<compile_context>
chip_gen: v7x
topology: tpu7x:2x2x1
jax: 0.10.0
libtpu: 0.0.40
codegen_flags: <defaults>
</compile_context>

<pallas_src>
import functools

import jax
import jax.numpy as jnp
from jax.experimental import pallas as pl
from jax.experimental.pallas import tpu as pltpu


# ----------------------------------------------------------------------------
# Fused kernel: B batch samples per grid step, everything VMEM-resident.
# ----------------------------------------------------------------------------
def _make_fused_kernel(*, B, npad, seg, mg, offs, cin, oc0, oc1, oc2, oc3):
    c12 = oc0 + oc1            # rows of the fused first matmul
    n_relu = oc0 + oc3         # output rows that get bias+ReLU (branch3 is a
                               # maxpool passthrough: no bias, no ReLU)

    def kernel(x_ref, mask_ref, sel_ref, w1_ref, w22_ref, w23_ref,
               b21_ref, b22_ref, bout_ref, o_ref,
               col1, col2, col3, y1m, y2m):
        f32, bf16 = jnp.float32, jnp.bfloat16
        nt = len(offs)

        # ---- im2col of x: col1[t*cin:(t+1)*cin, b*npad+p] = x[b, p+off_t] ---
        # x carries `mg` zero lanes on each side, so every write is full-width
        # (no stale lanes anywhere in col1 -> no scratch init needed).
        for b in range(B):
            for t, off in enumerate(offs):
                col1[t * cin:(t + 1) * cin, b * npad:(b + 1) * npad] = \
                    x_ref[b, :, mg + off: mg + off + npad]

        # ---- branch3: 3x3/s2 maxpool = max over the 9 stacked taps ----------
        pool = col1[0:cin, :]
        for t in range(1, nt):
            pool = jnp.maximum(pool, col1[t * cin:(t + 1) * cin, :])

        # ---- matmul 1 (K=9*cin): branch1 conv3x3 + branch2 conv1x1 fused ----
        r1 = jnp.dot(w1_ref[...], col1[...], preferred_element_type=f32)
        acc1 = r1[0:oc0, :]                                   # branch1, dense
        y1 = jnp.maximum(r1[oc0:c12, :] + b21_ref[...], 0.0) * mask_ref[...]
        y1 = y1.astype(bf16)                                  # (oc1, B*npad)

        # ---- stage y1 in a margin-padded scratch, build conv2 im2col --------
        for b in range(B):
            y1m[:, b * seg: b * seg + mg] = jnp.zeros((oc1, mg), bf16)
            y1m[:, b * seg + mg + npad:(b + 1) * seg] = jnp.zeros((oc1, mg), bf16)
            y1m[:, b * seg + mg: b * seg + mg + npad] = \
                y1[:, b * npad:(b + 1) * npad]
        for b in range(B):
            for t, off in enumerate(offs):
                col2[t * oc1:(t + 1) * oc1, b * npad:(b + 1) * npad] = \
                    y1m[:, b * seg + mg + off: b * seg + mg + off + npad]

        # ---- matmul 2 (K=9*oc1): branch2 conv2 3x3/s1/p1 ---------------------
        y2 = jnp.maximum(
            jnp.dot(w22_ref[...], col2[...], preferred_element_type=f32)
            + b22_ref[...], 0.0).astype(bf16)                 # (oc2, B*npad)

        for b in range(B):
            y2m[:, b * seg: b * seg + mg] = jnp.zeros((oc2, mg), bf16)
            y2m[:, b * seg + mg + npad:(b + 1) * seg] = jnp.zeros((oc2, mg), bf16)
            y2m[:, b * seg + mg: b * seg + mg + npad] = \
                y2[:, b * npad:(b + 1) * npad]
        for b in range(B):
            for t, off in enumerate(offs):
                col3[t * oc2:(t + 1) * oc2, b * npad:(b + 1) * npad] = \
                    y2m[:, b * seg + mg + off: b * seg + mg + off + npad]

        # ---- matmul 3 (K=9*oc2): branch2 conv3 3x3/s2 (dense) ----------------
        acc3 = jnp.dot(w23_ref[...], col3[...], preferred_element_type=f32)

        # ---- ONE fused stride-2 compaction matmul + ONE lane-dense store -----
        dense = jnp.concatenate(
            [acc1.astype(bf16), acc3.astype(bf16), pool], axis=0)
        out = jnp.dot(dense, sel_ref[...], preferred_element_type=f32)
        out = out + bout_ref[...]
        rows = jax.lax.broadcasted_iota(jnp.int32, out.shape, 0)
        out = jnp.where(rows < n_relu, jnp.maximum(out, 0.0), out)
        o_ref[0] = out

    return kernel


# ----------------------------------------------------------------------------
# ReductionAUnit forward (NCHW in / NCHW out).
# ----------------------------------------------------------------------------
def reduction_a_unit(x_nchw, params, *, block_n=2):
    n, cin, h, w = x_nchw.shape
    oc0 = params["b1_conv1"][0].shape[-1]
    oc1 = params["b2_conv1"][0].shape[-1]
    oc2 = params["b2_conv2"][0].shape[-1]
    oc3 = params["b2_conv3"][0].shape[-1]
    B = block_n
    assert n % B == 0, "batch must be divisible by block_n"

    gh, gw = h + 2, w + 2                      # 1-pixel padded grid
    npad = gh * gw
    ho, wo = (h - 3) // 2 + 1, (w - 3) // 2 + 1
    m_out = ho * wo
    mg = ((gw + 1 + 7) // 8) * 8               # small lane margin (>= gw+1)
    seg = npad + 2 * mg
    offs = tuple(dr * gw + dc for dr in (-1, 0, 1) for dc in (-1, 0, 1))
    c_total = oc0 + oc3 + cin

    # ---- input: NCHW -> (N, C, seg) bf16 with zero ring + lane margins ------
    xp = jnp.pad(x_nchw, ((0, 0), (0, 0), (1, 1), (1, 1))).reshape(n, cin, npad)
    xm = jnp.pad(xp, ((0, 0), (0, 0), (mg, mg))).astype(jnp.bfloat16)

    # ---- pad-ring mask (batched along lanes) --------------------------------
    mask1 = jnp.pad(jnp.ones((h, w), jnp.float32),
                    ((1, 1), (1, 1))).reshape(1, npad)
    mask = jnp.tile(mask1, (1, B))                              # (1, B*npad)

    # ---- block-diagonal stride-2 selection matrix (exact 0/1 in bf16) -------
    rows_s = 2 * jnp.arange(ho) + 2
    cols_s = 2 * jnp.arange(wo) + 2
    m_idx = (rows_s[:, None] * gw + cols_s[None, :]).reshape(-1)   # (m_out,)
    m_idx_b = (jnp.arange(B)[:, None] * npad + m_idx[None, :]).reshape(-1)
    sel = jax.nn.one_hot(m_idx_b, B * npad, dtype=jnp.bfloat16).T  # (B*npad, B*m_out)

    # ---- weights: fold BN scale, flatten taps into contraction, cast bf16 ---
    def fold_taps(whwio, scale):
        kh, kw, ci, co = whwio.shape
        wsc = whwio * scale.reshape(1, 1, 1, co)
        return jnp.transpose(wsc, (3, 0, 1, 2)).reshape(
            co, kh * kw * ci).astype(jnp.bfloat16)

    w_b1 = fold_taps(params["b1_conv1"][0], params["b1_conv1"][1])  # (oc0, 9cin)
    w_21c = fold_taps(params["b2_conv1"][0], params["b2_conv1"][1])  # (oc1, cin)
    w_21 = jnp.zeros((oc1, 9 * cin), jnp.bfloat16)
    w_21 = w_21.at[:, 4 * cin:5 * cin].set(w_21c)    # 1x1 conv -> centre tap
    w1 = jnp.concatenate([w_b1, w_21], axis=0)                      # (oc0+oc1, 9cin)
    w22 = fold_taps(params["b2_conv2"][0], params["b2_conv2"][1])   # (oc2, 9oc1)
    w23 = fold_taps(params["b2_conv3"][0], params["b2_conv3"][1])   # (oc3, 9oc2)

    b21 = params["b2_conv1"][2].reshape(-1, 1).astype(jnp.float32)
    b22 = params["b2_conv2"][2].reshape(-1, 1).astype(jnp.float32)
    bout = jnp.concatenate(
        [params["b1_conv1"][2].reshape(-1, 1),
         params["b2_conv3"][2].reshape(-1, 1),
         jnp.zeros((cin, 1), jnp.float32)], axis=0).astype(jnp.float32)

    kernel = _make_fused_kernel(B=B, npad=npad, seg=seg, mg=mg, offs=offs,
                                cin=cin, oc0=oc0, oc1=oc1, oc2=oc2, oc3=oc3)

    out = pl.pallas_call(
        kernel,
        out_shape=jax.ShapeDtypeStruct((n // B, c_total, B * m_out), jnp.float32),
        grid=(n // B,),
        in_specs=[
            pl.BlockSpec((B, cin, seg), lambda i: (i, 0, 0)),
            pl.BlockSpec((1, B * npad), lambda i: (0, 0)),
            pl.BlockSpec((B * npad, B * m_out), lambda i: (0, 0)),
            pl.BlockSpec((oc0 + oc1, 9 * cin), lambda i: (0, 0)),
            pl.BlockSpec((oc2, 9 * oc1), lambda i: (0, 0)),
            pl.BlockSpec((oc3, 9 * oc2), lambda i: (0, 0)),
            pl.BlockSpec((oc1, 1), lambda i: (0, 0)),
            pl.BlockSpec((oc2, 1), lambda i: (0, 0)),
            pl.BlockSpec((c_total, 1), lambda i: (0, 0)),
        ],
        out_specs=pl.BlockSpec((1, c_total, B * m_out), lambda i: (i, 0, 0)),
        scratch_shapes=[
            pltpu.VMEM((9 * cin, B * npad), jnp.bfloat16),   # im2col of x
            pltpu.VMEM((9 * oc1, B * npad), jnp.bfloat16),   # im2col of y1
            pltpu.VMEM((9 * oc2, B * npad), jnp.bfloat16),   # im2col of y2
            pltpu.VMEM((oc1, B * seg), jnp.bfloat16),        # margin-padded y1
            pltpu.VMEM((oc2, B * seg), jnp.bfloat16),        # margin-padded y2
        ],
        compiler_params=pltpu.CompilerParams(
            dimension_semantics=("parallel",)),
    )(xm, mask, sel, w1, w22, w23, b21, b22, bout)

    # lanes are [sample-within-block, spatial]: unpack and restore NCHW
    out = out.reshape(n // B, c_total, B, m_out).transpose(0, 2, 1, 3)
    return out.reshape(n, c_total, ho, wo)


# ----------------------------------------------------------------------------
# Deterministic synthetic parameters (Conv weight + folded BatchNorm)
# ----------------------------------------------------------------------------
def make_conv_params(key, cin, cout, ksize, bn_eps):
    k1, k2, k3, k4, k5 = jax.random.split(key, 5)
    w = jax.random.normal(k1, (ksize, ksize, cin, cout), jnp.float32) * 0.1
    gamma = jax.random.uniform(k2, (cout,), jnp.float32, 0.5, 1.5)
    beta = jax.random.normal(k3, (cout,), jnp.float32) * 0.1
    mean = jax.random.normal(k4, (cout,), jnp.float32) * 0.1
    var = jax.random.uniform(k5, (cout,), jnp.float32, 0.5, 1.5)
    scale = gamma / jnp.sqrt(var + bn_eps)          # BN folded into affine
    bias = beta - mean * scale
    return w, scale, bias


# ----------------------------------------------------------------------------
# Pure-JAX reference mirroring the kernel's numerics (scale folded into bf16
# weights, bf16 intermediates, f32 accumulation, bf16 rounding pre-compaction)
# ----------------------------------------------------------------------------
def _ref_conv_bn_relu(x, w, scale, bias, stride, padding, round_out=False):
    wsc = (w * scale.reshape(1, 1, 1, -1)).astype(jnp.bfloat16)
    y = jax.lax.conv_general_dilated(
        x.astype(jnp.bfloat16), wsc,
        window_strides=(stride, stride),
        padding=((padding, padding), (padding, padding)),
        dimension_numbers=("NCHW", "HWIO", "NCHW"),
        preferred_element_type=jnp.float32)
    if round_out:  # kernel compacts stride-2 outputs through a bf16 cast
        y = y.astype(jnp.bfloat16).astype(jnp.float32)
    y = y + bias.reshape(1, -1, 1, 1)
    return jnp.maximum(y, 0.0)


def _ref_maxpool(x):
    xb = x.astype(jnp.bfloat16).astype(jnp.float32)   # kernel pools bf16 x
    return jax.lax.reduce_window(xb, -jnp.inf, jax.lax.max,
                                 (1, 1, 3, 3), (1, 1, 2, 2), "VALID")


if __name__ == "__main__":
    key = jax.random.PRNGKey(0)
    N, Cin, H, W = 4, 8, 17, 17
    out_channels_list = (16, 8, 8, 16)   # Reduction-A: (oc0,) and (oc1,oc2,oc3)
    bn_eps = 1e-5

    kx, k1, k2, k3, k4 = jax.random.split(key, 5)
    x = jax.random.normal(kx, (N, Cin, H, W), jnp.float32)

    params = {
        "b1_conv1": make_conv_params(k1, Cin, out_channels_list[0], 3, bn_eps),
        "b2_conv1": make_conv_params(k2, Cin, out_channels_list[1], 1, bn_eps),
        "b2_conv2": make_conv_params(k3, out_channels_list[1],
                                     out_channels_list[2], 3, bn_eps),
        "b2_conv3": make_conv_params(k4, out_channels_list[2],
                                     out_channels_list[3], 3, bn_eps),
    }

    fwd = jax.jit(functools.partial(reduction_a_unit, params=params, block_n=2))
    y = fwd(x)
    jax.block_until_ready(y)

    Ho = (H - 3) // 2 + 1
    assert y.shape == (N, out_channels_list[0] + out_channels_list[3] + Cin,
                       Ho, Ho), y.shape

    r1 = _ref_conv_bn_relu(x, *params["b1_conv1"], 2, 0, round_out=True)
    r2 = _ref_conv_bn_relu(x, *params["b2_conv1"], 1, 0)
    r2 = _ref_conv_bn_relu(r2, *params["b2_conv2"], 1, 1)
    r2 = _ref_conv_bn_relu(r2, *params["b2_conv3"], 2, 0, round_out=True)
    r3 = _ref_maxpool(x)
    ref = jnp.concatenate([r1, r2, r3], axis=1)

    # tolerance sized for the bf16 MXU path (accumulation-order / rare bf16
    # rounding-boundary disagreements vs. XLA's conv).
    err = float(jnp.max(jnp.abs(y - ref)))
    assert jnp.allclose(y, ref, atol=1e-2, rtol=1e-2), err

    print("KERNEL_OK")
</pallas_src>

<mosaic_0001>
module attributes {stable_mosaic.version = 11 : i64} {
  func.func @kernel(%arg0: i32, %arg1: memref<2x8x409xbf16, #tpu.memory_space<vmem>>, %arg2: memref<1x722xf32, #tpu.memory_space<vmem>>, %arg3: memref<722x128xbf16, #tpu.memory_space<vmem>>, %arg4: memref<24x72xbf16, #tpu.memory_space<vmem>>, %arg5: memref<8x72xbf16, #tpu.memory_space<vmem>>, %arg6: memref<16x72xbf16, #tpu.memory_space<vmem>>, %arg7: memref<8x1xf32, #tpu.memory_space<vmem>>, %arg8: memref<8x1xf32, #tpu.memory_space<vmem>>, %arg9: memref<40x1xf32, #tpu.memory_space<vmem>>, %arg10: memref<1x40x128xf32, #tpu.memory_space<vmem>>, %arg11: memref<72x722xbf16, #tpu.memory_space<vmem>>, %arg12: memref<72x722xbf16, #tpu.memory_space<vmem>>, %arg13: memref<72x722xbf16, #tpu.memory_space<vmem>>, %arg14: memref<8x818xbf16, #tpu.memory_space<vmem>>, %arg15: memref<8x818xbf16, #tpu.memory_space<vmem>>) attributes {dimension_semantics = [#tpu.dimension_semantics<parallel>], iteration_bounds = array<i64: 2>, scalar_prefetch = 0 : i64, scratch_operands = 5 : i64, tpu.core_type = #tpu.core_type<tc>, window_params = [{transform_indices = @transform_0, window_bounds = array<i64: 2, 8, 409>}, {pipeline_mode = #tpu.pipeline_mode<synchronous>, transform_indices = @transform_1, window_bounds = array<i64: 1, 722>}, {pipeline_mode = #tpu.pipeline_mode<synchronous>, transform_indices = @transform_2, window_bounds = array<i64: 722, 128>}, {pipeline_mode = #tpu.pipeline_mode<synchronous>, transform_indices = @transform_3, window_bounds = array<i64: 24, 72>}, {pipeline_mode = #tpu.pipeline_mode<synchronous>, transform_indices = @transform_4, window_bounds = array<i64: 8, 72>}, {pipeline_mode = #tpu.pipeline_mode<synchronous>, transform_indices = @transform_5, window_bounds = array<i64: 16, 72>}, {pipeline_mode = #tpu.pipeline_mode<synchronous>, transform_indices = @transform_6, window_bounds = array<i64: 8, 1>}, {pipeline_mode = #tpu.pipeline_mode<synchronous>, transform_indices = @transform_7, window_bounds = array<i64: 8, 1>}, {pipeline_mode = #tpu.pipeline_mode<synchronous>, transform_indices = @transform_8, window_bounds = array<i64: 40, 1>}, {transform_indices = @transform_9, window_bounds = array<i64: 1, 40, 128>}]} {
    %c0 = arith.constant 0 : index
    %c0_0 = arith.constant 0 : index
    %c4 = arith.constant 4 : index
    %0 = vector.load %arg1[%c0, %c0_0, %c4] : memref<2x8x409xbf16, #tpu.memory_space<vmem>>, vector<1x8x361xbf16>
    %1 = vector.shape_cast %0 : vector<1x8x361xbf16> to vector<8x361xbf16>
    %c0_1 = arith.constant 0 : index
    %c0_2 = arith.constant 0 : index
    %2 = vector.load %arg11[%c0_1, %c0_2] : memref<72x722xbf16, #tpu.memory_space<vmem>>, vector<8x361xbf16>
    tpu.vector_store %arg11[%c0_1, %c0_2], %1 {strides = array<i32>} : memref<72x722xbf16, #tpu.memory_space<vmem>>, vector<8x361xbf16>,
    %c0_3 = arith.constant 0 : index
    %c0_4 = arith.constant 0 : index
    %c5 = arith.constant 5 : index
    %3 = vector.load %arg1[%c0_3, %c0_4, %c5] : memref<2x8x409xbf16, #tpu.memory_space<vmem>>, vector<1x8x361xbf16>
    %4 = vector.shape_cast %3 : vector<1x8x361xbf16> to vector<8x361xbf16>
    %c8 = arith.constant 8 : index
    %c0_5 = arith.constant 0 : index
    %5 = vector.load %arg11[%c8, %c0_5] : memref<72x722xbf16, #tpu.memory_space<vmem>>, vector<8x361xbf16>
    tpu.vector_store %arg11[%c8, %c0_5], %4 {strides = array<i32>} : memref<72x722xbf16, #tpu.memory_space<vmem>>, vector<8x361xbf16>,
    %c0_6 = arith.constant 0 : index
    %c0_7 = arith.constant 0 : index
    %c6 = arith.constant 6 : index
    %6 = vector.load %arg1[%c0_6, %c0_7, %c6] : memref<2x8x409xbf16, #tpu.memory_space<vmem>>, vector<1x8x361xbf16>
    %7 = vector.shape_cast %6 : vector<1x8x361xbf16> to vector<8x361xbf16>
    %c16 = arith.constant 16 : index
    %c0_8 = arith.constant 0 : index
    %8 = vector.load %arg11[%c16, %c0_8] : memref<72x722xbf16, #tpu.memory_space<vmem>>, vector<8x361xbf16>
    tpu.vector_store %arg11[%c16, %c0_8], %7 {strides = array<i32>} : memref<72x722xbf16, #tpu.memory_space<vmem>>, vector<8x361xbf16>,
    %c0_9 = arith.constant 0 : index
    %c0_10 = arith.constant 0 : index
    %c23 = arith.constant 23 : index
    %9 = vector.load %arg1[%c0_9, %c0_10, %c23] : memref<2x8x409xbf16, #tpu.memory_space<vmem>>, vector<1x8x361xbf16>
    %10 = vector.shape_cast %9 : vector<1x8x361xbf16> to vector<8x361xbf16>
    %c24 = arith.constant 24 : index
    %c0_11 = arith.constant 0 : index
    %11 = vector.load %arg11[%c24, %c0_11] : memref<72x722xbf16, #tpu.memory_space<vmem>>, vector<8x361xbf16>
    tpu.vector_store %arg11[%c24, %c0_11], %10 {strides = array<i32>} : memref<72x722xbf16, #tpu.memory_space<vmem>>, vector<8x361xbf16>,
    %c0_12 = arith.constant 0 : index
    %c0_13 = arith.constant 0 : index
    %c24_14 = arith.constant 24 : index
    %12 = vector.load %arg1[%c0_12, %c0_13, %c24_14] : memref<2x8x409xbf16, #tpu.memory_space<vmem>>, vector<1x8x361xbf16>
    %13 = vector.shape_cast %12 : vector<1x8x361xbf16> to vector<8x361xbf16>
    %c32 = arith.constant 32 : index
    %c0_15 = arith.constant 0 : index
    %14 = vector.load %arg11[%c32, %c0_15] : memref<72x722xbf16, #tpu.memory_space<vmem>>, vector<8x361xbf16>
    tpu.vector_store %arg11[%c32, %c0_15], %13 {strides = array<i32>} : memref<72x722xbf16, #tpu.memory_space<vmem>>, vector<8x361xbf16>,
    %c0_16 = arith.constant 0 : index
    %c0_17 = arith.constant 0 : index
    %c25 = arith.constant 25 : index
    %15 = vector.load %arg1[%c0_16, %c0_17, %c25] : memref<2x8x409xbf16, #tpu.memory_space<vmem>>, vector<1x8x361xbf16>
    %16 = vector.shape_cast %15 : vector<1x8x361xbf16> to vector<8x361xbf16>
    %c40 = arith.constant 40 : index
    %c0_18 = arith.constant 0 : index
    %17 = vector.load %arg11[%c40, %c0_18] : memref<72x722xbf16, #tpu.memory_space<vmem>>, vector<8x361xbf16>
    tpu.vector_store %arg11[%c40, %c0_18], %16 {strides = array<i32>} : memref<72x722xbf16, #tpu.memory_space<vmem>>, vector<8x361xbf16>,
    %c0_19 = arith.constant 0 : index
    %c0_20 = arith.constant 0 : index
    %c42 = arith.constant 42 : index
    %18 = vector.load %arg1[%c0_19, %c0_20, %c42] : memref<2x8x409xbf16, #tpu.memory_space<vmem>>, vector<1x8x361xbf16>
    %19 = vector.shape_cast %18 : vector<1x8x361xbf16> to vector<8x361xbf16>
    %c48 = arith.constant 48 : index
    %c0_21 = arith.constant 0 : index
    %20 = vector.load %arg11[%c48, %c0_21] : memref<72x722xbf16, #tpu.memory_space<vmem>>, vector<8x361xbf16>
    tpu.vector_store %arg11[%c48, %c0_21], %19 {strides = array<i32>} : memref<72x722xbf16, #tpu.memory_space<vmem>>, vector<8x361xbf16>,
    %c0_22 = arith.constant 0 : index
    %c0_23 = arith.constant 0 : index
    %c43 = arith.constant 43 : index
    %21 = vector.load %arg1[%c0_22, %c0_23, %c43] : memref<2x8x409xbf16, #tpu.memory_space<vmem>>, vector<1x8x361xbf16>
    %22 = vector.shape_cast %21 : vector<1x8x361xbf16> to vector<8x361xbf16>
    %c56 = arith.constant 56 : index
    %c0_24 = arith.constant 0 : index
    %23 = vector.load %arg11[%c56, %c0_24] : memref<72x722xbf16, #tpu.memory_space<vmem>>, vector<8x361xbf16>
    tpu.vector_store %arg11[%c56, %c0_24], %22 {strides = array<i32>} : memref<72x722xbf16, #tpu.memory_space<vmem>>, vector<8x361xbf16>,
    %c0_25 = arith.constant 0 : index
    %c0_26 = arith.constant 0 : index
    %c44 = arith.constant 44 : index
    %24 = vector.load %arg1[%c0_25, %c0_26, %c44] : memref<2x8x409xbf16, #tpu.memory_space<vmem>>, vector<1x8x361xbf16>
    %25 = vector.shape_cast %24 : vector<1x8x361xbf16> to vector<8x361xbf16>
    %c64 = arith.constant 64 : index
    %c0_27 = arith.constant 0 : index
    %26 = vector.load %arg11[%c64, %c0_27] : memref<72x722xbf16, #tpu.memory_space<vmem>>, vector<8x361xbf16>
    tpu.vector_store %arg11[%c64, %c0_27], %25 {strides = array<i32>} : memref<72x722xbf16, #tpu.memory_space<vmem>>, vector<8x361xbf16>,
    %c1 = arith.constant 1 : index
    %c0_28 = arith.constant 0 : index
    %c4_29 = arith.constant 4 : index
    %27 = vector.load %arg1[%c1, %c0_28, %c4_29] : memref<2x8x409xbf16, #tpu.memory_space<vmem>>, vector<1x8x361xbf16>
    %28 = vector.shape_cast %27 : vector<1x8x361xbf16> to vector<8x361xbf16>
    %c0_30 = arith.constant 0 : index
    %c361 = arith.constant 361 : index
    %29 = vector.load %arg11[%c0_30, %c361] : memref<72x722xbf16, #tpu.memory_space<vmem>>, vector<8x361xbf16>
    tpu.vector_store %arg11[%c0_30, %c361], %28 {strides = array<i32>} : memref<72x722xbf16, #tpu.memory_space<vmem>>, vector<8x361xbf16>,
    %c1_31 = arith.constant 1 : index
    %c0_32 = arith.constant 0 : index
    %c5_33 = arith.constant 5 : index
    %30 = vector.load %arg1[%c1_31, %c0_32, %c5_33] : memref<2x8x409xbf16, #tpu.memory_space<vmem>>, vector<1x8x361xbf16>
    %31 = vector.shape_cast %30 : vector<1x8x361xbf16> to vector<8x361xbf16>
    %c8_34 = arith.constant 8 : index
    %c361_35 = arith.constant 361 : index
    %32 = vector.load %arg11[%c8_34, %c361_35] : memref<72x722xbf16, #tpu.memory_space<vmem>>, vector<8x361xbf16>
    tpu.vector_store %arg11[%c8_34, %c361_35], %31 {strides = array<i32>} : memref<72x722xbf16, #tpu.memory_space<vmem>>, vector<8x361xbf16>,
    %c1_36 = arith.constant 1 : index
    %c0_37 = arith.constant 0 : index
    %c6_38 = arith.constant 6 : index
    %33 = vector.load %arg1[%c1_36, %c0_37, %c6_38] : memref<2x8x409xbf16, #tpu.memory_space<vmem>>, vector<1x8x361xbf16>
    %34 = vector.shape_cast %33 : vector<1x8x361xbf16> to vector<8x361xbf16>
    %c16_39 = arith.constant 16 : index
    %c361_40 = arith.constant 361 : index
    %35 = vector.load %arg11[%c16_39, %c361_40] : memref<72x722xbf16, #tpu.memory_space<vmem>>, vector<8x361xbf16>
    tpu.vector_store %arg11[%c16_39, %c361_40], %34 {strides = array<i32>} : memref<72x722xbf16, #tpu.memory_space<vmem>>, vector<8x361xbf16>,
    %c1_41 = arith.constant 1 : index
    %c0_42 = arith.constant 0 : index
    %c23_43 = arith.constant 23 : index
    %36 = vector.load %arg1[%c1_41, %c0_42, %c23_43] : memref<2x8x409xbf16, #tpu.memory_space<vmem>>, vector<1x8x361xbf16>
    %37 = vector.shape_cast %36 : vector<1x8x361xbf16> to vector<8x361xbf16>
    %c24_44 = arith.constant 24 : index
    %c361_45 = arith.constant 361 : index
    %38 = vector.load %arg11[%c24_44, %c361_45] : memref<72x722xbf16, #tpu.memory_space<vmem>>, vector<8x361xbf16>
    tpu.vector_store %arg11[%c24_44, %c361_45], %37 {strides = array<i32>} : memref<72x722xbf16, #tpu.memory_space<vmem>>, vector<8x361xbf16>,
    %c1_46 = arith.constant 1 : index
    %c0_47 = arith.constant 0 : index
    %c24_48 = arith.constant 24 : index
    %39 = vector.load %arg1[%c1_46, %c0_47, %c24_48] : memref<2x8x409xbf16, #tpu.memory_space<vmem>>, vector<1x8x361xbf16>
    %40 = vector.shape_cast %39 : vector<1x8x361xbf16> to vector<8x361xbf16>
    %c32_49 = arith.constant 32 : index
    %c361_50 = arith.constant 361 : index
    %41 = vector.load %arg11[%c32_49, %c361_50] : memref<72x722xbf16, #tpu.memory_space<vmem>>, vector<8x361xbf16>
    tpu.vector_store %arg11[%c32_49, %c361_50], %40 {strides = array<i32>} : memref<72x722xbf16, #tpu.memory_space<vmem>>, vector<8x361xbf16>,
    %c1_51 = arith.constant 1 : index
    %c0_52 = arith.constant 0 : index
    %c25_53 = arith.constant 25 : index
    %42 = vector.load %arg1[%c1_51, %c0_52, %c25_53] : memref<2x8x409xbf16, #tpu.memory_space<vmem>>, vector<1x8x361xbf16>
    %43 = vector.shape_cast %42 : vector<1x8x361xbf16> to vector<8x361xbf16>
    %c40_54 = arith.constant 40 : index
    %c361_55 = arith.constant 361 : index
    %44 = vector.load %arg11[%c40_54, %c361_55] : memref<72x722xbf16, #tpu.memory_space<vmem>>, vector<8x361xbf16>
    tpu.vector_store %arg11[%c40_54, %c361_55], %43 {strides = array<i32>} : memref<72x722xbf16, #tpu.memory_space<vmem>>, vector<8x361xbf16>,
    %c1_56 = arith.constant 1 : index
    %c0_57 = arith.constant 0 : index
    %c42_58 = arith.constant 42 : index
    %45 = vector.load %arg1[%c1_56, %c0_57, %c42_58] : memref<2x8x409xbf16, #tpu.memory_space<vmem>>, vector<1x8x361xbf16>
    %46 = vector.shape_cast %45 : vector<1x8x361xbf16> to vector<8x361xbf16>
    %c48_59 = arith.constant 48 : index
    %c361_60 = arith.constant 361 : index
    %47 = vector.load %arg11[%c48_59, %c361_60] : memref<72x722xbf16, #tpu.memory_space<vmem>>, vector<8x361xbf16>
    tpu.vector_store %arg11[%c48_59, %c361_60], %46 {strides = array<i32>} : memref<72x722xbf16, #tpu.memory_space<vmem>>, vector<8x361xbf16>,
    %c1_61 = arith.constant 1 : index
    %c0_62 = arith.constant 0 : index
    %c43_63 = arith.constant 43 : index
    %48 = vector.load %arg1[%c1_61, %c0_62, %c43_63] : memref<2x8x409xbf16, #tpu.memory_space<vmem>>, vector<1x8x361xbf16>
    %49 = vector.shape_cast %48 : vector<1x8x361xbf16> to vector<8x361xbf16>
    %c56_64 = arith.constant 56 : index
    %c361_65 = arith.constant 361 : index
    %50 = vector.load %arg11[%c56_64, %c361_65] : memref<72x722xbf16, #tpu.memory_space<vmem>>, vector<8x361xbf16>
    tpu.vector_store %arg11[%c56_64, %c361_65], %49 {strides = array<i32>} : memref<72x722xbf16, #tpu.memory_space<vmem>>, vector<8x361xbf16>,
    %c1_66 = arith.constant 1 : index
    %c0_67 = arith.constant 0 : index
    %c44_68 = arith.constant 44 : index
    %51 = vector.load %arg1[%c1_66, %c0_67, %c44_68] : memref<2x8x409xbf16, #tpu.memory_space<vmem>>, vector<1x8x361xbf16>
    %52 = vector.shape_cast %51 : vector<1x8x361xbf16> to vector<8x361xbf16>
    %c64_69 = arith.constant 64 : index
    %c361_70 = arith.constant 361 : index
    %53 = vector.load %arg11[%c64_69, %c361_70] : memref<72x722xbf16, #tpu.memory_space<vmem>>, vector<8x361xbf16>
    tpu.vector_store %arg11[%c64_69, %c361_70], %52 {strides = array<i32>} : memref<72x722xbf16, #tpu.memory_space<vmem>>, vector<8x361xbf16>,
    %c0_71 = arith.constant 0 : index
    %c0_72 = arith.constant 0 : index
    %54 = vector.load %arg11[%c0_71, %c0_72] : memref<72x722xbf16, #tpu.memory_space<vmem>>, vector<8x722xbf16>
    %c8_73 = arith.constant 8 : index
    %c0_74 = arith.constant 0 : index
    %55 = vector.load %arg11[%c8_73, %c0_74] : memref<72x722xbf16, #tpu.memory_space<vmem>>, vector<8x722xbf16>
    %56 = arith.maximumf %54, %55 : vector<8x722xbf16>
    %c16_75 = arith.constant 16 : index
    %c0_76 = arith.constant 0 : index
    %57 = vector.load %arg11[%c16_75, %c0_76] : memref<72x722xbf16, #tpu.memory_space<vmem>>, vector<8x722xbf16>
    %58 = arith.maximumf %56, %57 : vector<8x722xbf16>
    %c24_77 = arith.constant 24 : index
    %c0_78 = arith.constant 0 : index
    %59 = vector.load %arg11[%c24_77, %c0_78] : memref<72x722xbf16, #tpu.memory_space<vmem>>, vector<8x722xbf16>
    %60 = arith.maximumf %58, %59 : vector<8x722xbf16>
    %c32_79 = arith.constant 32 : index
    %c0_80 = arith.constant 0 : index
    %61 = vector.load %arg11[%c32_79, %c0_80] : memref<72x722xbf16, #tpu.memory_space<vmem>>, vector<8x722xbf16>
    %62 = arith.maximumf %60, %61 : vector<8x722xbf16>
    %c40_81 = arith.constant 40 : index
    %c0_82 = arith.constant 0 : index
    %63 = vector.load %arg11[%c40_81, %c0_82] : memref<72x722xbf16, #tpu.memory_space<vmem>>, vector<8x722xbf16>
    %64 = arith.maximumf %62, %63 : vector<8x722xbf16>
    %c48_83 = arith.constant 48 : index
    %c0_84 = arith.constant 0 : index
    %65 = vector.load %arg11[%c48_83, %c0_84] : memref<72x722xbf16, #tpu.memory_space<vmem>>, vector<8x722xbf16>
    %66 = arith.maximumf %64, %65 : vector<8x722xbf16>
    %c56_85 = arith.constant 56 : index
    %c0_86 = arith.constant 0 : index
    %67 = vector.load %arg11[%c56_85, %c0_86] : memref<72x722xbf16, #tpu.memory_space<vmem>>, vector<8x722xbf16>
    %68 = arith.maximumf %66, %67 : vector<8x722xbf16>
    %c64_87 = arith.constant 64 : index
    %c0_88 = arith.constant 0 : index
    %69 = vector.load %arg11[%c64_87, %c0_88] : memref<72x722xbf16, #tpu.memory_space<vmem>>, vector<8x722xbf16>
    %70 = arith.maximumf %68, %69 : vector<8x722xbf16>
    %c0_89 = arith.constant 0 : index
    %c0_90 = arith.constant 0 : index
    %71 = vector.load %arg4[%c0_89, %c0_90] : memref<24x72xbf16, #tpu.memory_space<vmem>>, vector<24x72xbf16>
    %c0_91 = arith.constant 0 : index
    %c0_92 = arith.constant 0 : index
    %72 = vector.load %arg11[%c0_91, %c0_92] : memref<72x722xbf16, #tpu.memory_space<vmem>>, vector<72x722xbf16>
    %cst = arith.constant dense<0.000000e+00> : vector<24x722xf32>
    %73 = tpu.matmul %71, %72, %cst {dimension_numbers = #tpu.dot_dimension_numbers<[1], [0], [0], [1], [0, 0, 1, 1], [], []>} : vector<24x72xbf16>, vector<72x722xbf16>, vector<24x722xf32> -> vector<24x722xf32>
    %74 = vector.extract_strided_slice %73 {offsets = [0, 0], sizes = [16, 722], strides = [1, 1]} : vector<24x722xf32> to vector<16x722xf32>
    %75 = vector.extract_strided_slice %73 {offsets = [16, 0], sizes = [8, 722], strides = [1, 1]} : vector<24x722xf32> to vector<8x722xf32>
    %c0_93 = arith.constant 0 : index
    %c0_94 = arith.constant 0 : index
    %76 = vector.load %arg7[%c0_93, %c0_94] : memref<8x1xf32, #tpu.memory_space<vmem>>, vector<8x1xf32>
    %77 = vector.broadcast %76 : vector<8x1xf32> to vector<8x722xf32>
    %78 = arith.addf %75, %77 : vector<8x722xf32>
    %cst_95 = arith.constant 0.000000e+00 : f32
    %79 = vector.broadcast %cst_95 : f32 to vector<8x722xf32>
    %80 = arith.maximumf %78, %79 : vector<8x722xf32>
    %c0_96 = arith.constant 0 : index
    %c0_97 = arith.constant 0 : index
    %81 = vector.load %arg2[%c0_96, %c0_97] : memref<1x722xf32, #tpu.memory_space<vmem>>, vector<1x722xf32>
    %82 = vector.broadcast %81 : vector<1x722xf32> to vector<8x722xf32>
    %83 = arith.mulf %80, %82 : vector<8x722xf32>
    %84 = arith.truncf %83 : vector<8x722xf32> to vector<8x722xbf16>
    %cst_98 = arith.constant 0.000000e+00 : bf16
    %85 = vector.broadcast %cst_98 : bf16 to vector<8x24xbf16>
    %c0_99 = arith.constant 0 : index
    %c0_100 = arith.constant 0 : index
    %86 = vector.load %arg14[%c0_99, %c0_100] : memref<8x818xbf16, #tpu.memory_space<vmem>>, vector<8x24xbf16>
    tpu.vector_store %arg14[%c0_99, %c0_100], %85 {strides = array<i32>} : memref<8x818xbf16, #tpu.memory_space<vmem>>, vector<8x24xbf16>,
    %cst_101 = arith.constant 0.000000e+00 : bf16
    %87 = vector.broadcast %cst_101 : bf16 to vector<8x24xbf16>
    %c0_102 = arith.constant 0 : index
    %c385 = arith.constant 385 : index
    %88 = vector.load %arg14[%c0_102, %c385] : memref<8x818xbf16, #tpu.memory_space<vmem>>, vector<8x24xbf16>
    tpu.vector_store %arg14[%c0_102, %c385], %87 {strides = array<i32>} : memref<8x818xbf16, #tpu.memory_space<vmem>>, vector<8x24xbf16>,
    %89 = vector.extract_strided_slice %84 {offsets = [0, 0], sizes = [8, 361], strides = [1, 1]} : vector<8x722xbf16> to vector<8x361xbf16>
    %c0_103 = arith.constant 0 : index
    %c24_104 = arith.constant 24 : index
    %90 = vector.load %arg14[%c0_103, %c24_104] : memref<8x818xbf16, #tpu.memory_space<vmem>>, vector<8x361xbf16>
    tpu.vector_store %arg14[%c0_103, %c24_104], %89 {strides = array<i32>} : memref<8x818xbf16, #tpu.memory_space<vmem>>, vector<8x361xbf16>,
    %cst_105 = arith.constant 0.000000e+00 : bf16
    %91 = vector.broadcast %cst_105 : bf16 to vector<8x24xbf16>
    %c0_106 = arith.constant 0 : index
    %c409 = arith.constant 409 : index
    %92 = vector.load %arg14[%c0_106, %c409] : memref<8x818xbf16, #tpu.memory_space<vmem>>, vector<8x24xbf16>
    tpu.vector_store %arg14[%c0_106, %c409], %91 {strides = array<i32>} : memref<8x818xbf16, #tpu.memory_space<vmem>>, vector<8x24xbf16>,
    %cst_107 = arith.constant 0.000000e+00 : bf16
    %93 = vector.broadcast %cst_107 : bf16 to vector<8x24xbf16>
    %c0_108 = arith.constant 0 : index
    %c794 = arith.constant 794 : index
    %94 = vector.load %arg14[%c0_108, %c794] : memref<8x818xbf16, #tpu.memory_space<vmem>>, vector<8x24xbf16>
    tpu.vector_store %arg14[%c0_108, %c794], %93 {strides = array<i32>} : memref<8x818xbf16, #tpu.memory_space<vmem>>, vector<8x24xbf16>,
    %95 = vector.extract_strided_slice %84 {offsets = [0, 361], sizes = [8, 361], strides = [1, 1]} : vector<8x722xbf16> to vector<8x361xbf16>
    %c0_109 = arith.constant 0 : index
    %c433 = arith.constant 433 : index
    %96 = vector.load %arg14[%c0_109, %c433] : memref<8x818xbf16, #tpu.memory_space<vmem>>, vector<8x361xbf16>
    tpu.vector_store %arg14[%c0_109, %c433], %95 {strides = array<i32>} : memref<8x818xbf16, #tpu.memory_space<vmem>>, vector<8x361xbf16>,
    %c0_110 = arith.constant 0 : index
    %c4_111 = arith.constant 4 : index
    %97 = vector.load %arg14[%c0_110, %c4_111] : memref<8x818xbf16, #tpu.memory_space<vmem>>, vector<8x361xbf16>
    %c0_112 = arith.constant 0 : index
    %c0_113 = arith.constant 0 : index
    %98 = vector.load %arg12[%c0_112, %c0_113] : memref<72x722xbf16, #tpu.memory_space<vmem>>, vector<8x361xbf16>
    tpu.vector_store %arg12[%c0_112, %c0_113], %97 {strides = array<i32>} : memref<72x722xbf16, #tpu.memory_space<vmem>>, vector<8x361xbf16>,
    %c0_114 = arith.constant 0 : index
    %c5_115 = arith.constant 5 : index
    %99 = vector.load %arg14[%c0_114, %c5_115] : memref<8x818xbf16, #tpu.memory_space<vmem>>, vector<8x361xbf16>
    %c8_116 = arith.constant 8 : index
    %c0_117 = arith.constant 0 : index
    %100 = vector.load %arg12[%c8_116, %c0_117] : memref<72x722xbf16, #tpu.memory_space<vmem>>, vector<8x361xbf16>
    tpu.vector_store %arg12[%c8_116, %c0_117], %99 {strides = array<i32>} : memref<72x722xbf16, #tpu.memory_space<vmem>>, vector<8x361xbf16>,
    %c0_118 = arith.constant 0 : index
    %c6_119 = arith.constant 6 : index
    %101 = vector.load %arg14[%c0_118, %c6_119] : memref<8x818xbf16, #tpu.memory_space<vmem>>, vector<8x361xbf16>
    %c16_120 = arith.constant 16 : index
    %c0_121 = arith.constant 0 : index
    %102 = vector.load %arg12[%c16_120, %c0_121] : memref<72x722xbf16, #tpu.memory_space<vmem>>, vector<8x361xbf16>
    tpu.vector_store %arg12[%c16_120, %c0_121], %101 {strides = array<i32>} : memref<72x722xbf16, #tpu.memory_space<vmem>>, vector<8x361xbf16>,
    %c0_122 = arith.constant 0 : index
    %c23_123 = arith.constant 23 : index
    %103 = vector.load %arg14[%c0_122, %c23_123] : memref<8x818xbf16, #tpu.memory_space<vmem>>, vector<8x361xbf16>
    %c24_124 = arith.constant 24 : index
    %c0_125 = arith.constant 0 : index
    %104 = vector.load %arg12[%c24_124, %c0_125] : memref<72x722xbf16, #tpu.memory_space<vmem>>, vector<8x361xbf16>
    tpu.vector_store %arg12[%c24_124, %c0_125], %103 {strides = array<i32>} : memref<72x722xbf16, #tpu.memory_space<vmem>>, vector<8x361xbf16>,
    %c0_126 = arith.constant 0 : index
    %c24_127 = arith.constant 24 : index
    %105 = vector.load %arg14[%c0_126, %c24_127] : memref<8x818xbf16, #tpu.memory_space<vmem>>, vector<8x361xbf16>
    %c32_128 = arith.constant 32 : index
    %c0_129 = arith.constant 0 : index
    %106 = vector.load %arg12[%c32_128, %c0_129] : memref<72x722xbf16, #tpu.memory_space<vmem>>, vector<8x361xbf16>
    tpu.vector_store %arg12[%c32_128, %c0_129], %105 {strides = array<i32>} : memref<72x722xbf16, #tpu.memory_space<vmem>>, vector<8x361xbf16>,
    %c0_130 = arith.constant 0 : index
    %c25_131 = arith.constant 25 : index
    %107 = vector.load %arg14[%c0_130, %c25_131] : memref<8x818xbf16, #tpu.memory_space<vmem>>, vector<8x361xbf16>
    %c40_132 = arith.constant 40 : index
    %c0_133 = arith.constant 0 : index
    %108 = vector.load %arg12[%c40_132, %c0_133] : memref<72x722xbf16, #tpu.memory_space<vmem>>, vector<8x361xbf16>
    tpu.vector_store %arg12[%c40_132, %c0_133], %107 {strides = array<i32>} : memref<72x722xbf16, #tpu.memory_space<vmem>>, vector<8x361xbf16>,
    %c0_134 = arith.constant 0 : index
    %c42_135 = arith.constant 42 : index
    %109 = vector.load %arg14[%c0_134, %c42_135] : memref<8x818xbf16, #tpu.memory_space<vmem>>, vector<8x361xbf16>
    %c48_136 = arith.constant 48 : index
    %c0_137 = arith.constant 0 : index
    %110 = vector.load %arg12[%c48_136, %c0_137] : memref<72x722xbf16, #tpu.memory_space<vmem>>, vector<8x361xbf16>
    tpu.vector_store %arg12[%c48_136, %c0_137], %109 {strides = array<i32>} : memref<72x722xbf16, #tpu.memory_space<vmem>>, vector<8x361xbf16>,
    %c0_138 = arith.constant 0 : index
    %c43_139 = arith.constant 43 : index
    %111 = vector.load %arg14[%c0_138, %c43_139] : memref<8x818xbf16, #tpu.memory_space<vmem>>, vector<8x361xbf16>
    %c56_140 = arith.constant 56 : index
    %c0_141 = arith.constant 0 : index
    %112 = vector.load %arg12[%c56_140, %c0_141] : memref<72x722xbf16, #tpu.memory_space<vmem>>, vector<8x361xbf16>
    tpu.vector_store %arg12[%c56_140, %c0_141], %111 {strides = array<i32>} : memref<72x722xbf16, #tpu.memory_space<vmem>>, vector<8x361xbf16>,
    %c0_142 = arith.constant 0 : index
    %c44_143 = arith.constant 44 : index
    %113 = vector.load %arg14[%c0_142, %c44_143] : memref<8x818xbf16, #tpu.memory_space<vmem>>, vector<8x361xbf16>
    %c64_144 = arith.constant 64 : index
    %c0_145 = arith.constant 0 : index
    %114 = vector.load %arg12[%c64_144, %c0_145] : memref<72x722xbf16, #tpu.memory_space<vmem>>, vector<8x361xbf16>
    tpu.vector_store %arg12[%c64_144, %c0_145], %113 {strides = array<i32>} : memref<72x722xbf16, #tpu.memory_space<vmem>>, vector<8x361xbf16>,
    %c0_146 = arith.constant 0 : index
    %c413 = arith.constant 413 : index
    %115 = vector.load %arg14[%c0_146, %c413] : memref<8x818xbf16, #tpu.memory_space<vmem>>, vector<8x361xbf16>
    %c0_147 = arith.constant 0 : index
    %c361_148 = arith.constant 361 : index
    %116 = vector.load %arg12[%c0_147, %c361_148] : memref<72x722xbf16, #tpu.memory_space<vmem>>, vector<8x361xbf16>
    tpu.vector_store %arg12[%c0_147, %c361_148], %115 {strides = array<i32>} : memref<72x722xbf16, #tpu.memory_space<vmem>>, vector<8x361xbf16>,
    %c0_149 = arith.constant 0 : index
    %c414 = arith.constant 414 : index
    %117 = vector.load %arg14[%c0_149, %c414] : memref<8x818xbf16, #tpu.memory_space<vmem>>, vector<8x361xbf16>
    %c8_150 = arith.constant 8 : index
    %c361_151 = arith.constant 361 : index
    %118 = vector.load %arg12[%c8_150, %c361_151] : memref<72x722xbf16, #tpu.memory_space<vmem>>, vector<8x361xbf16>
    tpu.vector_store %arg12[%c8_150, %c361_151], %117 {strides = array<i32>} : memref<72x722xbf16, #tpu.memory_space<vmem>>, vector<8x361xbf16>,
    %c0_152 = arith.constant 0 : index
    %c415 = arith.constant 415 : index
    %119 = vector.load %arg14[%c0_152, %c415] : memref<8x818xbf16, #tpu.memory_space<vmem>>, vector<8x361xbf16>
    %c16_153 = arith.constant 16 : index
    %c361_154 = arith.constant 361 : index
    %120 = vector.load %arg12[%c16_153, %c361_154] : memref<72x722xbf16, #tpu.memory_space<vmem>>, vector<8x361xbf16>
    tpu.vector_store %arg12[%c16_153, %c361_154], %119 {strides = array<i32>} : memref<72x722xbf16, #tpu.memory_space<vmem>>, vector<8x361xbf16>,
    %c0_155 = arith.constant 0 : index
    %c432 = arith.constant 432 : index
    %121 = vector.load %arg14[%c0_155, %c432] : memref<8x818xbf16, #tpu.memory_space<vmem>>, vector<8x361xbf16>
    %c24_156 = arith.constant 24 : index
    %c361_157 = arith.constant 361 : index
    %122 = vector.load %arg12[%c24_156, %c361_157] : memref<72x722xbf16, #tpu.memory_space<vmem>>, vector<8x361xbf16>
    tpu.vector_store %arg12[%c24_156, %c361_157], %121 {strides = array<i32>} : memref<72x722xbf16, #tpu.memory_space<vmem>>, vector<8x361xbf16>,
    %c0_158 = arith.constant 0 : index
    %c433_159 = arith.constant 433 : index
    %123 = vector.load %arg14[%c0_158, %c433_159] : memref<8x818xbf16, #tpu.memory_space<vmem>>, vector<8x361xbf16>
    %c32_160 = arith.constant 32 : index
    %c361_161 = arith.constant 361 : index
    %124 = vector.load %arg12[%c32_160, %c361_161] : memref<72x722xbf16, #tpu.memory_space<vmem>>, vector<8x361xbf16>
    tpu.vector_store %arg12[%c32_160, %c361_161], %123 {strides = array<i32>} : memref<72x722xbf16, #tpu.memory_space<vmem>>, vector<8x361xbf16>,
    %c0_162 = arith.constant 0 : index
    %c434 = arith.constant 434 : index
    %125 = vector.load %arg14[%c0_162, %c434] : memref<8x818xbf16, #tpu.memory_space<vmem>>, vector<8x361xbf16>
    %c40_163 = arith.constant 40 : index
    %c361_164 = arith.constant 361 : index
    %126 = vector.load %arg12[%c40_163, %c361_164] : memref<72x722xbf16, #tpu.memory_space<vmem>>, vector<8x361xbf16>
    tpu.vector_store %arg12[%c40_163, %c361_164], %125 {strides = array<i32>} : memref<72x722xbf16, #tpu.memory_space<vmem>>, vector<8x361xbf16>,
    %c0_165 = arith.constant 0 : index
    %c451 = arith.constant 451 : index
    %127 = vector.load %arg14[%c0_165, %c451] : memref<8x818xbf16, #tpu.memory_space<vmem>>, vector<8x361xbf16>
    %c48_166 = arith.constant 48 : index
    %c361_167 = arith.constant 361 : index
    %128 = vector.load %arg12[%c48_166, %c361_167] : memref<72x722xbf16, #tpu.memory_space<vmem>>, vector<8x361xbf16>
    tpu.vector_store %arg12[%c48_166, %c361_167], %127 {strides = array<i32>} : memref<72x722xbf16, #tpu.memory_space<vmem>>, vector<8x361xbf16>,
    %c0_168 = arith.constant 0 : index
    %c452 = arith.constant 452 : index
    %129 = vector.load %arg14[%c0_168, %c452] : memref<8x818xbf16, #tpu.memory_space<vmem>>, vector<8x361xbf16>
    %c56_169 = arith.constant 56 : index
    %c361_170 = arith.constant 361 : index
    %130 = vector.load %arg12[%c56_169, %c361_170] : memref<72x722xbf16, #tpu.memory_space<vmem>>, vector<8x361xbf16>
    tpu.vector_store %arg12[%c56_169, %c361_170], %129 {strides = array<i32>} : memref<72x722xbf16, #tpu.memory_space<vmem>>, vector<8x361xbf16>,
    %c0_171 = arith.constant 0 : index
    %c453 = arith.constant 453 : index
    %131 = vector.load %arg14[%c0_171, %c453] : memref<8x818xbf16, #tpu.memory_space<vmem>>, vector<8x361xbf16>
    %c64_172 = arith.constant 64 : index
    %c361_173 = arith.constant 361 : index
    %132 = vector.load %arg12[%c64_172, %c361_173] : memref<72x722xbf16, #tpu.memory_space<vmem>>, vector<8x361xbf16>
    tpu.vector_store %arg12[%c64_172, %c361_173], %131 {strides = array<i32>} : memref<72x722xbf16, #tpu.memory_space<vmem>>, vector<8x361xbf16>,
    %c0_174 = arith.constant 0 : index
    %c0_175 = arith.constant 0 : index
    %133 = vector.load %arg5[%c0_174, %c0_175] : memref<8x72xbf16, #tpu.memory_space<vmem>>, vector<8x72xbf16>
    %c0_176 = arith.constant 0 : index
    %c0_177 = arith.constant 0 : index
    %134 = vector.load %arg12[%c0_176, %c0_177] : memref<72x722xbf16, #tpu.memory_space<vmem>>, vector<72x722xbf16>
    %cst_178 = arith.constant dense<0.000000e+00> : vector<8x722xf32>
    %135 = tpu.matmul %133, %134, %cst_178 {dimension_numbers = #tpu.dot_dimension_numbers<[1], [0], [0], [1], [0, 0, 1, 1], [], []>} : vector<8x72xbf16>, vector<72x722xbf16>, vector<8x722xf32> -> vector<8x722xf32>
    %c0_179 = arith.constant 0 : index
    %c0_180 = arith.constant 0 : index
    %136 = vector.load %arg8[%c0_179, %c0_180] : memref<8x1xf32, #tpu.memory_space<vmem>>, vector<8x1xf32>
    %137 = vector.broadcast %136 : vector<8x1xf32> to vector<8x722xf32>
    %138 = arith.addf %135, %137 : vector<8x722xf32>
    %cst_181 = arith.constant 0.000000e+00 : f32
    %139 = vector.broadcast %cst_181 : f32 to vector<8x722xf32>
    %140 = arith.maximumf %138, %139 : vector<8x722xf32>
    %141 = arith.truncf %140 : vector<8x722xf32> to vector<8x722xbf16>
    %cst_182 = arith.constant 0.000000e+00 : bf16
    %142 = vector.broadcast %cst_182 : bf16 to vector<8x24xbf16>
    %c0_183 = arith.constant 0 : index
    %c0_184 = arith.constant 0 : index
    %143 = vector.load %arg15[%c0_183, %c0_184] : memref<8x818xbf16, #tpu.memory_space<vmem>>, vector<8x24xbf16>
    tpu.vector_store %arg15[%c0_183, %c0_184], %142 {strides = array<i32>} : memref<8x818xbf16, #tpu.memory_space<vmem>>, vector<8x24xbf16>,
    %cst_185 = arith.constant 0.000000e+00 : bf16
    %144 = vector.broadcast %cst_185 : bf16 to vector<8x24xbf16>
    %c0_186 = arith.constant 0 : index
    %c385_187 = arith.constant 385 : index
    %145 = vector.load %arg15[%c0_186, %c385_187] : memref<8x818xbf16, #tpu.memory_space<vmem>>, vector<8x24xbf16>
    tpu.vector_store %arg15[%c0_186, %c385_187], %144 {strides = array<i32>} : memref<8x818xbf16, #tpu.memory_space<vmem>>, vector<8x24xbf16>,
    %146 = vector.extract_strided_slice %141 {offsets = [0, 0], sizes = [8, 361], strides = [1, 1]} : vector<8x722xbf16> to vector<8x361xbf16>
    %c0_188 = arith.constant 0 : index
    %c24_189 = arith.constant 24 : index
    %147 = vector.load %arg15[%c0_188, %c24_189] : memref<8x818xbf16, #tpu.memory_space<vmem>>, vector<8x361xbf16>
    tpu.vector_store %arg15[%c0_188, %c24_189], %146 {strides = array<i32>} : memref<8x818xbf16, #tpu.memory_space<vmem>>, vector<8x361xbf16>,
    %cst_190 = arith.constant 0.000000e+00 : bf16
    %148 = vector.broadcast %cst_190 : bf16 to vector<8x24xbf16>
    %c0_191 = arith.constant 0 : index
    %c409_192 = arith.constant 409 : index
    %149 = vector.load %arg15[%c0_191, %c409_192] : memref<8x818xbf16, #tpu.memory_space<vmem>>, vector<8x24xbf16>
    tpu.vector_store %arg15[%c0_191, %c409_192], %148 {strides = array<i32>} : memref<8x818xbf16, #tpu.memory_space<vmem>>, vector<8x24xbf16>,
    %cst_193 = arith.constant 0.000000e+00 : bf16
    %150 = vector.broadcast %cst_193 : bf16 to vector<8x24xbf16>
    %c0_194 = arith.constant 0 : index
    %c794_195 = arith.constant 794 : index
    %151 = vector.load %arg15[%c0_194, %c794_195] : memref<8x818xbf16, #tpu.memory_space<vmem>>, vector<8x24xbf16>
    tpu.vector_store %arg15[%c0_194, %c794_195], %150 {strides = array<i32>} : memref<8x818xbf16, #tpu.memory_space<vmem>>, vector<8x24xbf16>,
    %152 = vector.extract_strided_slice %141 {offsets = [0, 361], sizes = [8, 361], strides = [1, 1]} : vector<8x722xbf16> to vector<8x361xbf16>
    %c0_196 = arith.constant 0 : index
    %c433_197 = arith.constant 433 : index
    %153 = vector.load %arg15[%c0_196, %c433_197] : memref<8x818xbf16, #tpu.memory_space<vmem>>, vector<8x361xbf16>
    tpu.vector_store %arg15[%c0_196, %c433_197], %152 {strides = array<i32>} : memref<8x818xbf16, #tpu.memory_space<vmem>>, vector<8x361xbf16>,
    %c0_198 = arith.constant 0 : index
    %c4_199 = arith.constant 4 : index
    %154 = vector.load %arg15[%c0_198, %c4_199] : memref<8x818xbf16, #tpu.memory_space<vmem>>, vector<8x361xbf16>
    %c0_200 = arith.constant 0 : index
    %c0_201 = arith.constant 0 : index
    %155 = vector.load %arg13[%c0_200, %c0_201] : memref<72x722xbf16, #tpu.memory_space<vmem>>, vector<8x361xbf16>
    tpu.vector_store %arg13[%c0_200, %c0_201], %154 {strides = array<i32>} : memref<72x722xbf16, #tpu.memory_space<vmem>>, vector<8x361xbf16>,
    %c0_202 = arith.constant 0 : index
    %c5_203 = arith.constant 5 : index
    %156 = vector.load %arg15[%c0_202, %c5_203] : memref<8x818xbf16, #tpu.memory_space<vmem>>, vector<8x361xbf16>
    %c8_204 = arith.constant 8 : index
    %c0_205 = arith.constant 0 : index
    %157 = vector.load %arg13[%c8_204, %c0_205] : memref<72x722xbf16, #tpu.memory_space<vmem>>, vector<8x361xbf16>
    tpu.vector_store %arg13[%c8_204, %c0_205], %156 {strides = array<i32>} : memref<72x722xbf16, #tpu.memory_space<vmem>>, vector<8x361xbf16>,
    %c0_206 = arith.constant 0 : index
    %c6_207 = arith.constant 6 : index
    %158 = vector.load %arg15[%c0_206, %c6_207] : memref<8x818xbf16, #tpu.memory_space<vmem>>, vector<8x361xbf16>
    %c16_208 = arith.constant 16 : index
    %c0_209 = arith.constant 0 : index
    %159 = vector.load %arg13[%c16_208, %c0_209] : memref<72x722xbf16, #tpu.memory_space<vmem>>, vector<8x361xbf16>
    tpu.vector_store %arg13[%c16_208, %c0_209], %158 {strides = array<i32>} : memref<72x722xbf16, #tpu.memory_space<vmem>>, vector<8x361xbf16>,
    %c0_210 = arith.constant 0 : index
    %c23_211 = arith.constant 23 : index
    %160 = vector.load %arg15[%c0_210, %c23_211] : memref<8x818xbf16, #tpu.memory_space<vmem>>, vector<8x361xbf16>
    %c24_212 = arith.constant 24 : index
    %c0_213 = arith.constant 0 : index
    %161 = vector.load %arg13[%c24_212, %c0_213] : memref<72x722xbf16, #tpu.memory_space<vmem>>, vector<8x361xbf16>
    tpu.vector_store %arg13[%c24_212, %c0_213], %160 {strides = array<i32>} : memref<72x722xbf16, #tpu.memory_space<vmem>>, vector<8x361xbf16>,
    %c0_214 = arith.constant 0 : index
    %c24_215 = arith.constant 24 : index
    %162 = vector.load %arg15[%c0_214, %c24_215] : memref<8x818xbf16, #tpu.memory_space<vmem>>, vector<8x361xbf16>
    %c32_216 = arith.constant 32 : index
    %c0_217 = arith.constant 0 : index
    %163 = vector.load %arg13[%c32_216, %c0_217] : memref<72x722xbf16, #tpu.memory_space<vmem>>, vector<8x361xbf16>
    tpu.vector_store %arg13[%c32_216, %c0_217], %162 {strides = array<i32>} : memref<72x722xbf16, #tpu.memory_space<vmem>>, vector<8x361xbf16>,
    %c0_218 = arith.constant 0 : index
    %c25_219 = arith.constant 25 : index
    %164 = vector.load %arg15[%c0_218, %c25_219] : memref<8x818xbf16, #tpu.memory_space<vmem>>, vector<8x361xbf16>
    %c40_220 = arith.constant 40 : index
    %c0_221 = arith.constant 0 : index
    %165 = vector.load %arg13[%c40_220, %c0_221] : memref<72x722xbf16, #tpu.memory_space<vmem>>, vector<8x361xbf16>
    tpu.vector_store %arg13[%c40_220, %c0_221], %164 {strides = array<i32>} : memref<72x722xbf16, #tpu.memory_space<vmem>>, vector<8x361xbf16>,
    %c0_222 = arith.constant 0 : index
    %c42_223 = arith.constant 42 : index
    %166 = vector.load %arg15[%c0_222, %c42_223] : memref<8x818xbf16, #tpu.memory_space<vmem>>, vector<8x361xbf16>
    %c48_224 = arith.constant 48 : index
    %c0_225 = arith.constant 0 : index
    %167 = vector.load %arg13[%c48_224, %c0_225] : memref<72x722xbf16, #tpu.memory_space<vmem>>, vector<8x361xbf16>
    tpu.vector_store %arg13[%c48_224, %c0_225], %166 {strides = array<i32>} : memref<72x722xbf16, #tpu.memory_space<vmem>>, vector<8x361xbf16>,
    %c0_226 = arith.constant 0 : index
    %c43_227 = arith.constant 43 : index
    %168 = vector.load %arg15[%c0_226, %c43_227] : memref<8x818xbf16, #tpu.memory_space<vmem>>, vector<8x361xbf16>
    %c56_228 = arith.constant 56 : index
    %c0_229 = arith.constant 0 : index
    %169 = vector.load %arg13[%c56_228, %c0_229] : memref<72x722xbf16, #tpu.memory_space<vmem>>, vector<8x361xbf16>
    tpu.vector_store %arg13[%c56_228, %c0_229], %168 {strides = array<i32>} : memref<72x722xbf16, #tpu.memory_space<vmem>>, vector<8x361xbf16>,
    %c0_230 = arith.constant 0 : index
    %c44_231 = arith.constant 44 : index
    %170 = vector.load %arg15[%c0_230, %c44_231] : memref<8x818xbf16, #tpu.memory_space<vmem>>, vector<8x361xbf16>
    %c64_232 = arith.constant 64 : index
    %c0_233 = arith.constant 0 : index
    %171 = vector.load %arg13[%c64_232, %c0_233] : memref<72x722xbf16, #tpu.memory_space<vmem>>, vector<8x361xbf16>
    tpu.vector_store %arg13[%c64_232, %c0_233], %170 {strides = array<i32>} : memref<72x722xbf16, #tpu.memory_space<vmem>>, vector<8x361xbf16>,
    %c0_234 = arith.constant 0 : index
    %c413_235 = arith.constant 413 : index
    %172 = vector.load %arg15[%c0_234, %c413_235] : memref<8x818xbf16, #tpu.memory_space<vmem>>, vector<8x361xbf16>
    %c0_236 = arith.constant 0 : index
    %c361_237 = arith.constant 361 : index
    %173 = vector.load %arg13[%c0_236, %c361_237] : memref<72x722xbf16, #tpu.memory_space<vmem>>, vector<8x361xbf16>
    tpu.vector_store %arg13[%c0_236, %c361_237], %172 {strides = array<i32>} : memref<72x722xbf16, #tpu.memory_space<vmem>>, vector<8x361xbf16>,
    %c0_238 = arith.constant 0 : index
    %c414_239 = arith.constant 414 : index
    %174 = vector.load %arg15[%c0_238, %c414_239] : memref<8x818xbf16, #tpu.memory_space<vmem>>, vector<8x361xbf16>
    %c8_240 = arith.constant 8 : index
    %c361_241 = arith.constant 361 : index
    %175 = vector.load %arg13[%c8_240, %c361_241] : memref<72x722xbf16, #tpu.memory_space<vmem>>, vector<8x361xbf16>
    tpu.vector_store %arg13[%c8_240, %c361_241], %174 {strides = array<i32>} : memref<72x722xbf16, #tpu.memory_space<vmem>>, vector<8x361xbf16>,
    %c0_242 = arith.constant 0 : index
    %c415_243 = arith.constant 415 : index
    %176 = vector.load %arg15[%c0_242, %c415_243] : memref<8x818xbf16, #tpu.memory_space<vmem>>, vector<8x361xbf16>
    %c16_244 = arith.constant 16 : index
    %c361_245 = arith.constant 361 : index
    %177 = vector.load %arg13[%c16_244, %c361_245] : memref<72x722xbf16, #tpu.memory_space<vmem>>, vector<8x361xbf16>
    tpu.vector_store %arg13[%c16_244, %c361_245], %176 {strides = array<i32>} : memref<72x722xbf16, #tpu.memory_space<vmem>>, vector<8x361xbf16>,
    %c0_246 = arith.constant 0 : index
    %c432_247 = arith.constant 432 : index
    %178 = vector.load %arg15[%c0_246, %c432_247] : memref<8x818xbf16, #tpu.memory_space<vmem>>, vector<8x361xbf16>
    %c24_248 = arith.constant 24 : index
    %c361_249 = arith.constant 361 : index
    %179 = vector.load %arg13[%c24_248, %c361_249] : memref<72x722xbf16, #tpu.memory_space<vmem>>, vector<8x361xbf16>
    tpu.vector_store %arg13[%c24_248, %c361_249], %178 {strides = array<i32>} : memref<72x722xbf16, #tpu.memory_space<vmem>>, vector<8x361xbf16>,
    %c0_250 = arith.constant 0 : index
    %c433_251 = arith.constant 433 : index
    %180 = vector.load %arg15[%c0_250, %c433_251] : memref<8x818xbf16, #tpu.memory_space<vmem>>, vector<8x361xbf16>
    %c32_252 = arith.constant 32 : index
    %c361_253 = arith.constant 361 : index
    %181 = vector.load %arg13[%c32_252, %c361_253] : memref<72x722xbf16, #tpu.memory_space<vmem>>, vector<8x361xbf16>
    tpu.vector_store %arg13[%c32_252, %c361_253], %180 {strides = array<i32>} : memref<72x722xbf16, #tpu.memory_space<vmem>>, vector<8x361xbf16>,
    %c0_254 = arith.constant 0 : index
    %c434_255 = arith.constant 434 : index
    %182 = vector.load %arg15[%c0_254, %c434_255] : memref<8x818xbf16, #tpu.memory_space<vmem>>, vector<8x361xbf16>
    %c40_256 = arith.constant 40 : index
    %c361_257 = arith.constant 361 : index
    %183 = vector.load %arg13[%c40_256, %c361_257] : memref<72x722xbf16, #tpu.memory_space<vmem>>, vector<8x361xbf16>
    tpu.vector_store %arg13[%c40_256, %c361_257], %182 {strides = array<i32>} : memref<72x722xbf16, #tpu.memory_space<vmem>>, vector<8x361xbf16>,
    %c0_258 = arith.constant 0 : index
    %c451_259 = arith.constant 451 : index
    %184 = vector.load %arg15[%c0_258, %c451_259] : memref<8x818xbf16, #tpu.memory_space<vmem>>, vector<8x361xbf16>
    %c48_260 = arith.constant 48 : index
    %c361_261 = arith.constant 361 : index
    %185 = vector.load %arg13[%c48_260, %c361_261] : memref<72x722xbf16, #tpu.memory_space<vmem>>, vector<8x361xbf16>
    tpu.vector_store %arg13[%c48_260, %c361_261], %184 {strides = array<i32>} : memref<72x722xbf16, #tpu.memory_space<vmem>>, vector<8x361xbf16>,
    %c0_262 = arith.constant 0 : index
    %c452_263 = arith.constant 452 : index
    %186 = vector.load %arg15[%c0_262, %c452_263] : memref<8x818xbf16, #tpu.memory_space<vmem>>, vector<8x361xbf16>
    %c56_264 = arith.constant 56 : index
    %c361_265 = arith.constant 361 : index
    %187 = vector.load %arg13[%c56_264, %c361_265] : memref<72x722xbf16, #tpu.memory_space<vmem>>, vector<8x361xbf16>
    tpu.vector_store %arg13[%c56_264, %c361_265], %186 {strides = array<i32>} : memref<72x722xbf16, #tpu.memory_space<vmem>>, vector<8x361xbf16>,
    %c0_266 = arith.constant 0 : index
    %c453_267 = arith.constant 453 : index
    %188 = vector.load %arg15[%c0_266, %c453_267] : memref<8x818xbf16, #tpu.memory_space<vmem>>, vector<8x361xbf16>
    %c64_268 = arith.constant 64 : index
    %c361_269 = arith.constant 361 : index
    %189 = vector.load %arg13[%c64_268, %c361_269] : memref<72x722xbf16, #tpu.memory_space<vmem>>, vector<8x361xbf16>
    tpu.vector_store %arg13[%c64_268, %c361_269], %188 {strides = array<i32>} : memref<72x722xbf16, #tpu.memory_space<vmem>>, vector<8x361xbf16>,
    %c0_270 = arith.constant 0 : index
    %c0_271 = arith.constant 0 : index
    %190 = vector.load %arg6[%c0_270, %c0_271] : memref<16x72xbf16, #tpu.memory_space<vmem>>, vector<16x72xbf16>
    %c0_272 = arith.constant 0 : index
    %c0_273 = arith.constant 0 : index
    %191 = vector.load %arg13[%c0_272, %c0_273] : memref<72x722xbf16, #tpu.memory_space<vmem>>, vector<72x722xbf16>
    %cst_274 = arith.constant dense<0.000000e+00> : vector<16x722xf32>
    %192 = tpu.matmul %190, %191, %cst_274 {dimension_numbers = #tpu.dot_dimension_numbers<[1], [0], [0], [1], [0, 0, 1, 1], [], []>} : vector<16x72xbf16>, vector<72x722xbf16>, vector<16x722xf32> -> vector<16x722xf32>
    %193 = arith.truncf %74 : vector<16x722xf32> to vector<16x722xbf16>
    %194 = arith.truncf %192 : vector<16x722xf32> to vector<16x722xbf16>
    %195 = tpu.concatenate %193, %194, %70 in 0 : vector<16x722xbf16>, vector<16x722xbf16>, vector<8x722xbf16> -> vector<40x722xbf16>
    %c0_275 = arith.constant 0 : index
    %c0_276 = arith.constant 0 : index
    %196 = vector.load %arg3[%c0_275, %c0_276] : memref<722x128xbf16, #tpu.memory_space<vmem>>, vector<722x128xbf16>
    %cst_277 = arith.constant dense<0.000000e+00> : vector<40x128xf32>
    %197 = tpu.matmul %195, %196, %cst_277 {dimension_numbers = #tpu.dot_dimension_numbers<[1], [0], [0], [1], [0, 0, 1, 1], [], []>} : vector<40x722xbf16>, vector<722x128xbf16>, vector<40x128xf32> -> vector<40x128xf32>
    %c0_278 = arith.constant 0 : index
    %c0_279 = arith.constant 0 : index
    %198 = vector.load %arg9[%c0_278, %c0_279] : memref<40x1xf32, #tpu.memory_space<vmem>>, vector<40x1xf32>
    %199 = vector.broadcast %198 : vector<40x1xf32> to vector<40x128xf32>
    %200 = arith.addf %197, %199 : vector<40x128xf32>
    %201 = tpu.iota {dimensions = array<i32: 0>} : vector<40x128xi32>
    %c32_i32 = arith.constant 32 : i32
    %202 = vector.broadcast %c32_i32 : i32 to vector<40x128xi32>
    %203 = arith.cmpi slt, %201, %202 : vector<40x128xi32>
    %cst_280 = arith.constant 0.000000e+00 : f32
    %204 = vector.broadcast %cst_280 : f32 to vector<40x128xf32>
    %205 = arith.maximumf %200, %204 : vector<40x128xf32>
    %206 = arith.select %203, %205, %200 : vector<40x128xi1>, vector<40x128xf32>
    %c0_281 = arith.constant 0 : index
    %c0_282 = arith.constant 0 : index
    %c0_283 = arith.constant 0 : index
    %207 = vector.load %arg10[%c0_281, %c0_282, %c0_283] : memref<1x40x128xf32, #tpu.memory_space<vmem>>, vector<1x40x128xf32>
    %208 = vector.shape_cast %207 : vector<1x40x128xf32> to vector<40x128xf32>
    %209 = vector.shape_cast %206 : vector<40x128xf32> to vector<1x40x128xf32>
    tpu.vector_store %arg10[%c0_281, %c0_282, %c0_283], %209 {strides = array<i32>} : memref<1x40x128xf32, #tpu.memory_space<vmem>>, vector<1x40x128xf32>,
    return
  }
  func.func @transform_0(%arg0: i32) -> (i32, i32, i32) {
    %c0_i32 = arith.constant 0 : i32
    %c0_i32_0 = arith.constant 0 : i32
    %c0_i32_1 = arith.constant 0 : i32
    return %arg0, %c0_i32, %c0_i32_0 : i32, i32, i32
  }
  func.func @transform_1(%arg0: i32) -> (i32, i32) {
    %c0_i32 = arith.constant 0 : i32
    %c0_i32_0 = arith.constant 0 : i32
    %c0_i32_1 = arith.constant 0 : i32
    return %c0_i32, %c0_i32_0 : i32, i32
  }
  func.func @transform_2(%arg0: i32) -> (i32, i32) {
    %c0_i32 = arith.constant 0 : i32
    %c0_i32_0 = arith.constant 0 : i32
    %c0_i32_1 = arith.constant 0 : i32
    return %c0_i32, %c0_i32_0 : i32, i32
  }
  func.func @transform_3(%arg0: i32) -> (i32, i32) {
    %c0_i32 = arith.constant 0 : i32
    %c0_i32_0 = arith.constant 0 : i32
    %c0_i32_1 = arith.constant 0 : i32
    return %c0_i32, %c0_i32_0 : i32, i32
  }
  func.func @transform_4(%arg0: i32) -> (i32, i32) {
    %c0_i32 = arith.constant 0 : i32
    %c0_i32_0 = arith.constant 0 : i32
    %c0_i32_1 = arith.constant 0 : i32
    return %c0_i32, %c0_i32_0 : i32, i32
  }
  func.func @transform_5(%arg0: i32) -> (i32, i32) {
    %c0_i32 = arith.constant 0 : i32
    %c0_i32_0 = arith.constant 0 : i32
    %c0_i32_1 = arith.constant 0 : i32
    return %c0_i32, %c0_i32_0 : i32, i32
  }
  func.func @transform_6(%arg0: i32) -> (i32, i32) {
    %c0_i32 = arith.constant 0 : i32
    %c0_i32_0 = arith.constant 0 : i32
    %c0_i32_1 = arith.constant 0 : i32
    return %c0_i32, %c0_i32_0 : i32, i32
  }
  func.func @transform_7(%arg0: i32) -> (i32, i32) {
    %c0_i32 = arith.constant 0 : i32
    %c0_i32_0 = arith.constant 0 : i32
    %c0_i32_1 = arith.constant 0 : i32
    return %c0_i32, %c0_i32_0 : i32, i32
  }
  func.func @transform_8(%arg0: i32) -> (i32, i32) {
    %c0_i32 = arith.constant 0 : i32
    %c0_i32_0 = arith.constant 0 : i32
    %c0_i32_1 = arith.constant 0 : i32
    return %c0_i32, %c0_i32_0 : i32, i32
  }
  func.func @transform_9(%arg0: i32) -> (i32, i32, i32) {
    %c0_i32 = arith.constant 0 : i32
    %c0_i32_0 = arith.constant 0 : i32
    %c0_i32_1 = arith.constant 0 : i32
    return %arg0, %c0_i32, %c0_i32_0 : i32, i32, i32
  }
}

</mosaic_0001>

<bundles_post_ra>
// kernel: reduction_a_unit.1
= control target key start
LH: loop header
LB: loop body
LE: loop exit
PB: predicated region body
PF: predicated region fallthrough
CT: control target
= control target key end

     0   :  { %s3689_s30 = smov 0   ;;  %s4671_s0 = inlined_call_operand.vmem [shape: bf16[4,8,409], index: 0, kind: input, shape index: {}]   ;;  %s4672_s1 = inlined_call_operand.vmem [shape: f32[1,722], index: 1, kind: input, shape index: {}]   ;;  %s4673_s2 = inlined_call_operand.vmem [shape: bf16[722,128], index: 2, kind: input, shape index: {}]   ;;  %s4674_s3 = inlined_call_operand.vmem [shape: bf16[24,72], index: 3, kind: input, shape index: {}]   ;;  %s4675_s4 = inlined_call_operand.vmem [shape: bf16[8,72], index: 4, kind: input, shape index: {}]   ;;  %s4676_s5 = inlined_call_operand.vmem [shape: bf16[16,72], index: 5, kind: input, shape index: {}]   ;;  %s4677_s6 = inlined_call_operand.vmem [shape: f32[8,1], index: 6, kind: input, shape index: {}]   ;;  %s4678_s7 = inlined_call_operand.vmem [shape: f32[8,1], index: 7, kind: input, shape index: {}]   ;;  %s4679_s8 = inlined_call_operand.vmem [shape: f32[40,1], index: 8, kind: input, shape index: {}]   ;;  %s4680_s9 = inlined_call_operand.vmem [shape: f32[2,40,128], index: 9, kind: output, shape index: {}]  }
   0x1 LB: > { %s3695_s10 = sadd.s32 4294967295, %s3607_s30   ;;  %p3161_p0 = scmp.ge.s32.totalorder %s3607_s30, 1  ;;  %s3607_s30 = sphi %s3689_s30, %s19_s30  }
   0x2   : > { %p289_p1 = scmp.lt.s32.totalorder %s3607_s30, 3 }
   0x4   : > { %p290_p2 = pnand %p3161_p0, %p289_p1 }
   0x5   : > { %s3162_s11 = sshll.u32 (!%p290_p2), %s3695_s10, 1  ;;  %s3609_s16 = smov (!%p290_p2), 123   ;;  %v3617_v6 = vmov (!%p290_p2), 0   ;;  %v1043_v13 = vld [vmem:[%s4677_s6] sm:$0xff] (!%p290_p2)  ;;  %vm356_vm0 = vcmask (!%p290_p2), 855040   ;;  %vm349_vm1 = vcmask (!%p290_p2), 1043456  }
   0x6   : > { %293 = sbr.rel (%p290_p2) target bundleno = 1738 (0x6ca), region = 56  ;;  %p327_p3 = scmp.lt.s32.totalorder (!%p290_p2), %s3162_s11, 3  ;;  %922 = vmatprep.mubr.bf16.mxu0 (!%p290_p2), %v3617_v6  ;;  %3479 = vset.pattern.permute.xlu0 (!%p290_p2), %v3617_v6  ;;  %vm4692_vm2 = vcmask (!%p290_p2), 1006592   ;;  %vm4693_vm3 = vcmask (!%p290_p2), 1014784   ;;  %vm4691_vm4 = vcmask (!%p290_p2), 998400   ;;  %vm4690_vm5 = vcmask (!%p290_p2), 859136  }
   0x7   : > { %s3610_s17 = smov (!%p290_p2), 124   ;;  %s3611_s18 = smov (!%p290_p2), 122   ;;  %1698 = vmatprep.mubr.bf16.mxu1 (!%p290_p2), %v3617_v6  ;;  %3480 = vset.pattern.permute.xlu1 (!%p290_p2), %v3617_v6  ;;  %vm4689_vm6 = vcmask (!%p290_p2), 850944   ;;  %vm4688_vm7 = vcmask (!%p290_p2), 842752   ;;  %vm4687_vm8 = vcmask (!%p290_p2), 703488   ;;  %vm4686_vm9 = vcmask (!%p290_p2), 695296  }
   0x8   : > { %s3612_s19 = smov (!%p290_p2), 105   ;;  %s3613_s20 = smov (!%p290_p2), 104   ;;  %vm4685_vm10 = vcmask (!%p290_p2), 687104   ;;  %vm516_vm11 = vcmask (!%p290_p2), 1044296   ;;  %vm517_vm12 = vcmask (!%p290_p2), 1047556   ;;  %vm534_vm13 = vcmask (!%p290_p2), 818176  }
   0x9   : > { %s3614_s21 = smov (!%p290_p2), 103   ;;  %s3615_s22 = smov (!%p290_p2), 86   ;;  %vm510_vm14 = vcmask (!%p290_p2), 826368   ;;  %vm3779_vm15 = vmor (!%p290_p2), %vm517_vm12, %vm516_vm11  ;;  %vm4700_vm11 = vcmask (!%p290_p2), 670720  }
   0xa   : > { %s4683_s23 = smov (!%p290_p2), 85   ;;  %s4681_s24 = smov (!%p290_p2), 84  }
   0xb   : > { %s3619_s25 = smov (!%p290_p2), 100   ;;  %s3620_s26 = smov (!%p290_p2), 101  }
   0xc   : > { %s3621_s27 = smov (!%p290_p2), 82   ;;  %s3622_s28 = smov (!%p290_p2), 99  }
   0xd   : > { %s4762_s11 = smov (!%p327_p3, %s3162_s11), 3  ;;  %s3623_s29 = smov 80  }
   0xe   : > { %s3363_s12 = sshll.u32 %s4762_s11, 4  ;;  %s3624_s11 = smov 81  }
   0xf   : > { %s3703_s15 = scalar_lea.vmem %s4671_s0, %s3363_s12  ;;  %s3625_s12 = smov 62  }
  0x10   : > { %v358_v0 = vld [vmem:[%s3703_s15] sm:$0xff]  ;;  %v359_v1 = vld [vmem:[%s3703_s15 + $0x8] sm:$0xf]  ;;  %v3168_v7 = vld [vmem:[%s3703_s15 + $0x10] sm:$0xff]  ;;  %s3626_s13 = smov 63   ;;  %s3627_s14 = smov 61  }
  0x11   : > { %362 = vrot.lane.b32.xlu1 %v358_v0, %s3609_s16  ;;  %343 = vrot.lane.b32.xlu0 %v358_v0, %s3610_s17  ;;  %v340_v2 = vld [vmem:[%s3703_s15 + $0x8] sm:$0xf]  ;;  %v3167_v8 = vld [vmem:[%s3703_s15 + $0x18] sm:$0xf]  ;;  %p333_p4 = scmp.lt.s32.totalorder %s3695_s10, 1 }
  0x12   : > { %v376_v3 = vld [vmem:[%s3703_s15 + $0x8] sm:$0xf]  ;;  %v3171_v9 = vld [vmem:[%s3703_s15 + $0x18] sm:$0xf] }
  0x13   : > { %v393_v4 = vld [vmem:[%s3703_s15 + $0x8] sm:$0xf]  ;;  %v3169_v10 = vld [vmem:[%s3703_s15 + $0x18] sm:$0xf]  ;;  %s4764_s10 = smov (!%p333_p4, %s3695_s10), 1 }
  0x14   : > { %v410_v5 = vld [vmem:[%s3703_s15 + $0x8] sm:$0xff]  ;;  %v3175_v11 = vld [vmem:[%s3703_s15 + $0x18] sm:$0xff] }
  0x15   : > { %364 = vrot.lane.b32.xlu1 %v359_v1, %s3609_s16  ;;  %345 = vrot.lane.b32.xlu0 %v340_v2, %s3610_s17  ;;  %v3173_v12 = vld [vmem:[%s3703_s15 + $0x18] sm:$0xf]  ;;  %s3632_s15 = smov 57  }
  0x19   : > { %381 = vrot.lane.b32.xlu1 %v376_v3, %s3611_s18  ;;  %379 = vrot.lane.b32.xlu0 %v358_v0, %s3611_s18 }
  0x1d   : > { %398 = vrot.lane.b32.xlu1 %v393_v4, %s3612_s19  ;;  %396 = vrot.lane.b32.xlu0 %v358_v0, %s3612_s19 }
  0x21   : > { %415 = vrot.lane.b32.xlu1 %v410_v5, %s3613_s20  ;;  %413 = vrot.lane.b32.xlu0 %v358_v0, %s3613_s20 }
  0x25   : > { %433 = vrot.lane.b32.xlu1 %v410_v5, %s3614_s21  ;;  %431 = vrot.lane.b32.xlu0 %v358_v0, %s3614_s21 }
  0x29   : > { %451 = vrot.lane.b32.xlu1 %v410_v5, %s3615_s22  ;;  %449 = vrot.lane.b32.xlu0 %v358_v0, %s3615_s22 }
  0x2d   : > { %469 = vrot.lane.b32.xlu1 %v410_v5, %s4683_s23  ;;  %467 = vrot.lane.b32.xlu0 %v358_v0, %s4683_s23  ;;  %s4694_s23 = smov 74  }
  0x31   : > { %487 = vrot.lane.b32.xlu1 %v410_v5, %s4681_s24  ;;  %485 = vrot.lane.b32.xlu0 %v358_v0, %s4681_s24  ;;  %s4698_s24 = smov 56  }
  0x35   : > { %528 = vrot.lane.b32.xlu1 %v3168_v7, %s3619_s25  ;;  %504 = vrot.lane.b32.xlu0 %v3168_v7, %s3620_s26 }
  0x39   : > { %564 = vrot.lane.b32.xlu1 %v3168_v7, %s3621_s27  ;;  %546 = vrot.lane.b32.xlu0 %v3168_v7, %s3622_s28 }
  0x3d   : > { %600 = vrot.lane.b32.xlu1 %v3168_v7, %s3623_s29  ;;  %582 = vrot.lane.b32.xlu0 %v3168_v7, %s3624_s11 }
  0x41   : > { %636 = vrot.lane.b32.xlu1 %v3168_v7, %s3625_s12  ;;  %618 = vrot.lane.b32.xlu0 %v3168_v7, %s3626_s13 }
  0x45   : > { %506 = vrot.lane.b32.xlu1 %v3167_v8, %s3620_s26  ;;  %654 = vrot.lane.b32.xlu0 %v3168_v7, %s3627_s14  ;;  %s3636_s26 = smov 36  }
  0x49   : > { %548 = vrot.lane.b32.xlu1 %v3171_v9, %s3622_s28  ;;  %530 = vrot.lane.b32.xlu0 %v3169_v10, %s3619_s25  ;;  %s3628_s28 = smov 24   ;;  %s3635_s25 = smov 38  }
  0x4d   : > { %584 = vrot.lane.b32.xlu1 %v3175_v11, %s3624_s11  ;;  %566 = vrot.lane.b32.xlu0 %v3173_v12, %s3621_s27  ;;  %s4713_s11 = smov 85   ;;  %s3637_s27 = smov 37  }
  0x51   : > { %620 = vrot.lane.b32.xlu1 %v3175_v11, %s3626_s13  ;;  %602 = vrot.lane.b32.xlu0 %v3175_v11, %s3623_s29  ;;  %s3629_s29 = smov 72   ;;  %s3630_s13 = smov 75  }
  0x55   : > { %656 = vrot.lane.b32.xlu1 %v3175_v11, %s3627_s14  ;;  %638 = vrot.lane.b32.xlu0 %v3175_v11, %s3625_s12  ;;  %s4714_s12 = smov 84   ;;  %s4696_s14 = smov 76  }
  0x59   : > { %1046 = vperm.xlu0 %3479, %v1043_v13  }
  0x83   : > { %v363_v14 = vpop.permute.xlu1 %362  ;;  %v344_v15 = vpop.permute.xlu0 %343 }
  0x84   : > { %v366_v18 = vrot.slane %v363_v14, 4  ;;  %v347_v19 = vrot.slane %v344_v15, 4 }
  0x87   : > { %v365_v16 = vpop.permute.xlu1 %364  ;;  %v346_v17 = vpop.permute.xlu0 %345 }
  0x88   : > { %v367_v20 = vrot.slane %v365_v16, 4  ;;  %374 = vst.msk [vmem:[#allocation2 + $0x20] sm:$0xf] %vm356_vm0, %v365_v16  ;;  %v348_v21 = vrot.slane %v346_v17, 4  ;;  %357 = vst.msk [vmem:[#allocation2 + $0x8] sm:$0xf] %vm356_vm0, %v346_v17 }
  0x8a   : > { %v368_v22 = vsel %vm349_vm1, %v366_v18, %v367_v20  ;;  %v350_v23 = vsel %vm349_vm1, %v347_v19, %v348_v21 }
  0x8b   : > { %v370_v24 = vsel %vm4692_vm2, %v363_v14, %v368_v22  ;;  %v352_v25 = vsel %vm4693_vm3, %v344_v15, %v350_v23  ;;  %v382_v26 = vpop.permute.xlu1 %381  ;;  %v380_v27 = vpop.permute.xlu0 %379  ;;  %vm660_vm2 = vcmask 498688  }
  0x8c   : > { %v384_v28 = vrot.slane %v382_v26, 4  ;;  %391 = vst.msk [vmem:[#allocation2 + $0x38] sm:$0xf] %vm356_vm0, %v382_v26  ;;  %v383_v29 = vrot.slane %v380_v27, 4  ;;  %v674_v30 = vmax.bf16 %v370_v24, %v352_v25  ;;  %v3187_v31 = vcombine.high %v352_v25, %v370_v24 }
  0x8d   : > { %v3186_v32 = vcombine.low %v352_v25, %v370_v24 }
  0x8e   : > { %v385_v33 = vsel %vm349_vm1, %v383_v29, %v384_v28  ;;  %890 = vmatprep.subr.bf16.mxu0 %v3187_v31 }
  0x8f   : > { %v387_v34 = vsel %vm4691_vm4, %v380_v27, %v385_v33  ;;  %v399_v35 = vpop.permute.xlu1 %398  ;;  %v397_v36 = vpop.permute.xlu0 %396  ;;  %891 = vmatpush1.bf16.msra.mxu0 %v3186_v32  ;;  %vm521_vm4 = vcmask 670724  }
  0x90   : > { %v401_v37 = vrot.slane %v399_v35, 4  ;;  %408 = vst.msk [vmem:[#allocation2 + $0x50] sm:$0xf] %vm356_vm0, %v399_v35  ;;  %v400_v38 = vrot.slane %v397_v36, 4  ;;  %v680_v39 = vmax.bf16 %v674_v30, %v387_v34  ;;  %vm3876_vm3 = vmor %vm521_vm4, %vm349_vm1  ;;  %vm1107_vm4 = vcmask 199688  }
  0x91   : > { %1108 = vst.msk [vmem:[#allocation5 + $0xc] sm:$0xf] %vm1107_vm4, %v3617_v6  ;;  %1802 = vst.msk [vmem:[#allocation6 + $0xc] sm:$0xf] %vm1107_vm4, %v3617_v6  ;;  %vm1159_vm4 = vcmask 1043848  }
  0x92   : > { %v402_v40 = vsel %vm349_vm1, %v400_v38, %v401_v37 }
  0x93   : > { %v404_v41 = vsel %vm4690_vm5, %v397_v36, %v402_v40  ;;  %v416_v42 = vpop.permute.xlu1 %415  ;;  %v414_v43 = vpop.permute.xlu0 %413  ;;  %v3800_v36 = vld [vmem:[%s4674_s3] sm:$0xff]   ;;  %vm624_vm5 = vcmask 515072  }
  0x94   : > { %v418_v44 = vrot.slane %v416_v42, 4  ;;  %v417_v45 = vrot.slane %v414_v43, 4  ;;  %v686_v46 = vmax.bf16 %v680_v39, %v404_v41  ;;  %v3193_v47 = vcombine.high %v387_v34, %v404_v41 }
  0x95   : > { %v3192_v48 = vcombine.low %v387_v34, %v404_v41 }
  0x96   : > { %v422_v49 = vsel %vm4689_vm6, %v416_v42, %v418_v44  ;;  %v419_v50 = vsel %vm349_vm1, %v417_v45, %v418_v44  ;;  %892 = vmatprep.subr.bf16.mxu0 %v3193_v47 }
  0x97   : > { %426 = vst.msk [vmem:[#allocation2 + $0x68] sm:$0xf] %vm356_vm0, %v422_v49  ;;  %v421_v51 = vsel %vm4689_vm6, %v414_v43, %v419_v50  ;;  %v434_v52 = vpop.permute.xlu1 %433  ;;  %v432_v53 = vpop.permute.xlu0 %431  ;;  %893 = vmatpush1.bf16.msra.mxu0 %v3192_v48  ;;  %vm642_vm6 = vcmask 506880  }
  0x98   : > { %v436_v54 = vrot.slane %v434_v52, 4  ;;  %v435_v55 = vrot.slane %v432_v53, 4  ;;  %v692_v56 = vmax.bf16 %v686_v46, %v421_v51 }
  0x9a   : > { %v440_v57 = vsel %vm4688_vm7, %v434_v52, %v436_v54  ;;  %v437_v58 = vsel %vm349_vm1, %v435_v55, %v436_v54 }
  0x9b   : > { %444 = vst.msk [vmem:[#allocation2 + $0x80] sm:$0xf] %vm356_vm0, %v440_v57  ;;  %v439_v59 = vsel %vm4688_vm7, %v432_v53, %v437_v58  ;;  %v452_v60 = vpop.permute.xlu1 %451  ;;  %v450_v61 = vpop.permute.xlu0 %449  ;;  %vm588_vm7 = vcmask 662528  }
  0x9c   : > { %v454_v62 = vrot.slane %v452_v60, 4  ;;  %v453_v63 = vrot.slane %v450_v61, 4  ;;  %v698_v0 = vmax.bf16 %v692_v56, %v439_v59  ;;  %v3199_v1 = vcombine.high %v421_v51, %v439_v59  ;;  %v3852_v56 = vld [vmem:[%s4674_s3 + $0x8] ss:$0 sps:$4 sm:$0xff]  }
  0x9d   : > { %v3198_v2 = vcombine.low %v421_v51, %v439_v59 }
  0x9e   : > { %v458_v3 = vsel %vm4687_vm8, %v452_v60, %v454_v62  ;;  %v455_v4 = vsel %vm349_vm1, %v453_v63, %v454_v62  ;;  %894 = vmatprep.subr.bf16.mxu0 %v3199_v1 }
  0x9f   : > { %462 = vst.msk [vmem:[#allocation2 + $0x98] sm:$0xf] %vm356_vm0, %v458_v3  ;;  %v457_v5 = vsel %vm4687_vm8, %v450_v61, %v455_v4  ;;  %v470_v7 = vpop.permute.xlu1 %469  ;;  %v468_v8 = vpop.permute.xlu0 %467  ;;  %895 = vmatpush1.bf16.msra.mxu0 %v3198_v2  ;;  %vm606_vm8 = vcmask 654336  }
  0xa0   : > { %v472_v9 = vrot.slane %v470_v7, 4  ;;  %v471_v10 = vrot.slane %v468_v8, 4  ;;  %v704_v11 = vmax.bf16 %v698_v0, %v457_v5 }
  0xa2   : > { %v476_v12 = vsel %vm4686_vm9, %v470_v7, %v472_v9  ;;  %v473_v13 = vsel %vm349_vm1, %v471_v10, %v472_v9  ;;  %v3555_v7 = vld [vmem:[%s4673_s2] sm:$0xff]  }
  0xa3   : > { %480 = vst.msk [vmem:[#allocation2 + $0xb0] sm:$0xf] %vm356_vm0, %v476_v12  ;;  %v475_v14 = vsel %vm4686_vm9, %v468_v8, %v473_v13  ;;  %v488_v15 = vpop.permute.xlu1 %487  ;;  %v486_v16 = vpop.permute.xlu0 %485  ;;  %vm865_vm9 = vcmask 588800  }
  0xa4   : > { %v490_v17 = vrot.slane %v488_v15, 4  ;;  %v489_v18 = vrot.slane %v486_v16, 4  ;;  %v3205_v19 = vcombine.high %v457_v5, %v475_v14  ;;  %v3204_v20 = vcombine.low %v457_v5, %v475_v14 }
  0xa5   : > { %v710_v21 = vmax.bf16 %v704_v11, %v475_v14 }
  0xa6   : > { %v494_v22 = vsel %vm4685_vm10, %v488_v15, %v490_v17  ;;  %v491_v23 = vsel %vm349_vm1, %v489_v18, %v490_v17  ;;  %896 = vmatprep.subr.bf16.mxu0 %v3205_v19 }
  0xa7   : > { %498 = vst.msk [vmem:[#allocation2 + $0xc8] sm:$0xf] %vm356_vm0, %v494_v22  ;;  %v493_v24 = vsel %vm4685_vm10, %v486_v16, %v491_v23  ;;  %v3774_v25 = vpop.permute.xlu1 %528  ;;  %v3776_v26 = vpop.permute.xlu0 %504  ;;  %897 = vmatpush1.bf16.msra.mxu0 %v3204_v20  ;;  %vm552_vm10 = vcmask 809984  }
  0xa8   : > { %v532_v28 = vrot.slane %v3774_v25, 4  ;;  %v508_v29 = vrot.slane %v3776_v26, 4  ;;  %v3211_v30 = vcombine.high %v493_v24, %v493_v24  ;;  %v3210_v31 = vcombine.low %v493_v24, %v493_v24 }
  0xa9   : > { %v3785_v32 = vmax.bf16 %v710_v21, %v493_v24 }
  0xaa   : > { %v535_v33 = vsel %vm534_vm13, %v532_v28, %v3774_v25  ;;  %v511_v34 = vsel %vm510_vm14, %v508_v29, %v3776_v26  ;;  %3216 = vmatprep.subr.msk.bf16.mxu0 %vm349_vm1, %v3211_v30  ;;  %v873_v35 = vsel %vm349_vm1, %v3210_v31, 0 }
  0xab   : > { %540 = vst.msk [vmem:[#allocation2 + $0x20] sm:$0xff] %vm3779_vm15, %v535_v33  ;;  %519 = vst.msk [vmem:[#allocation2 + $0x8] sm:$0xff] %vm3779_vm15, %v511_v34  ;;  %v3806_v37 = vpop.permute.xlu1 %564  ;;  %v3808_v38 = vpop.permute.xlu0 %546  ;;  %899 = vmatpush1.bf16.msra.mxu0 %v873_v35 }
  0xac   : > { %v568_v39 = vrot.slane %v3806_v37, 4  ;;  %v550_v40 = vrot.slane %v3808_v38, 4 }
  0xae   : > { %v571_v41 = vsel %vm4700_vm11, %v568_v39, %v3806_v37  ;;  %v553_v42 = vsel %vm552_vm10, %v550_v40, %v3808_v38  ;;  %3217 = vmatmul.mubr.msk.bf16.vlgmr.msra.gmra.mrb[0].mxu0 %vm865_vm9, %v3800_v36 }
  0xaf   : > { %576 = vst.msk [vmem:[#allocation2 + $0x50] sm:$0xff] %vm3779_vm15, %v571_v41  ;;  %558 = vst.msk [vmem:[#allocation2 + $0x38] sm:$0xff] %vm3779_vm15, %v553_v42  ;;  %v3826_v43 = vpop.permute.xlu1 %600  ;;  %v3828_v44 = vpop.permute.xlu0 %582  ;;  %932 = vmatprep.mubr.bf16.mxu0 %v3617_v6 }
  0xb0   : > { %v604_v45 = vrot.slane %v3826_v43, 4  ;;  %v586_v46 = vrot.slane %v3828_v44, 4 }
  0xb2   : > { %v607_v47 = vsel %vm606_vm8, %v604_v45, %v3826_v43  ;;  %v589_v48 = vsel %vm588_vm7, %v586_v46, %v3828_v44  ;;  %v669_v49 = vld [vmem:[#allocation2 + $0x8] sm:$0xff]  ;;  %v672_v50 = vld [vmem:[#allocation2 + $0x20] sm:$0xff] }
  0xb3   : > { %612 = vst.msk [vmem:[#allocation2 + $0x80] sm:$0xff] %vm3779_vm15, %v607_v47  ;;  %594 = vst.msk [vmem:[#allocation2 + $0x68] sm:$0xff] %vm3779_vm15, %v589_v48  ;;  %v3845_v51 = vpop.permute.xlu1 %636  ;;  %v3847_v52 = vpop.permute.xlu0 %618  ;;  %v675_v53 = vmax.bf16 %v672_v50, %v669_v49  ;;  %v3189_v54 = vcombine.high %v669_v49, %v672_v50  ;;  %v3188_v55 = vcombine.low %v669_v49, %v672_v50 }
  0xb4   : > { %v640_v57 = vrot.slane %v3845_v51, 4  ;;  %v622_v58 = vrot.slane %v3847_v52, 4 }
  0xb5   : > { %941 = vmatprep.subr.bf16.mxu0 %v3189_v54 }
  0xb6   : > { %v643_v59 = vsel %vm642_vm6, %v640_v57, %v3845_v51  ;;  %v625_v60 = vsel %vm624_vm5, %v622_v58, %v3847_v52  ;;  %942 = vmatpush1.bf16.msra.mxu0 %v3188_v55  ;;  %v678_v61 = vld [vmem:[#allocation2 + $0x38] sm:$0xff]  ;;  %v684_v62 = vld [vmem:[#allocation2 + $0x50] sm:$0xff] }
  0xb7   : > { %648 = vst.msk [vmem:[#allocation2 + $0xb0] sm:$0xff] %vm3779_vm15, %v643_v59  ;;  %630 = vst.msk [vmem:[#allocation2 + $0x98] sm:$0xff] %vm3779_vm15, %v625_v60  ;;  %v507_v63 = vpop.permute.xlu1 %506  ;;  %v3868_v0 = vpop.permute.xlu0 %654  ;;  %v681_v1 = vmax.bf16 %v678_v61, %v675_v53  ;;  %v3195_v2 = vcombine.high %v678_v61, %v684_v62  ;;  %v3194_v3 = vcombine.low %v678_v61, %v684_v62  ;;  %3218 = vmatmul.mubr.msk.bf16.gmra.mrb[4].mxu0 %vm865_vm9, %v3852_v56 }
  0xb8   : > { %v509_v4 = vrot.slane %v507_v63, 4  ;;  %v658_v5 = vrot.slane %v3868_v0, 4  ;;  %973 = vmatprep.mubr.bf16.mxu0 %v3617_v6 }
  0xb9   : > { %v687_v8 = vmax.bf16 %v684_v62, %v681_v1  ;;  %943 = vmatprep.subr.bf16.mxu0 %v3195_v2 }
  0xba   : > { %v512_v9 = vsel %vm349_vm1, %v508_v29, %v509_v4  ;;  %v661_v10 = vsel %vm660_vm2, %v658_v5, %v3868_v0  ;;  %944 = vmatpush1.bf16.msra.mxu0 %v3194_v3  ;;  %v690_v11 = vld [vmem:[#allocation2 + $0x68] sm:$0xff]  ;;  %v696_v12 = vld [vmem:[#allocation2 + $0x80] sm:$0xff] }
  0xbb   : > { %v513_v13 = vsel %vm510_vm14, %v512_v9, %v507_v63  ;;  %666 = vst.msk [vmem:[#allocation2 + $0xc8] sm:$0xff] %vm3779_vm15, %v661_v10  ;;  %v549_v14 = vpop.permute.xlu1 %548  ;;  %v531_v15 = vpop.permute.xlu0 %530  ;;  %v693_v16 = vmax.bf16 %v690_v11, %v687_v8  ;;  %v3201_v17 = vcombine.high %v690_v11, %v696_v12  ;;  %v3200_v18 = vcombine.low %v690_v11, %v696_v12 }
  0xbc   : > { %523 = vst.msk [vmem:[#allocation2 + $0x10] sm:$0xff] %vm3876_vm3, %v513_v13  ;;  %v551_v19 = vrot.slane %v549_v14, 4  ;;  %v533_v20 = vrot.slane %v531_v15, 4  ;;  %vm1135_vm14 = vcmask 396488  }
  0xbd   : > { %v699_v21 = vmax.bf16 %v696_v12, %v693_v16  ;;  %945 = vmatprep.subr.bf16.mxu0 %v3201_v17 }
  0xbe   : > { %v554_v22 = vsel %vm349_vm1, %v550_v40, %v551_v19  ;;  %v536_v23 = vsel %vm349_vm1, %v532_v28, %v533_v20  ;;  %946 = vmatpush1.bf16.msra.mxu0 %v3200_v18  ;;  %v702_v24 = vld [vmem:[#allocation2 + $0x98] sm:$0xff]  ;;  %v708_v26 = vld [vmem:[#allocation2 + $0xb0] sm:$0xff] }
  0xbf   : > { %v555_v29 = vsel %vm552_vm10, %v554_v22, %v549_v14  ;;  %v537_v30 = vsel %vm534_vm13, %v536_v23, %v531_v15  ;;  %v585_v31 = vpop.permute.xlu1 %584  ;;  %v567_v33 = vpop.permute.xlu0 %566  ;;  %v705_v34 = vmax.bf16 %v702_v24, %v699_v21  ;;  %v3207_v35 = vcombine.high %v702_v24, %v708_v26 }
  0xc0   : > { %559 = vst.msk [vmem:[#allocation2 + $0x40] sm:$0xff] %vm3876_vm3, %v555_v29  ;;  %541 = vst.msk [vmem:[#allocation2 + $0x28] sm:$0xff] %vm3876_vm3, %v537_v30  ;;  %v587_v25 = vrot.slane %v585_v31, 4  ;;  %v569_v38 = vrot.slane %v567_v33, 4  ;;  %v3206_v28 = vcombine.low %v702_v24, %v708_v26  ;;  %vm1132_vm10 = vcmask 7172  }
  0xc1   : > { %947 = vmatprep.subr.bf16.mxu0 %v3207_v35  ;;  %v711_v40 = vmax.bf16 %v708_v26, %v705_v34  ;;  %v1063_v35 = vlaneseq  ;;  %vm4030_vm13 = vmor %vm1132_vm10, %vm349_vm1  ;;  %vm4720_vm10 = vcmask 1006592  }
  0xc2   : > { %v590_v41 = vsel %vm349_vm1, %v586_v46, %v587_v25  ;;  %v572_v42 = vsel %vm349_vm1, %v568_v39, %v569_v38  ;;  %948 = vmatpush1.bf16.msra.mxu0 %v3206_v28  ;;  %v714_v47 = vld [vmem:[#allocation2 + $0xc8] sm:$0xff] }
  0xc3   : > { %v591_v48 = vsel %vm588_vm7, %v590_v41, %v585_v31  ;;  %v573_v49 = vsel %vm4700_vm11, %v572_v42, %v567_v33  ;;  %v621_v50 = vpop.permute.xlu1 %620  ;;  %v603_v53 = vpop.permute.xlu0 %602  ;;  %v3213_v54 = vcombine.high %v714_v47, %v714_v47  ;;  %v3212_v55 = vcombine.low %v714_v47, %v714_v47  ;;  %v670_v2 = vld [vmem:[#allocation2 + $0x10] sm:$0xff] }
  0xc4   : > { %595 = vst.msk [vmem:[#allocation2 + $0x70] sm:$0xff] %vm3876_vm3, %v591_v48  ;;  %577 = vst.msk [vmem:[#allocation2 + $0x58] sm:$0xff] %vm3876_vm3, %v573_v49  ;;  %v623_v44 = vrot.slane %v621_v50, 4  ;;  %v605_v37 = vrot.slane %v603_v53, 4  ;;  %v3916_v46 = vmax.bf16 %v714_v47, %v711_v40  ;;  %v1061_v48 = vld [vmem:[%s4672_s1] sm:$0x3f] }
  0xc5   : > { %3219 = vmatprep.subr.msk.bf16.mxu0 %vm349_vm1, %v3213_v54  ;;  %v879_v39 = vsel %vm349_vm1, %v3212_v55, 0  ;;  %vm1123_vm7 = vcmask 195584   ;;  %vm4704_vm11 = vcmask 457728  }
  0xc6   : > { %v626_v59 = vsel %vm349_vm1, %v622_v58, %v623_v44  ;;  %v608_v60 = vsel %vm349_vm1, %v604_v45, %v605_v37  ;;  %950 = vmatpush1.bf16.msra.mxu0 %v879_v39 }
  0xc7   : > { %v627_v61 = vsel %vm624_vm5, %v626_v59, %v621_v50  ;;  %v609_v62 = vsel %vm606_vm8, %v608_v60, %v603_v53  ;;  %v657_v63 = vpop.permute.xlu1 %656  ;;  %v639_v1 = vpop.permute.xlu0 %638  ;;  %v673_v3 = vld [vmem:[#allocation2 + $0x28] sm:$0xff]  ;;  %v679_v8 = vld [vmem:[#allocation2 + $0x40] sm:$0xff]  ;;  %vm1137_vm5 = vcmask 404688  }
  0xc8   : > { %631 = vst.msk [vmem:[#allocation2 + $0xa0] sm:$0xff] %vm3876_vm3, %v627_v61  ;;  %613 = vst.msk [vmem:[#allocation2 + $0x88] sm:$0xff] %vm3876_vm3, %v609_v62  ;;  %v659_v52 = vrot.slane %v657_v63, 4  ;;  %v641_v58 = vrot.slane %v639_v1, 4  ;;  %v676_v43 = vmax.bf16 %v673_v3, %v670_v2  ;;  %v3191_v4 = vcombine.high %v670_v2, %v673_v3 }
  0xc9   : > { %3220 = vmatmul.mubr.msk.bf16.vlgmr.msra.gmra.mrb[8].mxu0 %vm865_vm9, %v3800_v36  ;;  %v3190_v45 = vcombine.low %v670_v2, %v673_v3  ;;  %1138 = vst.msk [vmem:[#allocation5 + $0x18] sm:$0xf] %vm1137_vm5, %v3617_v6  ;;  %1825 = vst.msk [vmem:[#allocation6 + $0x18] sm:$0xf] %vm1137_vm5, %v3617_v6 }
  0xca   : > { %v662_v9 = vsel %vm349_vm1, %v658_v5, %v659_v52  ;;  %v644_v10 = vsel %vm349_vm1, %v640_v57, %v641_v58  ;;  %992 = vmatprep.subr.bf16.mxu0 %v3191_v4  ;;  %v682_v11 = vmax.bf16 %v679_v8, %v676_v43  ;;  %983 = vmatprep.mubr.bf16.mxu0 %v3617_v6 }
  0xcb   : > { %v663_v12 = vsel %vm660_vm2, %v662_v9, %v657_v63  ;;  %v645_v13 = vsel %vm642_vm6, %v644_v10, %v639_v1  ;;  %993 = vmatpush1.bf16.msra.mxu0 %v3190_v45  ;;  %v685_v14 = vld [vmem:[#allocation2 + $0x58] sm:$0xff]  ;;  %v691_v57 = vld [vmem:[#allocation2 + $0x70] sm:$0xff]  ;;  %vm1105_vm2 = vcmask 191488   ;;  %vm1129_vm6 = vcmask 1043648  }
  0xcc   : > { %667 = vst.msk [vmem:[#allocation2 + $0xd0] sm:$0xff] %vm3876_vm3, %v663_v12  ;;  %649 = vst.msk [vmem:[#allocation2 + $0xb8] sm:$0xff] %vm3876_vm3, %v645_v13  ;;  %v688_v0 = vmax.bf16 %v685_v14, %v682_v11  ;;  %v3197_v51 = vcombine.high %v679_v8, %v685_v14  ;;  %v3196_v5 = vcombine.low %v679_v8, %v685_v14 }
  0xcd   : > { %1106 = vst.msk [vmem:[#allocation5] sm:$0xf] %vm1105_vm2, %v3617_v6  ;;  %1801 = vst.msk [vmem:[#allocation6] sm:$0xf] %vm1105_vm2, %v3617_v6  ;;  %vm1162_vm2 = vcmask 211972  }
  0xce   : > { %994 = vmatprep.subr.bf16.mxu0 %v3197_v51  ;;  %v694_v15 = vmax.bf16 %v691_v57, %v688_v0  ;;  %vm4018_vm8 = vmor %vm517_vm12, %vm1129_vm6 }
  0xcf   : > { %995 = vmatpush1.bf16.msra.mxu0 %v3196_v5  ;;  %v697_v16 = vld [vmem:[#allocation2 + $0x88] sm:$0xff]  ;;  %v703_v20 = vld [vmem:[#allocation2 + $0xa0] sm:$0xff]  ;;  %vm4049_vm5 = vmor %vm1162_vm2, %vm349_vm1  ;;  %vm4721_vm2 = vcmask 998400  }
  0xd0   : > { %v700_v17 = vmax.bf16 %v697_v16, %v694_v15  ;;  %v3203_v18 = vcombine.high %v691_v57, %v697_v16  ;;  %v3202_v19 = vcombine.low %v691_v57, %v697_v16  ;;  %vm4054_vm6 = vmor %vm517_vm12, %vm1159_vm4  ;;  %vm4719_vm12 = vcmask 1014784  }
  0xd1   : > { %3221 = vmatmul.mubr.msk.bf16.gmra.mrb[12].mxu0 %vm865_vm9, %v3852_v56  ;;  %vm4722_vm4 = vcmask 859136  }
  0xd2   : > { %996 = vmatprep.subr.bf16.mxu0 %v3203_v18  ;;  %v706_v21 = vmax.bf16 %v703_v20, %v700_v17  ;;  %1024 = vmatprep.mubr.bf16.mxu0 %v3617_v6 }
  0xd3   : > { %997 = vmatpush1.bf16.msra.mxu0 %v3202_v19  ;;  %v709_v22 = vld [vmem:[#allocation2 + $0xb8] sm:$0xff]  ;;  %v715_v23 = vld [vmem:[#allocation2 + $0xd0] sm:$0xff] }
  0xd4   : > { %v712_v24 = vmax.bf16 %v709_v22, %v706_v21  ;;  %v3209_v26 = vcombine.high %v703_v20, %v709_v22  ;;  %v3208_v29 = vcombine.low %v703_v20, %v709_v22  ;;  %v3215_v30 = vcombine.high %v715_v23, %v715_v23 }
  0xd5   : > { %v3214_v31 = vcombine.low %v715_v23, %v715_v23 }
  0xd6   : > { %998 = vmatprep.subr.bf16.mxu0 %v3209_v26  ;;  %v3950_v33 = vmax.bf16 %v715_v23, %v712_v24 }
  0xd7   : > { %999 = vmatpush1.bf16.msra.mxu0 %v3208_v29  ;;  %v885_v34 = vsel %vm349_vm1, %v3214_v31, 0 }
  0xd8   : > { %3222 = vmatprep.subr.msk.bf16.mxu0 %vm349_vm1, %v3215_v30  ;;  %v1047_v47 = vpop.permute.xlu0 %1046 }
  0xdb   : > { %1001 = vmatpush1.bf16.msra.mxu0 %v885_v34 }
  0xde   : > { %3223 = vmatmul.mubr.msk.bf16.vlgmr.msra.gmra.mrb[16].mxu0 %vm865_vm9, %v3800_v36  ;;  %v3968_v36 = vshrl.u32 %v1063_v35, 7 }
  0xdf   : > { %1034 = vmatprep.mubr.bf16.mxu0 %v3617_v6 }
  0xe0   : > { %v1065_v42 = vsub.s32 0, %v3968_v36  ;;  %v1069_v49 = vsub.s32 1, %v3968_v36  ;;  %v1073_v45 = vsub.s32 2, %v3968_v36  ;;  %v1077_v8 = vsub.s32 3, %v3968_v36 }
  0xe1   : > { %v1081_v26 = vsub.s32 4, %v3968_v36  ;;  %v1085_v29 = vsub.s32 5, %v3968_v36 }
  0xe2   : > { %v1066_v55 = vrot.slane %v1061_v48, %v1065_v42  ;;  %v1070_v39 = vrot.slane %v1061_v48, %v1069_v49  ;;  %v1074_v11 = vrot.slane %v1061_v48, %v1073_v45  ;;  %v1078_v14 = vrot.slane %v1061_v48, %v1077_v8 }
  0xe3   : > { %v1082_v34 = vrot.slane %v1061_v48, %v1081_v26  ;;  %v1086_v49 = vrot.slane %v1061_v48, %v1085_v29  ;;  %v1504_v29 = vld [vmem:[%s4678_s7] sm:$0xff] }
  0xe6   : > { %3224 = vmatmul.mubr.msk.bf16.gmra.mrb[20].mxu0 %vm865_vm9, %v3852_v56 }
  0xe7   : > { %1739 = vmatprep.mubr.bf16.mxu0 %v3617_v6 }
 0x181   : > { %v3962_v25 = vpop.f32.mrb[0].mxu0 }
 0x182   : > { %v3964_v38 = vpop.f32.mrb[1].mxu0 }
 0x183   : > { %v3966_v28 = vpop.f32.mrb[2].mxu0 }
 0x184   : > { %v2468_v40 = vpack.c.bf16 %v3966_v28, %v3962_v25  ;;  %v3972_v56 = vpop.f32.mrb[3].mxu0  ;;  %v3590_v25 = vld [vmem:[%s4673_s2 + $0x118] sm:$0xff]   ;;  %v3591_v28 = vld [vmem:[%s4673_s2 + $0x120] sm:$0xff]  }
 0x185   : > { %v2469_v41 = vpack.c.bf16 %v3972_v56, %v3964_v38  ;;  %v3563_v38 = vld [vmem:[%s4673_s2 + $0xc8] sm:$0xff]   ;;  %v3562_v56 = vld [vmem:[%s4673_s2 + $0x10] sm:$0xff]  }
 0x18a   : > { %v934_v50 = vpop.f32.mrb[4].mxu0 }
 0x18b   : > { %v936_v53 = vpop.f32.mrb[5].mxu0  ;;  %v1049_v54 = vadd.f32 %v1047_v47, %v934_v50 }
 0x18c   : > { %v938_v44 = vpop.f32.mrb[6].mxu0  ;;  %v1050_v37 = vadd.f32 %v1047_v47, %v936_v53 }
 0x18d   : > { %v939_v59 = vpop.f32.mrb[7].mxu0  ;;  %v1055_v60 = vmax.f32 %v1049_v54, 0.0 }
 0x18e   : > { %v1056_v61 = vmax.f32 %v1050_v37, 0.0 }
 0x18f   : > { %v1093_v62 = vmul.f32 %v1066_v55, %v1055_v60 }
 0x190   : > { %v1094_v63 = vmul.f32 %v1070_v39, %v1056_v61 }
 0x192   : > { %v3364_v1 = vpack.c.bf16 %v1094_v63, %v1093_v62 }
 0x194   : > { %1117 = vrot.lane.b32.xlu1 %v3364_v1, %s3628_s28 }
 0x19c   : > { %v3984_v2 = vpop.f32.mrb[8].mxu0 }
 0x19d   : > { %v3986_v3 = vpop.f32.mrb[9].mxu0 }
 0x19e   : > { %v3988_v52 = vpop.f32.mrb[10].mxu0 }
 0x19f   : > { %v2470_v58 = vpack.c.bf16 %v3988_v52, %v3984_v2  ;;  %v3992_v43 = vpop.f32.mrb[11].mxu0  ;;  %v3593_v2 = vld [vmem:[%s4673_s2 + $0x130] sm:$0xff]   ;;  %v3594_v52 = vld [vmem:[%s4673_s2 + $0x138] sm:$0xff]  }
 0x1a0   : > { %v2471_v4 = vpack.c.bf16 %v3992_v43, %v3986_v3  ;;  %v3569_v3 = vld [vmem:[%s4673_s2 + $0x60] sm:$0xff]   ;;  %v3568_v43 = vld [vmem:[%s4673_s2 + $0x90] sm:$0xff]  }
 0x1a4   : > { %v985_v9 = vpop.f32.mrb[12].mxu0 }
 0x1a5   : > { %v1051_v10 = vadd.f32 %v1047_v47, %v985_v9  ;;  %v987_v12 = vpop.f32.mrb[13].mxu0 }
 0x1a6   : > { %v1052_v13 = vadd.f32 %v1047_v47, %v987_v12  ;;  %v989_v0 = vpop.f32.mrb[14].mxu0 }
 0x1a7   : > { %v1057_v51 = vmax.f32 %v1051_v10, 0.0  ;;  %v990_v5 = vpop.f32.mrb[15].mxu0 }
 0x1a8   : > { %v1058_v57 = vmax.f32 %v1052_v13, 0.0 }
 0x1a9   : > { %v1095_v15 = vmul.f32 %v1074_v11, %v1057_v51 }
 0x1aa   : > { %v1096_v16 = vmul.f32 %v1078_v14, %v1058_v57 }
 0x1ab   : > { %v3365_v17 = vpack.c.bf16 %v1095_v15, %v1095_v15 }
 0x1ac   : > { %v3366_v18 = vpack.c.bf16 %v1096_v16, %v1095_v15 }
 0x1ad   : > { %1119 = vrot.lane.b32.xlu1 %v3365_v17, %s3628_s28 }
 0x1ae   : > { %1147 = vrot.lane.b32.xlu0 %v3366_v18, %s3629_s29 }
 0x1b1   : > { %v4000_v19 = vpop.f32.mrb[16].mxu0 }
 0x1b2   : > { %v4002_v20 = vpop.f32.mrb[17].mxu0 }
 0x1b3   : > { %v4004_v21 = vpop.f32.mrb[18].mxu0 }
 0x1b4   : > { %v2472_v22 = vpack.c.bf16 %v4004_v21, %v4000_v19  ;;  %v4008_v23 = vpop.f32.mrb[19].mxu0  ;;  %v3311_v19 = vcombine.high %v3950_v33, %v3950_v33  ;;  %v3308_v21 = vcombine.low %v3916_v46, %v3916_v46 }
 0x1b5   : > { %v2473_v24 = vpack.c.bf16 %v4008_v23, %v4002_v20 }
 0x1b9   : > { %v1036_v30 = vpop.f32.mrb[20].mxu0 }
 0x1ba   : > { %v1053_v31 = vadd.f32 %v1047_v47, %v1036_v30  ;;  %v1038_v35 = vpop.f32.mrb[21].mxu0 }
 0x1bb   : > { %v1054_v42 = vadd.f32 %v1047_v47, %v1038_v35  ;;  %v1040_v50 = vpop.f32.mrb[22].mxu0 }
 0x1bc   : > { %v1059_v53 = vmax.f32 %v1053_v31, 0.0  ;;  %v1041_v54 = vpop.f32.mrb[23].mxu0 }
 0x1bd   : > { %v1060_v55 = vmax.f32 %v1054_v42, 0.0 }
 0x1be   : > { %v1097_v44 = vmul.f32 %v1082_v34, %v1059_v53 }
 0x1bf   : > { %v1098_v37 = vmul.f32 %v1086_v49, %v1060_v55 }
 0x1c1   : > { %v3367_v39 = vpack.c.bf16 %v1098_v37, %v1097_v44 }
 0x1c3   : > { %1149 = vrot.lane.b32.xlu1 %v3367_v39, %s3629_s29 }
 0x206   : > { %v1118_v59 = vpop.permute.xlu1 %1117 }
 0x207   : > { %v1121_v60 = vrot.slane %v1118_v59, 4 }
 0x209   : > { %v1124_v47 = vsel %vm1123_vm7, %v1121_v60, %v1118_v59 }
 0x20a   : > { %1131 = vst.msk [vmem:[#allocation5] sm:$0xff] %vm4018_vm8, %v1124_v47 }
 0x211   : > { %v1165_v48 = vld [vmem:[#allocation5] sm:$0xff] }
 0x212   : > { %1169 = vrot.lane.b32.xlu0 %v1165_v48, %s3610_s17 }
 0x216   : > { %1185 = vrot.lane.b32.xlu0 %v1165_v48, %s3609_s16 }
 0x21a   : > { %1201 = vrot.lane.b32.xlu0 %v1165_v48, %s3611_s18 }
 0x21e   : > { %1217 = vrot.lane.b32.xlu0 %v1165_v48, %s3612_s19 }
 0x21f   : > { %v1120_v61 = vpop.permute.xlu1 %1119 }
 0x220   : > { %v1122_v62 = vrot.slane %v1120_v61, 4  ;;  %v1148_v10 = vpop.permute.xlu0 %1147 }
 0x221   : > { %v1151_v13 = vrot.slane %v1148_v10, 4 }
 0x222   : > { %v1125_v1 = vsel %vm349_vm1, %v1121_v60, %v1122_v62  ;;  %1233 = vrot.lane.b32.xlu0 %v1165_v48, %s3613_s20 }
 0x223   : > { %v1126_v45 = vsel %vm1123_vm7, %v1125_v1, %v1120_v61 }
 0x224   : > { %1134 = vst.msk [vmem:[#allocation5 + $0x8] sm:$0xff] %vm4030_vm13, %v1126_v45 }
 0x225   : > { %1136 = vst.msk [vmem:[#allocation5 + $0xc] sm:$0xf] %vm1135_vm14, %v3617_v6 }
 0x226   : > { %1250 = vrot.lane.b32.xlu0 %v1165_v48, %s3614_s21 }
 0x22a   : > { %1267 = vrot.lane.b32.xlu0 %v1165_v48, %s3615_s22 }
 0x22b   : > { %v1166_v8 = vld [vmem:[#allocation5 + $0x8] sm:$0xf] }
 0x22c   : > { %1171 = vrot.lane.b32.xlu1 %v1166_v8, %s3610_s17  ;;  %v1182_v9 = vld [vmem:[#allocation5 + $0x8] sm:$0xf] }
 0x22d   : > { %v1198_v11 = vld [vmem:[#allocation5 + $0x8] sm:$0xf] }
 0x22e   : > { %1284 = vrot.lane.b32.xlu0 %v1165_v48, %s4713_s11  ;;  %v1214_v5 = vld [vmem:[#allocation5 + $0x8] sm:$0xf] }
 0x230   : > { %1187 = vrot.lane.b32.xlu1 %v1182_v9, %s3609_s16 }
 0x232   : > { %1301 = vrot.lane.b32.xlu0 %v1165_v48, %s4714_s12 }
 0x234   : > { %1203 = vrot.lane.b32.xlu1 %v1198_v11, %s3611_s18 }
 0x235   : > { %v1150_v12 = vpop.permute.xlu1 %1149 }
 0x236   : > { %v1152_v0 = vrot.slane %v1150_v12, 4 }
 0x238   : > { %v1153_v57 = vsel %vm349_vm1, %v1151_v13, %v1152_v0  ;;  %v1156_v15 = vsel %vm865_vm9, %v1150_v12, %v1152_v0  ;;  %1219 = vrot.lane.b32.xlu1 %v1214_v5, %s3612_s19 }
 0x239   : > { %v1155_v16 = vsel %vm865_vm9, %v1148_v10, %v1153_v57  ;;  %1164 = vst.msk [vmem:[#allocation5 + $0x14] sm:$0xff] %vm4049_vm5, %v1156_v15 }
 0x23a   : > { %1161 = vst.msk [vmem:[#allocation5 + $0xc] sm:$0xff] %vm4054_vm6, %v1155_v16 }
 0x240   : > { %v1333_v17 = vld [vmem:[#allocation5 + $0x14] sm:$0xff] }
 0x241   : > { %1338 = vrot.lane.b32.xlu1 %v1333_v17, %s3630_s13  ;;  %1320 = vrot.lane.b32.xlu0 %v1333_v17, %s4696_s14  ;;  %v1230_v18 = vld [vmem:[#allocation5 + $0x8] sm:$0xff] }
 0x242   : > { %v1314_v26 = vld [vmem:[#allocation5 + $0xc] sm:$0xff] }
 0x245   : > { %1374 = vrot.lane.b32.xlu1 %v1333_v17, %s3632_s15  ;;  %1356 = vrot.lane.b32.xlu0 %v1333_v17, %s4694_s23 }
 0x249   : > { %1392 = vrot.lane.b32.xlu0 %v1333_v17, %s4698_s24  ;;  %1235 = vrot.lane.b32.xlu1 %v1230_v18, %s3613_s20 }
 0x24d   : > { %1318 = vrot.lane.b32.xlu0 %v1314_v26, %s4696_s14  ;;  %1252 = vrot.lane.b32.xlu1 %v1230_v18, %s3614_s21 }
 0x251   : > { %1354 = vrot.lane.b32.xlu0 %v1314_v26, %s4694_s23  ;;  %1269 = vrot.lane.b32.xlu1 %v1230_v18, %s3615_s22 }
 0x255   : > { %1390 = vrot.lane.b32.xlu0 %v1314_v26, %s4698_s24  ;;  %1286 = vrot.lane.b32.xlu1 %v1230_v18, %s4713_s11  ;;  %s3638_s24 = smov 55  }
 0x259   : > { %1426 = vrot.lane.b32.xlu0 %v1314_v26, %s3635_s25  ;;  %1336 = vrot.lane.b32.xlu1 %v1314_v26, %s3630_s13 }
 0x25d   : > { %1462 = vrot.lane.b32.xlu0 %v1314_v26, %s3636_s26  ;;  %1303 = vrot.lane.b32.xlu1 %v1230_v18, %s4714_s12 }
 0x261   : > { %1446 = vrot.lane.b32.xlu0 %v1333_v17, %s3637_s27  ;;  %1372 = vrot.lane.b32.xlu1 %v1314_v26, %s3632_s15 }
 0x265   : > { %1507 = vperm.xlu0 %3479, %v1504_v29   ;;  %1408 = vrot.lane.b32.xlu1 %v1314_v26, %s3638_s24 }
 0x269   : > { %1444 = vrot.lane.b32.xlu1 %v1314_v26, %s3637_s27 }
 0x26d   : > { %1410 = vrot.lane.b32.xlu1 %v1333_v17, %s3638_s24 }
 0x271   : > { %1428 = vrot.lane.b32.xlu1 %v1333_v17, %s3635_s25 }
 0x275   : > { %1464 = vrot.lane.b32.xlu1 %v1333_v17, %s3636_s26 }
 0x284   : > { %v1170_v30 = vpop.permute.xlu0 %1169 }
 0x285   : > { %v1173_v53 = vrot.slane %v1170_v30, 4 }
 0x288   : > { %v1186_v31 = vpop.permute.xlu0 %1185 }
 0x289   : > { %v1189_v39 = vrot.slane %v1186_v31, 4 }
 0x28c   : > { %v1202_v34 = vpop.permute.xlu0 %1201 }
 0x28d   : > { %v1205_v62 = vrot.slane %v1202_v34, 4 }
 0x290   : > { %v1218_v35 = vpop.permute.xlu0 %1217 }
 0x291   : > { %v1221_v13 = vrot.slane %v1218_v35, 4 }
 0x294   : > { %v1234_v42 = vpop.permute.xlu0 %1233 }
 0x298   : > { %v4092_v49 = vpop.permute.xlu0 %1250 }
 0x29c   : > { %v4097_v59 = vpop.permute.xlu0 %1267 }
 0x29e   : > { %v1172_v50 = vpop.permute.xlu1 %1171 }
 0x29f   : > { %v1174_v54 = vrot.slane %v1172_v50, 4  ;;  %1180 = vst.msk [vmem:[#allocation3 + $0x8] sm:$0xf] %vm356_vm0, %v1172_v50  ;;  %v1237_v50 = vrot.slane %v1234_v42, 4 }
 0x2a0   : > { %v4103_v9 = vpop.permute.xlu0 %1284 }
 0x2a1   : > { %v1175_v55 = vsel %vm349_vm1, %v1173_v53, %v1174_v54 }
 0x2a2   : > { %v1176_v44 = vsel %vm4719_vm12, %v1170_v30, %v1175_v55  ;;  %v1188_v37 = vpop.permute.xlu1 %1187  ;;  %vm4723_vm12 = vcmask 850944  }
 0x2a3   : > { %v1190_v60 = vrot.slane %v1188_v37, 4  ;;  %1196 = vst.msk [vmem:[#allocation3 + $0x20] sm:$0xf] %vm356_vm0, %v1188_v37 }
 0x2a4   : > { %v4110_v15 = vpop.permute.xlu0 %1301 }
 0x2a5   : > { %v1191_v47 = vsel %vm349_vm1, %v1189_v39, %v1190_v60  ;;  %v1254_v39 = vrot.slane %v4092_v49, 4 }
 0x2a6   : > { %v1192_v48 = vsel %vm4720_vm10, %v1186_v31, %v1191_v47  ;;  %v1204_v61 = vpop.permute.xlu1 %1203  ;;  %vm4724_vm10 = vmmov %vm4723_vm12 }
 0x2a7   : > { %v1206_v1 = vrot.slane %v1204_v61, 4  ;;  %1212 = vst.msk [vmem:[#allocation3 + $0x38] sm:$0xf] %vm356_vm0, %v1204_v61  ;;  %v3230_v45 = vcombine.high %v1176_v44, %v1192_v48  ;;  %v3229_v8 = vcombine.low %v1176_v44, %v1192_v48 }
 0x2a9   : > { %v1207_v10 = vsel %vm349_vm1, %v1205_v62, %v1206_v1  ;;  %1666 = vmatprep.subr.bf16.mxu1 %v3230_v45 }
 0x2aa   : > { %v1208_v11 = vsel %vm4721_vm2, %v1202_v34, %v1207_v10  ;;  %v1220_v12 = vpop.permute.xlu1 %1219  ;;  %1667 = vmatpush1.bf16.msra.mxu1 %v3229_v8  ;;  %vm4702_vm2 = vcmask 621568  }
 0x2ab   : > { %v1222_v0 = vrot.slane %v1220_v12, 4  ;;  %1228 = vst.msk [vmem:[#allocation3 + $0x50] sm:$0xf] %vm356_vm0, %v1220_v12 }
 0x2ad   : > { %v1223_v5 = vsel %vm349_vm1, %v1221_v13, %v1222_v0 }
 0x2ae   : > { %v1224_v57 = vsel %vm4722_vm4, %v1218_v35, %v1223_v5  ;;  %vm4701_vm4 = vcmask 605184  }
 0x2af   : > { %v3236_v16 = vcombine.high %v1208_v11, %v1224_v57  ;;  %v3235_v17 = vcombine.low %v1208_v11, %v1224_v57 }
 0x2b1   : > { %1668 = vmatprep.subr.bf16.mxu1 %v3236_v16 }
 0x2b2   : > { %1669 = vmatpush1.bf16.msra.mxu1 %v3235_v17 }
 0x2b3   : > { %v1321_v18 = vpop.permute.xlu0 %1320  ;;  %v4112_v26 = vpop.permute.xlu1 %1338 }
 0x2b4   : > { %v1323_v60 = vrot.slane %v1321_v18, 4 }
 0x2b7   : > { %v1357_v29 = vpop.permute.xlu0 %1356  ;;  %v4114_v30 = vpop.permute.xlu1 %1374 }
 0x2b8   : > { %v1359_v8 = vrot.slane %v1357_v29, 4 }
 0x2bb   : > { %v1393_v31 = vpop.permute.xlu0 %1392  ;;  %v1236_v34 = vpop.permute.xlu1 %1235 }
 0x2bc   : > { %v1238_v53 = vrot.slane %v1236_v34, 4 }
 0x2be   : > { %v1239_v54 = vsel %vm349_vm1, %v1237_v50, %v1238_v53  ;;  %v1241_v35 = vsel %vm4723_vm12, %v1236_v34, %v1238_v53  ;;  %vm4725_vm12 = vcmask 842752  }
 0x2bf   : > { %v1240_v55 = vsel %vm4724_vm10, %v1234_v42, %v1239_v54  ;;  %1245 = vst.msk [vmem:[#allocation3 + $0x68] sm:$0xf] %vm356_vm0, %v1241_v35  ;;  %v1319_v44 = vpop.permute.xlu0 %1318  ;;  %v1253_v37 = vpop.permute.xlu1 %1252  ;;  %v1271_v42 = vrot.slane %v4097_v59, 4  ;;  %vm4726_vm10 = vmmov %vm4725_vm12 }
 0x2c0   : > { %v1322_v47 = vrot.slane %v1319_v44, 4  ;;  %v1255_v48 = vrot.slane %v1253_v37, 4 }
 0x2c2   : > { %v1325_v61 = vsel %vm4702_vm2, %v1322_v47, %v1319_v44  ;;  %v1326_v62 = vsel %vm349_vm1, %v1322_v47, %v1323_v60  ;;  %v1256_v1 = vsel %vm349_vm1, %v1254_v39, %v1255_v48  ;;  %v1258_v45 = vsel %vm4725_vm12, %v1253_v37, %v1255_v48 }
 0x2c3   : > { %v1327_v10 = vsel %vm4702_vm2, %v1326_v62, %v1321_v18  ;;  %1330 = vst.msk [vmem:[#allocation3 + $0x8] sm:$0xff] %vm3779_vm15, %v1325_v61  ;;  %v1257_v11 = vsel %vm4726_vm10, %v4092_v49, %v1256_v1  ;;  %v1355_v12 = vpop.permute.xlu0 %1354  ;;  %v1270_v13 = vpop.permute.xlu1 %1269  ;;  %vm4727_vm12 = vcmask 703488   ;;  %v1395_v44 = vrot.slane %v1393_v31, 4 }
 0x2c4   : > { %1262 = vst.msk [vmem:[#allocation3 + $0x80] sm:$0xf] %vm356_vm0, %v1258_v45  ;;  %v1358_v0 = vrot.slane %v1355_v12, 4  ;;  %v1272_v5 = vrot.slane %v1270_v13, 4  ;;  %v3242_v57 = vcombine.high %v1240_v55, %v1257_v11  ;;  %v3241_v16 = vcombine.low %v1240_v55, %v1257_v11  ;;  %vm4728_vm10 = vmmov %vm4727_vm12 }
 0x2c5   : > { %1331 = vst.msk [vmem:[#allocation3 + $0x10] sm:$0xff] %vm3876_vm3, %v1327_v10  ;;  %v1288_v55 = vrot.slane %v4103_v9, 4  ;;  %v1341_v48 = vrot.slane %v4112_v26, 4  ;;  %vm4703_vm2 = vcmask 613376  }
 0x2c6   : > { %v1361_v17 = vsel %vm4701_vm4, %v1358_v0, %v1355_v12  ;;  %v1362_v18 = vsel %vm349_vm1, %v1358_v0, %v1359_v8  ;;  %v1273_v34 = vsel %vm349_vm1, %v1271_v42, %v1272_v5  ;;  %v1275_v50 = vsel %vm4727_vm12, %v1270_v13, %v1272_v5  ;;  %1670 = vmatprep.subr.bf16.mxu1 %v3242_v57 }
 0x2c7   : > { %v1363_v49 = vsel %vm4701_vm4, %v1362_v18, %v1357_v29  ;;  %1366 = vst.msk [vmem:[#allocation3 + $0x38] sm:$0xff] %vm3779_vm15, %v1361_v17  ;;  %v1274_v53 = vsel %vm4728_vm10, %v4097_v59, %v1273_v34  ;;  %v1391_v54 = vpop.permute.xlu0 %1390  ;;  %v1287_v35 = vpop.permute.xlu1 %1286  ;;  %1671 = vmatpush1.bf16.msra.mxu1 %v3241_v16  ;;  %vm1432_vm12 = vcmask 310272   ;;  %vm4729_vm10 = vcmask 695296  }
 0x2c8   : > { %1279 = vst.msk [vmem:[#allocation3 + $0x98] sm:$0xf] %vm356_vm0, %v1275_v50  ;;  %v1394_v37 = vrot.slane %v1391_v54, 4  ;;  %v1289_v29 = vrot.slane %v1287_v35, 4  ;;  %vm4730_vm4 = vmmov %vm4729_vm10  ;;  %v1305_v57 = vrot.slane %v4110_v15, 4 }
 0x2c9   : > { %1367 = vst.msk [vmem:[#allocation3 + $0x40] sm:$0xff] %vm3876_vm3, %v1363_v49 }
 0x2ca   : > { %v1397_v39 = vsel %vm4704_vm11, %v1394_v37, %v1391_v54  ;;  %v1398_v60 = vsel %vm349_vm1, %v1394_v37, %v1395_v44  ;;  %v1290_v59 = vsel %vm349_vm1, %v1288_v55, %v1289_v29  ;;  %v1292_v47 = vsel %vm4729_vm10, %v1287_v35, %v1289_v29 }
 0x2cb   : > { %v1399_v61 = vsel %vm4704_vm11, %v1398_v60, %v1393_v31  ;;  %1402 = vst.msk [vmem:[#allocation3 + $0x68] sm:$0xff] %vm3779_vm15, %v1397_v39  ;;  %v1291_v62 = vsel %vm4730_vm4, %v4103_v9, %v1290_v59  ;;  %v4158_v1 = vpop.permute.xlu0 %1426  ;;  %v1337_v45 = vpop.permute.xlu1 %1336  ;;  %vm1468_vm4 = vcmask 293888   ;;  %vm4731_vm10 = vcmask 687104  }
 0x2cc   : > { %1296 = vst.msk [vmem:[#allocation3 + $0xb0] sm:$0xf] %vm356_vm0, %v1292_v47  ;;  %v1430_v42 = vrot.slane %v4158_v1, 4  ;;  %v1340_v8 = vrot.slane %v1337_v45, 4  ;;  %v3248_v10 = vcombine.high %v1274_v53, %v1291_v62  ;;  %v3247_v31 = vcombine.low %v1274_v53, %v1291_v62 }
 0x2cd   : > { %1403 = vst.msk [vmem:[#allocation3 + $0x70] sm:$0xff] %vm3876_vm3, %v1399_v61  ;;  %vm1378_vm11 = vcmask 465920   ;;  %v1377_v53 = vrot.slane %v4114_v30, 4 }
 0x2ce   : > { %v1433_v11 = vsel %vm1432_vm12, %v1430_v42, %v4158_v1  ;;  %v1343_v9 = vsel %vm4703_vm2, %v1340_v8, %v1337_v45  ;;  %v1344_v12 = vsel %vm349_vm1, %v1340_v8, %v1341_v48  ;;  %1672 = vmatprep.subr.bf16.mxu1 %v3248_v10  ;;  %v4204_v48 = vld [vmem:[%s4675_s4] sm:$0xf] }
 0x2cf   : > { %1438 = vst.msk [vmem:[#allocation3 + $0x98] sm:$0xff] %vm3779_vm15, %v1433_v11  ;;  %v1345_v13 = vsel %vm4703_vm2, %v1344_v12, %v4112_v26  ;;  %1348 = vst.msk [vmem:[#allocation3 + $0x20] sm:$0xff] %vm3779_vm15, %v1343_v9  ;;  %v4175_v0 = vpop.permute.xlu0 %1462  ;;  %v1304_v5 = vpop.permute.xlu1 %1303  ;;  %1673 = vmatpush1.bf16.msra.mxu1 %v3247_v31 }
 0x2d0   : > { %1349 = vst.msk [vmem:[#allocation3 + $0x28] sm:$0xff] %vm3876_vm3, %v1345_v13  ;;  %v1466_v16 = vrot.slane %v4175_v0, 4  ;;  %v1306_v17 = vrot.slane %v1304_v5, 4  ;;  %vm4732_vm2 = vmmov %vm4731_vm10 }
 0x2d2   : > { %v1469_v26 = vsel %vm1468_vm4, %v1466_v16, %v4175_v0  ;;  %v1307_v18 = vsel %vm349_vm1, %v1305_v57, %v1306_v17  ;;  %v1309_v34 = vsel %vm4731_vm10, %v1304_v5, %v1306_v17  ;;  %vm1450_vm10 = vcmask 302080  }
 0x2d3   : > { %v1308_v50 = vsel %vm4732_vm2, %v4110_v15, %v1307_v18  ;;  %1313 = vst.msk [vmem:[#allocation3 + $0xc8] sm:$0xf] %vm356_vm0, %v1309_v34  ;;  %v1373_v49 = vpop.permute.xlu1 %1372  ;;  %vm1414_vm2 = vcmask 449536   ;;  %v1447_v62 = vpop.permute.xlu0 %1446 }
 0x2d4   : > { %1474 = vst.msk [vmem:[#allocation3 + $0xc8] sm:$0xff] %vm3779_vm15, %v1469_v26  ;;  %v1376_v54 = vrot.slane %v1373_v49, 4  ;;  %v3254_v35 = vcombine.high %v1308_v50, %v1308_v50  ;;  %v3253_v55 = vcombine.low %v1308_v50, %v1308_v50  ;;  %v1449_v10 = vrot.slane %v1447_v62, 4 }
 0x2d6   : > { %v1379_v44 = vsel %vm1378_vm11, %v1376_v54, %v1373_v49  ;;  %v1380_v37 = vsel %vm349_vm1, %v1376_v54, %v1377_v53  ;;  %v3498_v29 = vld [vmem:[#allocation3 + $0x8] ss:$24 sps:$4 sm:$0xff]   ;;  %v3500_v39 = vld [vmem:[#allocation3 + $0xc] ss:$24 sps:$4 sm:$0xff]   ;;  %3259 = vmatprep.subr.msk.bf16.mxu1 %vm349_vm1, %v3254_v35  ;;  %v1649_v15 = vsel %vm349_vm1, %v3253_v55, 0 }
 0x2d7   : > { %v1381_v60 = vsel %vm1378_vm11, %v1380_v37, %v4114_v30  ;;  %1384 = vst.msk [vmem:[#allocation3 + $0x50] sm:$0xff] %vm3779_vm15, %v1379_v44  ;;  %v1409_v59 = vpop.permute.xlu1 %1408  ;;  %1675 = vmatpush1.bf16.msra.mxu1 %v1649_v15  ;;  %v3503_v47 = vld [vmem:[#allocation3 + $0x14] ss:$24 sps:$4 sm:$0xff]   ;;  %1707 = vmatprep.subr.bf16.mxu0 %v3500_v39  ;;  %v3501_v30 = vld [vmem:[#allocation3 + $0x10] ss:$24 sps:$4 sm:$0xff]  }
 0x2d8   : > { %1385 = vst.msk [vmem:[#allocation3 + $0x58] sm:$0xff] %vm3876_vm3, %v1381_v60  ;;  %v1412_v61 = vrot.slane %v1409_v59, 4  ;;  %1708 = vmatpush1.bf16.msra.mxu0 %v3498_v29  ;;  %1748 = vmatprep.subr.bf16.mxu1 %v3503_v47 }
 0x2da   : > { %v1415_v45 = vsel %vm1414_vm2, %v1412_v61, %v1409_v59  ;;  %3260 = vmatmul.mubr.msk.bf16.vlgmr.msra.gmra.mrb[0].mxu1 %vm865_vm9, %v4204_v48 }
 0x2db   : > { %1420 = vst.msk [vmem:[#allocation3 + $0x80] sm:$0xff] %vm3779_vm15, %v1415_v45  ;;  %v1445_v8 = vpop.permute.xlu1 %1444  ;;  %1749 = vmatpush1.bf16.msra.mxu1 %v3501_v30  ;;  %1780 = vmatprep.mubr.bf16.mxu1 %v3617_v6  ;;  %v1502_v55 = vld [vmem:[#allocation3 + $0xc8] sm:$0xff] }
 0x2dc   : > { %v1448_v31 = vrot.slane %v1445_v8, 4  ;;  %v3256_v59 = vcombine.high %v1502_v55, %v1502_v55  ;;  %v3255_v47 = vcombine.low %v1502_v55, %v1502_v55 }
 0x2de   : > { %v1451_v11 = vsel %vm1450_vm10, %v1448_v31, %v1445_v8  ;;  %v1452_v9 = vsel %vm349_vm1, %v1448_v31, %v1449_v10  ;;  %v3504_v12 = vld [vmem:[#allocation3 + $0x38] ss:$24 sps:$4 sm:$0xff]   ;;  %v3506_v13 = vld [vmem:[#allocation3 + $0x3c] ss:$24 sps:$4 sm:$0xff]   ;;  %v1655_v30 = vsel %vm349_vm1, %v3255_v47, 0 }
 0x2df   : > { %v1453_v5 = vsel %vm1450_vm10, %v1452_v9, %v1447_v62  ;;  %1456 = vst.msk [vmem:[#allocation3 + $0xb0] sm:$0xff] %vm3779_vm15, %v1451_v11  ;;  %v1411_v57 = vpop.permute.xlu1 %1410  ;;  %v3507_v17 = vld [vmem:[#allocation3 + $0x40] ss:$24 sps:$4 sm:$0xff]   ;;  %v3509_v26 = vld [vmem:[#allocation3 + $0x44] ss:$24 sps:$4 sm:$0xff]   ;;  %1709 = vmatprep.subr.bf16.mxu0 %v3506_v13 }
 0x2e0   : > { %1457 = vst.msk [vmem:[#allocation3 + $0xb8] sm:$0xff] %vm3876_vm3, %v1453_v5  ;;  %v1413_v18 = vrot.slane %v1411_v57, 4  ;;  %1710 = vmatpush1.bf16.msra.mxu0 %v3504_v12  ;;  %1750 = vmatprep.subr.bf16.mxu1 %v3509_v26 }
 0x2e1   : > { %1751 = vmatpush1.bf16.msra.mxu1 %v3507_v17 }
 0x2e2   : > { %v1416_v34 = vsel %vm349_vm1, %v1412_v61, %v1413_v18  ;;  %v3510_v50 = vld [vmem:[#allocation3 + $0x68] ss:$24 sps:$4 sm:$0xff]   ;;  %v3512_v49 = vld [vmem:[#allocation3 + $0x6c] ss:$24 sps:$4 sm:$0xff]  }
 0x2e3   : > { %v1417_v53 = vsel %vm1414_vm2, %v1416_v34, %v1411_v57  ;;  %v1429_v54 = vpop.permute.xlu1 %1428  ;;  %1711 = vmatprep.subr.bf16.mxu0 %v3512_v49 }
 0x2e4   : > { %1421 = vst.msk [vmem:[#allocation3 + $0x88] sm:$0xff] %vm3876_vm3, %v1417_v53  ;;  %v1431_v35 = vrot.slane %v1429_v54, 4  ;;  %1712 = vmatpush1.bf16.msra.mxu0 %v3510_v50  ;;  %v1508_v11 = vpop.permute.xlu0 %1507 }
 0x2e6   : > { %v1434_v44 = vsel %vm349_vm1, %v1430_v42, %v1431_v35  ;;  %v3513_v37 = vld [vmem:[#allocation3 + $0x98] ss:$24 sps:$4 sm:$0xff]   ;;  %v3515_v29 = vld [vmem:[#allocation3 + $0x9c] ss:$24 sps:$4 sm:$0xff]  }
 0x2e7   : > { %v1435_v39 = vsel %vm1432_vm12, %v1434_v44, %v1429_v54  ;;  %v1465_v15 = vpop.permute.xlu1 %1464  ;;  %1713 = vmatprep.subr.bf16.mxu0 %v3515_v29 }
 0x2e8   : > { %1439 = vst.msk [vmem:[#allocation3 + $0xa0] sm:$0xff] %vm3876_vm3, %v1435_v39  ;;  %v1467_v60 = vrot.slane %v1465_v15, 4  ;;  %1714 = vmatpush1.bf16.msra.mxu0 %v3513_v37 }
 0x2e9   : > { %3261 = vmatprep.subr.msk.bf16.mxu0 %vm349_vm1, %v3256_v59 }
 0x2ea   : > { %v1470_v61 = vsel %vm349_vm1, %v1466_v16, %v1467_v60 }
 0x2eb   : > { %v1471_v1 = vsel %vm1468_vm4, %v1470_v61, %v1465_v15  ;;  %v3518_v42 = vld [vmem:[#allocation3 + $0x70] ss:$24 sps:$4 sm:$0xff]   ;;  %v3520_v62 = vld [vmem:[#allocation3 + $0x74] ss:$24 sps:$4 sm:$0xff]  }
 0x2ec   : > { %1475 = vst.msk [vmem:[#allocation3 + $0xd0] sm:$0xff] %vm3876_vm3, %v1471_v1  ;;  %1716 = vmatpush1.bf16.msra.mxu0 %v1655_v30  ;;  %1752 = vmatprep.subr.bf16.mxu1 %v3520_v62 }
 0x2ed   : > { %1753 = vmatpush1.bf16.msra.mxu1 %v3518_v42 }
 0x2ef   : > { %v3521_v45 = vld [vmem:[#allocation3 + $0xa0] ss:$24 sps:$4 sm:$0xff]   ;;  %v3523_v8 = vld [vmem:[#allocation3 + $0xa4] ss:$24 sps:$4 sm:$0xff]   ;;  %3262 = vmatmul.mubr.msk.bf16.vlgmr.msra.gmra.mrb[24].mxu0 %vm865_vm9, %v4204_v48 }
 0x2f0   : > { %1754 = vmatprep.subr.bf16.mxu1 %v3523_v8  ;;  %2371 = vmatprep.mubr.bf16.mxu0 %v3617_v6 }
 0x2f1   : > { %1755 = vmatpush1.bf16.msra.mxu1 %v3521_v45 }
 0x2f3   : > { %v1503_v0 = vld [vmem:[#allocation3 + $0xd0] sm:$0xff] }
 0x2f4   : > { %v3258_v16 = vcombine.high %v1503_v0, %v1503_v0  ;;  %v3257_v10 = vcombine.low %v1503_v0, %v1503_v0 }
 0x2f6   : > { %3263 = vmatprep.subr.msk.bf16.mxu1 %vm349_vm1, %v3258_v16  ;;  %v1661_v31 = vsel %vm349_vm1, %v3257_v10, 0 }
 0x2f7   : > { %1757 = vmatpush1.bf16.msra.mxu1 %v1661_v31 }
 0x2fa   : > { %3264 = vmatmul.mubr.msk.bf16.vlgmr.msra.gmra.mrb[4].mxu1 %vm865_vm9, %v4204_v48 }
 0x2fb   : > { %2414 = vmatprep.mubr.bf16.mxu1 %v3617_v6 }
 0x3ad   : > { %v1700_v9 = vpop.f32.mrb[0].mxu1 }
 0x3ae   : > { %v1701_v12 = vadd.f32 %v1700_v9, %v1508_v11  ;;  %v1702_v13 = vpop.f32.mrb[1].mxu1 }
 0x3af   : > { %v1703_v5 = vadd.f32 %v1702_v13, %v1508_v11  ;;  %v1704_v57 = vpop.f32.mrb[2].mxu1 }
 0x3b0   : > { %v1789_v17 = vmax.f32 %v1701_v12, 0.0  ;;  %v1705_v26 = vpop.f32.mrb[3].mxu1 }
 0x3b1   : > { %v1790_v18 = vmax.f32 %v1703_v5, 0.0 }
 0x3b3   : > { %v3368_v34 = vpack.c.bf16 %v1790_v18, %v1789_v17 }
 0x3b5   : > { %1811 = vrot.lane.b32.xlu1 %v3368_v34, %s3628_s28 }
 0x3c2   : > { %v1741_v50 = vpop.f32.mrb[24].mxu0 }
 0x3c3   : > { %v1742_v49 = vadd.f32 %v1741_v50, %v1508_v11  ;;  %v1743_v53 = vpop.f32.mrb[25].mxu0 }
 0x3c4   : > { %v1744_v54 = vadd.f32 %v1743_v53, %v1508_v11  ;;  %v1745_v35 = vpop.f32.mrb[26].mxu0  ;;  %v2594_v53 = vld [vmem:[%s4679_s8 + $0x18] sm:$0xff] }
 0x3c5   : > { %v1791_v48 = vmax.f32 %v1742_v49, 0.0  ;;  %v1746_v55 = vpop.f32.mrb[27].mxu0  ;;  %v2592_v49 = vld [vmem:[%s4679_s8 + $0x8] sm:$0xff] }
 0x3c6   : > { %v1792_v44 = vmax.f32 %v1744_v54, 0.0 }
 0x3c7   : > { %v3369_v37 = vpack.c.bf16 %v1791_v48, %v1791_v48 }
 0x3c8   : > { %v3370_v29 = vpack.c.bf16 %v1792_v44, %v1791_v48  ;;  %v2591_v44 = vld [vmem:[%s4679_s8] sm:$0xff] }
 0x3c9   : > { %1813 = vrot.lane.b32.xlu0 %v3369_v37, %s3628_s28  ;;  %s4734_s28 = smov 74  }
 0x3ca   : > { %1834 = vrot.lane.b32.xlu1 %v3370_v29, %s3629_s29 }
 0x3cd   : > { %v1782_v39 = vpop.f32.mrb[4].mxu1 }
 0x3ce   : > { %v1783_v15 = vadd.f32 %v1782_v39, %v1508_v11  ;;  %v1784_v60 = vpop.f32.mrb[5].mxu1 }
 0x3cf   : > { %v1785_v59 = vadd.f32 %v1784_v60, %v1508_v11  ;;  %v1786_v47 = vpop.f32.mrb[6].mxu1 }
 0x3d0   : > { %v1793_v61 = vmax.f32 %v1783_v15, 0.0  ;;  %v1787_v1 = vpop.f32.mrb[7].mxu1 }
 0x3d1   : > { %v1794_v42 = vmax.f32 %v1785_v59, 0.0 }
 0x3d3   : > { %v3371_v62 = vpack.c.bf16 %v1794_v42, %v1793_v61 }
 0x3d5   : > { %1836 = vrot.lane.b32.xlu0 %v3371_v62, %s3629_s29 }
 0x427   : > { %v1812_v30 = vpop.permute.xlu1 %1811 }
 0x428   : > { %v1815_v45 = vrot.slane %v1812_v30, 4 }
 0x42a   : > { %v1817_v8 = vsel %vm1123_vm7, %v1815_v45, %v1812_v30 }
 0x42b   : > { %1822 = vst.msk [vmem:[#allocation6] sm:$0xff] %vm4018_vm8, %v1817_v8  ;;  %vm4737_vm8 = vcmask 1006592  }
 0x432   : > { %v1847_v0 = vld [vmem:[#allocation6] sm:$0xff] }
 0x433   : > { %1851 = vrot.lane.b32.xlu1 %v1847_v0, %s3610_s17 }
 0x437   : > { %1867 = vrot.lane.b32.xlu1 %v1847_v0, %s3609_s16 }
 0x43b   : > { %1883 = vrot.lane.b32.xlu1 %v1847_v0, %s3611_s18  ;;  %v1814_v16 = vpop.permute.xlu0 %1813 }
 0x43c   : > { %v1816_v10 = vrot.slane %v1814_v16, 4  ;;  %v1835_v36 = vpop.permute.xlu1 %1834 }
 0x43d   : > { %v1838_v12 = vrot.slane %v1835_v36, 4 }
 0x43e   : > { %v1818_v31 = vsel %vm349_vm1, %v1815_v45, %v1816_v10 }
 0x43f   : > { %1899 = vrot.lane.b32.xlu1 %v1847_v0, %s3612_s19  ;;  %v1819_v11 = vsel %vm1123_vm7, %v1818_v31, %v1814_v16  ;;  %vm4736_vm7 = vcmask 1014784  }
 0x440   : > { %1823 = vst.msk [vmem:[#allocation6 + $0x8] sm:$0xff] %vm4030_vm13, %v1819_v11  ;;  %vm4738_vm13 = vcmask 998400  }
 0x441   : > { %1824 = vst.msk [vmem:[#allocation6 + $0xc] sm:$0xf] %vm1135_vm14, %v3617_v6  ;;  %vm4739_vm14 = vcmask 859136  }
 0x443   : > { %1915 = vrot.lane.b32.xlu1 %v1847_v0, %s3613_s20 }
 0x447   : > { %v1837_v9 = vpop.permute.xlu0 %1836  ;;  %1932 = vrot.lane.b32.xlu1 %v1847_v0, %s3614_s21  ;;  %v1848_v5 = vld [vmem:[#allocation6 + $0x8] sm:$0xf] }
 0x448   : > { %v1839_v13 = vrot.slane %v1837_v9, 4  ;;  %1853 = vrot.lane.b32.xlu0 %v1848_v5, %s3610_s17  ;;  %v1864_v26 = vld [vmem:[#allocation6 + $0x8] sm:$0xf]  ;;  %s4733_s17 = smov 76  }
 0x449   : > { %v1880_v18 = vld [vmem:[#allocation6 + $0x8] sm:$0xf] }
 0x44a   : > { %v1840_v57 = vsel %vm349_vm1, %v1838_v12, %v1839_v13  ;;  %v1842_v17 = vsel %vm865_vm9, %v1837_v9, %v1839_v13  ;;  %v1896_v34 = vld [vmem:[#allocation6 + $0x8] sm:$0xf] }
 0x44b   : > { %v1841_v63 = vsel %vm865_vm9, %v1835_v36, %v1840_v57  ;;  %1846 = vst.msk [vmem:[#allocation6 + $0x14] sm:$0xff] %vm4049_vm5, %v1842_v17  ;;  %1949 = vrot.lane.b32.xlu1 %v1847_v0, %s3615_s22  ;;  %vm4740_vm5 = vcmask 850944  }
 0x44c   : > { %1845 = vst.msk [vmem:[#allocation6 + $0xc] sm:$0xff] %vm4054_vm6, %v1841_v63  ;;  %1869 = vrot.lane.b32.xlu0 %v1864_v26, %s3609_s16  ;;  %s4735_s16 = smov 56   ;;  %vm4741_vm6 = vmmov %vm4740_vm5 }
 0x44f   : > { %1966 = vrot.lane.b32.xlu1 %v1847_v0, %s4713_s11 }
 0x450   : > { %1885 = vrot.lane.b32.xlu0 %v1880_v18, %s3611_s18 }
 0x452   : > { %v2014_v14 = vld [vmem:[#allocation6 + $0x14] sm:$0xff] }
 0x453   : > { %1983 = vrot.lane.b32.xlu1 %v1847_v0, %s4714_s12  ;;  %v1912_v51 = vld [vmem:[#allocation6 + $0x8] sm:$0xff] }
 0x454   : > { %1901 = vrot.lane.b32.xlu0 %v1896_v34, %s3612_s19  ;;  %v1996_v50 = vld [vmem:[#allocation6 + $0xc] sm:$0xff] }
 0x457   : > { %2002 = vrot.lane.b32.xlu1 %v2014_v14, %s4733_s17 }
 0x458   : > { %2019 = vrot.lane.b32.xlu0 %v2014_v14, %s3630_s13 }
 0x45b   : > { %2036 = vrot.lane.b32.xlu1 %v2014_v14, %s4734_s28 }
 0x45c   : > { %2053 = vrot.lane.b32.xlu0 %v2014_v14, %s3632_s15 }
 0x45f   : > { %2070 = vrot.lane.b32.xlu1 %v2014_v14, %s4735_s16 }
 0x460   : > { %2087 = vrot.lane.b32.xlu0 %v2014_v14, %s3638_s24 }
 0x463   : > { %2104 = vrot.lane.b32.xlu1 %v2014_v14, %s3635_s25 }
 0x464   : > { %1917 = vrot.lane.b32.xlu0 %v1912_v51, %s3613_s20 }
 0x467   : > { %2000 = vrot.lane.b32.xlu1 %v1996_v50, %s4733_s17 }
 0x468   : > { %1934 = vrot.lane.b32.xlu0 %v1912_v51, %s3614_s21 }
 0x46b   : > { %2034 = vrot.lane.b32.xlu1 %v1996_v50, %s4734_s28 }
 0x46c   : > { %1951 = vrot.lane.b32.xlu0 %v1912_v51, %s3615_s22 }
 0x46f   : > { %2068 = vrot.lane.b32.xlu1 %v1996_v50, %s4735_s16 }
 0x470   : > { %1968 = vrot.lane.b32.xlu0 %v1912_v51, %s4713_s11 }
 0x473   : > { %2102 = vrot.lane.b32.xlu1 %v1996_v50, %s3635_s25 }
 0x474   : > { %1985 = vrot.lane.b32.xlu0 %v1912_v51, %s4714_s12 }
 0x477   : > { %2136 = vrot.lane.b32.xlu1 %v1996_v50, %s3636_s26 }
 0x478   : > { %2017 = vrot.lane.b32.xlu0 %v1996_v50, %s3630_s13 }
 0x47b   : > { %2598 = vperm.xlu1 %3480, %v2591_v44  }
 0x47c   : > { %2051 = vrot.lane.b32.xlu0 %v1996_v50, %s3632_s15  ;;  %s3440_s15 = smul.u32 40, %s4764_s10 }
 0x480   : > { %2085 = vrot.lane.b32.xlu0 %v1996_v50, %s3638_s24 }
 0x484   : > { %2119 = vrot.lane.b32.xlu0 %v1996_v50, %s3637_s27 }
 0x488   : > { %2121 = vrot.lane.b32.xlu0 %v2014_v14, %s3637_s27 }
 0x48c   : > { %2138 = vrot.lane.b32.xlu0 %v2014_v14, %s3636_s26  ;;  %s4661_s26 = scalar_lea.vmem %s4680_s9, %s3440_s15 }
 0x490   : > { %2603 = vperm.xlu0 %3479, %v2592_v49  }
 0x494   : > { %2613 = vperm.xlu0 %3479, %v2594_v53  }
 0x4a5   : > { %v1852_v54 = vpop.permute.xlu1 %1851 }
 0x4a6   : > { %v1855_v15 = vrot.slane %v1852_v54, 4 }
 0x4a9   : > { %v1868_v35 = vpop.permute.xlu1 %1867 }
 0x4aa   : > { %v1871_v42 = vrot.slane %v1868_v35, 4 }
 0x4ad   : > { %v1884_v48 = vpop.permute.xlu1 %1883 }
 0x4ae   : > { %v1887_v16 = vrot.slane %v1884_v48, 4 }
 0x4b1   : > { %v1900_v55 = vpop.permute.xlu1 %1899 }
 0x4b2   : > { %v1903_v5 = vrot.slane %v1900_v55, 4 }
 0x4b5   : > { %v1916_v37 = vpop.permute.xlu1 %1915 }
 0x4b9   : > { %v4312_v29 = vpop.permute.xlu1 %1932 }
 0x4ba   : > { %v1854_v39 = vpop.permute.xlu0 %1853 }
 0x4bb   : > { %v1856_v60 = vrot.slane %v1854_v39, 4  ;;  %1862 = vst.msk [vmem:[#allocation4 + $0x8] sm:$0xf] %vm356_vm0, %v1854_v39 }
 0x4bd   : > { %v4315_v59 = vpop.permute.xlu1 %1949  ;;  %v1857_v47 = vsel %vm349_vm1, %v1855_v15, %v1856_v60 }
 0x4be   : > { %v1858_v61 = vsel %vm4736_vm7, %v1852_v54, %v1857_v47  ;;  %v1870_v1 = vpop.permute.xlu0 %1869  ;;  %vm4742_vm7 = vcmask 621568  }
 0x4bf   : > { %v1872_v62 = vrot.slane %v1870_v1, 4  ;;  %1878 = vst.msk [vmem:[#allocation4 + $0x20] sm:$0xf] %vm356_vm0, %v1870_v1 }
 0x4c1   : > { %v4320_v30 = vpop.permute.xlu1 %1966  ;;  %v1873_v45 = vsel %vm349_vm1, %v1871_v42, %v1872_v62  ;;  %v1936_v42 = vrot.slane %v4312_v29, 4 }
 0x4c2   : > { %v1874_v8 = vsel %vm4737_vm8, %v1868_v35, %v1873_v45  ;;  %v1886_v0 = vpop.permute.xlu0 %1885  ;;  %vm4743_vm8 = vmmov %vm4742_vm7 }
 0x4c3   : > { %v1888_v10 = vrot.slane %v1886_v0, 4  ;;  %1894 = vst.msk [vmem:[#allocation4 + $0x38] sm:$0xf] %vm356_vm0, %v1886_v0  ;;  %v3270_v31 = vcombine.low %v1858_v61, %v1874_v8  ;;  %v3271_v11 = vcombine.high %v1858_v61, %v1874_v8 }
 0x4c5   : > { %v4325_v36 = vpop.permute.xlu1 %1983  ;;  %v1889_v9 = vsel %vm349_vm1, %v1887_v16, %v1888_v10  ;;  %2339 = vmatprep.subr.bf16.mxu0 %v3271_v11 }
 0x4c6   : > { %v1890_v12 = vsel %vm4738_vm13, %v1884_v48, %v1889_v9  ;;  %v1902_v13 = vpop.permute.xlu0 %1901  ;;  %2340 = vmatpush1.bf16.msra.mxu0 %v3270_v31  ;;  %v1919_v48 = vrot.slane %v1916_v37, 4  ;;  %vm4744_vm13 = vcmask 842752   ;;  %v1953_v9 = vrot.slane %v4315_v59, 4 }
 0x4c7   : > { %v1904_v57 = vrot.slane %v1902_v13, 4  ;;  %1910 = vst.msk [vmem:[#allocation4 + $0x50] sm:$0xf] %vm356_vm0, %v1902_v13 }
 0x4c9   : > { %v2003_v17 = vpop.permute.xlu1 %2002  ;;  %v1905_v63 = vsel %vm349_vm1, %v1903_v5, %v1904_v57 }
 0x4ca   : > { %v1906_v26 = vsel %vm4739_vm14, %v1900_v55, %v1905_v63  ;;  %v4332_v18 = vpop.permute.xlu0 %2019  ;;  %v2005_v15 = vrot.slane %v2003_v17, 4  ;;  %vm4745_vm14 = vmmov %vm4744_vm13 }
 0x4cb   : > { %v3276_v34 = vcombine.low %v1890_v12, %v1906_v26  ;;  %v3277_v14 = vcombine.high %v1890_v12, %v1906_v26 }
 0x4cd   : > { %v2037_v51 = vpop.permute.xlu1 %2036  ;;  %2341 = vmatprep.subr.bf16.mxu0 %v3277_v14 }
 0x4ce   : > { %v4334_v50 = vpop.permute.xlu0 %2053  ;;  %2342 = vmatpush1.bf16.msra.mxu0 %v3276_v34  ;;  %v2039_v10 = vrot.slane %v2037_v51, 4 }
 0x4d1   : > { %v2071_v49 = vpop.permute.xlu1 %2070 }
 0x4d2   : > { %v4336_v53 = vpop.permute.xlu0 %2087 }
 0x4d5   : > { %v4338_v54 = vpop.permute.xlu1 %2104 }
 0x4d6   : > { %v1918_v35 = vpop.permute.xlu0 %1917 }
 0x4d7   : > { %v1920_v44 = vrot.slane %v1918_v35, 4 }
 0x4d9   : > { %v2001_v39 = vpop.permute.xlu1 %2000  ;;  %v1921_v55 = vsel %vm349_vm1, %v1919_v48, %v1920_v44  ;;  %v1923_v60 = vsel %vm4740_vm5, %v1918_v35, %v1920_v44  ;;  %vm4746_vm5 = vcmask 605184   ;;  %v2073_v35 = vrot.slane %v2071_v49, 4 }
 0x4da   : > { %v2004_v47 = vrot.slane %v2001_v39, 4  ;;  %v1922_v61 = vsel %vm4741_vm6, %v1916_v37, %v1921_v55  ;;  %1927 = vst.msk [vmem:[#allocation4 + $0x68] sm:$0xf] %vm356_vm0, %v1923_v60  ;;  %v1935_v1 = vpop.permute.xlu0 %1934  ;;  %vm4747_vm6 = vmmov %vm4746_vm5 }
 0x4db   : > { %v1937_v62 = vrot.slane %v1935_v1, 4 }
 0x4dc   : > { %v2006_v45 = vsel %vm4742_vm7, %v2004_v47, %v2001_v39  ;;  %v2007_v8 = vsel %vm349_vm1, %v2004_v47, %v2005_v15  ;;  %vm4748_vm7 = vcmask 703488   ;;  %v1970_v15 = vrot.slane %v4320_v30, 4 }
 0x4dd   : > { %v2008_v0 = vsel %vm4743_vm8, %v2007_v8, %v2003_v17  ;;  %2011 = vst.msk [vmem:[#allocation4 + $0x8] sm:$0xff] %vm3779_vm15, %v2006_v45  ;;  %v2035_v16 = vpop.permute.xlu1 %2034  ;;  %v1938_v31 = vsel %vm349_vm1, %v1936_v42, %v1937_v62  ;;  %v1940_v37 = vsel %vm4744_vm13, %v1935_v1, %v1937_v62  ;;  %vm4749_vm8 = vmmov %vm4748_vm7  ;;  %vm4750_vm13 = vcmask 457728  }
 0x4de   : > { %2012 = vst.msk [vmem:[#allocation4 + $0x10] sm:$0xff] %vm3876_vm3, %v2008_v0  ;;  %v2038_v11 = vrot.slane %v2035_v16, 4  ;;  %v1939_v12 = vsel %vm4745_vm14, %v4312_v29, %v1938_v31  ;;  %v1952_v13 = vpop.permute.xlu0 %1951  ;;  %vm4751_vm14 = vmmov %vm4750_vm13  ;;  %v1987_v8 = vrot.slane %v4325_v36, 4 }
 0x4df   : > { %1944 = vst.msk [vmem:[#allocation4 + $0x80] sm:$0xf] %vm356_vm0, %v1940_v37  ;;  %v1954_v5 = vrot.slane %v1952_v13, 4  ;;  %v3282_v63 = vcombine.low %v1922_v61, %v1939_v12  ;;  %v3283_v14 = vcombine.high %v1922_v61, %v1939_v12 }
 0x4e0   : > { %v2040_v57 = vsel %vm4746_vm5, %v2038_v11, %v2035_v16  ;;  %v2041_v17 = vsel %vm349_vm1, %v2038_v11, %v2039_v10  ;;  %vm4752_vm5 = vcmask 695296  }
 0x4e1   : > { %v2042_v26 = vsel %vm4747_vm6, %v2041_v17, %v2037_v51  ;;  %2045 = vst.msk [vmem:[#allocation4 + $0x38] sm:$0xff] %vm3779_vm15, %v2040_v57  ;;  %v2069_v34 = vpop.permute.xlu1 %2068  ;;  %v1955_v48 = vsel %vm349_vm1, %v1953_v9, %v1954_v5  ;;  %v1957_v29 = vsel %vm4748_vm7, %v1952_v13, %v1954_v5  ;;  %2343 = vmatprep.subr.bf16.mxu0 %v3283_v14  ;;  %vm4753_vm6 = vmmov %vm4752_vm5  ;;  %vm4754_vm7 = vcmask 687104  }
 0x4e2   : > { %2046 = vst.msk [vmem:[#allocation4 + $0x40] sm:$0xff] %vm3876_vm3, %v2042_v26  ;;  %v2072_v44 = vrot.slane %v2069_v34, 4  ;;  %v1956_v39 = vsel %vm4749_vm8, %v4315_v59, %v1955_v48  ;;  %v1969_v51 = vpop.permute.xlu0 %1968  ;;  %2344 = vmatpush1.bf16.msra.mxu0 %v3282_v63  ;;  %v2107_v59 = vrot.slane %v4338_v54, 4  ;;  %v2022_v57 = vrot.slane %v4332_v18, 4  ;;  %vm4755_vm8 = vmmov %vm4754_vm7 }
 0x4e3   : > { %1961 = vst.msk [vmem:[#allocation4 + $0x98] sm:$0xf] %vm356_vm0, %v1957_v29  ;;  %v1971_v55 = vrot.slane %v1969_v51, 4 }
 0x4e4   : > { %v2074_v60 = vsel %vm4750_vm13, %v2072_v44, %v2069_v34  ;;  %v2075_v47 = vsel %vm349_vm1, %v2072_v44, %v2073_v35 }
 0x4e5   : > { %v2076_v61 = vsel %vm4751_vm14, %v2075_v47, %v2071_v49  ;;  %2079 = vst.msk [vmem:[#allocation4 + $0x68] sm:$0xff] %vm3779_vm15, %v2074_v60  ;;  %v2103_v1 = vpop.permute.xlu1 %2102  ;;  %v1972_v42 = vsel %vm349_vm1, %v1970_v15, %v1971_v55  ;;  %v1974_v62 = vsel %vm4752_vm5, %v1969_v51, %v1971_v55  ;;  %v2056_v51 = vrot.slane %v4334_v50, 4 }
 0x4e6   : > { %2080 = vst.msk [vmem:[#allocation4 + $0x70] sm:$0xff] %vm3876_vm3, %v2076_v61  ;;  %v2106_v45 = vrot.slane %v2103_v1, 4  ;;  %v1973_v0 = vsel %vm4753_vm6, %v4320_v30, %v1972_v42  ;;  %v1986_v49 = vpop.permute.xlu0 %1985  ;;  %v2090_v61 = vrot.slane %v4336_v53, 4 }
 0x4e7   : > { %1978 = vst.msk [vmem:[#allocation4 + $0xb0] sm:$0xf] %vm356_vm0, %v1974_v62  ;;  %v1988_v16 = vrot.slane %v1986_v49, 4  ;;  %v3288_v37 = vcombine.low %v1956_v39, %v1973_v0  ;;  %v3289_v12 = vcombine.high %v1956_v39, %v1973_v0  ;;  %v4419_v39 = vld [vmem:[%s4676_s5] sm:$0xff]  }
 0x4e8   : > { %v2108_v10 = vsel %vm1432_vm12, %v2106_v45, %v2103_v1  ;;  %v2109_v31 = vsel %vm349_vm1, %v2106_v45, %v2107_v59 }
 0x4e9   : > { %v2110_v11 = vsel %vm1432_vm12, %v2109_v31, %v4338_v54  ;;  %2113 = vst.msk [vmem:[#allocation4 + $0x98] sm:$0xff] %vm3779_vm15, %v2108_v10  ;;  %v4391_v9 = vpop.permute.xlu1 %2136  ;;  %v1989_v30 = vsel %vm349_vm1, %v1987_v8, %v1988_v16  ;;  %v1991_v13 = vsel %vm4754_vm7, %v1986_v49, %v1988_v16  ;;  %2345 = vmatprep.subr.bf16.mxu0 %v3289_v12  ;;  %vm4756_vm12 = vcmask 613376  }
 0x4ea   : > { %2114 = vst.msk [vmem:[#allocation4 + $0xa0] sm:$0xff] %vm3876_vm3, %v2110_v11  ;;  %v2140_v5 = vrot.slane %v4391_v9, 4  ;;  %v1990_v54 = vsel %vm4755_vm8, %v4325_v36, %v1989_v30  ;;  %v2018_v17 = vpop.permute.xlu0 %2017  ;;  %2346 = vmatpush1.bf16.msra.mxu0 %v3288_v37 }
 0x4eb   : > { %1995 = vst.msk [vmem:[#allocation4 + $0xc8] sm:$0xf] %vm356_vm0, %v1991_v13  ;;  %v2021_v63 = vrot.slane %v2018_v17, 4  ;;  %v3295_v34 = vcombine.high %v1990_v54, %v1990_v54  ;;  %v3294_v14 = vcombine.low %v1990_v54, %v1990_v54  ;;  %vm4757_vm0 = vmmov %vm4756_vm12 }
 0x4ec   : > { %v2142_v26 = vsel %vm1468_vm4, %v2140_v5, %v4391_v9  ;;  %v3553_v9 = vld [vmem:[%s4673_s2 + $0x40] sm:$0xff]  }
 0x4ed   : > { %2147 = vst.msk [vmem:[#allocation4 + $0xc8] sm:$0xff] %vm3779_vm15, %v2142_v26  ;;  %v2023_v35 = vsel %vm4756_vm12, %v2021_v63, %v2018_v17  ;;  %v2024_v36 = vsel %vm349_vm1, %v2021_v63, %v2022_v57  ;;  %3300 = vmatprep.subr.msk.bf16.mxu0 %vm349_vm1, %v3295_v34  ;;  %v2322_v48 = vsel %vm349_vm1, %v3294_v14, 0 }
 0x4ee   : > { %v2025_v29 = vsel %vm4757_vm0, %v2024_v36, %v4332_v18  ;;  %2028 = vst.msk [vmem:[#allocation4 + $0x20] sm:$0xff] %vm3779_vm15, %v2023_v35  ;;  %v2052_v44 = vpop.permute.xlu0 %2051  ;;  %2348 = vmatpush1.bf16.msra.mxu0 %v2322_v48 }
 0x4ef   : > { %2029 = vst.msk [vmem:[#allocation4 + $0x28] sm:$0xff] %vm3876_vm3, %v2025_v29  ;;  %v2055_v15 = vrot.slane %v2052_v44, 4 }
 0x4f1   : > { %v2057_v55 = vsel %vm1378_vm11, %v2055_v15, %v2052_v44  ;;  %v2058_v18 = vsel %vm349_vm1, %v2055_v15, %v2056_v51  ;;  %3301 = vmatmul.mubr.msk.bf16.vlgmr.msra.gmra.mrb[28].mxu0 %vm865_vm9, %v4419_v39 }
 0x4f2   : > { %v2059_v60 = vsel %vm1378_vm11, %v2058_v18, %v4334_v50  ;;  %2062 = vst.msk [vmem:[#allocation4 + $0x50] sm:$0xff] %vm3779_vm15, %v2057_v55  ;;  %v2086_v47 = vpop.permute.xlu0 %2085  ;;  %2457 = vmatprep.mubr.bf16.mxu0 %v3617_v6  ;;  %v3557_v18 = vld [vmem:[%s4673_s2 + $0x48] sm:$0xff]  }
 0x4f3   : > { %2063 = vst.msk [vmem:[#allocation4 + $0x58] sm:$0xff] %vm3876_vm3, %v2059_v60  ;;  %v2089_v1 = vrot.slane %v2086_v47, 4 }
 0x4f4   : > { %v2176_v14 = vld [vmem:[#allocation4 + $0xc8] sm:$0xff] }
 0x4f5   : > { %v2091_v59 = vsel %vm1414_vm2, %v2089_v1, %v2086_v47  ;;  %v2092_v42 = vsel %vm349_vm1, %v2089_v1, %v2090_v61  ;;  %v3526_v50 = vld [vmem:[#allocation4 + $0x8] ss:$24 sps:$4 sm:$0xff]   ;;  %v3528_v62 = vld [vmem:[#allocation4 + $0xc] ss:$24 sps:$4 sm:$0xff]   ;;  %v3297_v44 = vcombine.high %v2176_v14, %v2176_v14  ;;  %v3296_v51 = vcombine.low %v2176_v14, %v2176_v14  ;;  %v3559_v1 = vld [vmem:[%s4673_s2 + $0xc0] sm:$0xff]  }
 0x4f6   : > { %v2093_v45 = vsel %vm1414_vm2, %v2092_v42, %v4336_v53  ;;  %2096 = vst.msk [vmem:[#allocation4 + $0x80] sm:$0xff] %vm3779_vm15, %v2091_v59  ;;  %v2120_v8 = vpop.permute.xlu0 %2119  ;;  %v3530_v0 = vld [vmem:[#allocation4 + $0x10] ss:$24 sps:$4 sm:$0xff]   ;;  %v3532_v49 = vld [vmem:[#allocation4 + $0x14] ss:$24 sps:$4 sm:$0xff]   ;;  %2382 = vmatprep.subr.bf16.mxu1 %v3528_v62  ;;  %v3558_v59 = vld [vmem:[%s4673_s2 + $0x8] sm:$0xff]  }
 0x4f7   : > { %2097 = vst.msk [vmem:[#allocation4 + $0x88] sm:$0xff] %vm3876_vm3, %v2093_v45  ;;  %v2123_v16 = vrot.slane %v2120_v8, 4  ;;  %2383 = vmatpush1.bf16.msra.mxu1 %v3526_v50  ;;  %2425 = vmatprep.subr.bf16.mxu0 %v3532_v49  ;;  %v2328_v55 = vsel %vm349_vm1, %v3296_v51, 0  ;;  %v3561_v50 = vld [vmem:[%s4673_s2 + $0x50] sm:$0xff]   ;;  %v3560_v62 = vld [vmem:[%s4673_s2 + $0x80] sm:$0xff]   ;;  %v3564_v45 = vld [vmem:[%s4673_s2 + $0x88] sm:$0xff]  }
 0x4f8   : > { %2426 = vmatpush1.bf16.msra.mxu0 %v3530_v0  ;;  %v3570_v0 = vld [vmem:[%s4673_s2 + $0x20] sm:$0xff]   ;;  %v3573_v49 = vld [vmem:[%s4673_s2 + $0x68] sm:$0xff]   ;;  %v3589_v14 = vld [vmem:[%s4673_s2 + $0x110] sm:$0xff]  }
 0x4f9   : > { %v2125_v10 = vsel %vm1450_vm10, %v2123_v16, %v2120_v8  ;;  %v3533_v31 = vld [vmem:[#allocation4 + $0x38] ss:$24 sps:$4 sm:$0xff]   ;;  %v3535_v37 = vld [vmem:[#allocation4 + $0x3c] ss:$24 sps:$4 sm:$0xff]   ;;  %v3567_v8 = vld [vmem:[%s4673_s2 + $0xd0] sm:$0xff]  }
 0x4fa   : > { %2130 = vst.msk [vmem:[#allocation4 + $0xb0] sm:$0xff] %vm3779_vm15, %v2125_v10  ;;  %v2122_v53 = vpop.permute.xlu0 %2121  ;;  %v3536_v11 = vld [vmem:[#allocation4 + $0x40] ss:$24 sps:$4 sm:$0xff]   ;;  %v3538_v12 = vld [vmem:[#allocation4 + $0x44] ss:$24 sps:$4 sm:$0xff]   ;;  %2384 = vmatprep.subr.bf16.mxu1 %v3535_v37  ;;  %v3575_v10 = vld [vmem:[%s4673_s2 + $0xe0] sm:$0xff]  }
 0x4fb   : > { %v2124_v30 = vrot.slane %v2122_v53, 4  ;;  %2385 = vmatpush1.bf16.msra.mxu1 %v3533_v31  ;;  %2427 = vmatprep.subr.bf16.mxu0 %v3538_v12  ;;  %v3574_v31 = vld [vmem:[%s4673_s2 + $0x28] sm:$0xff]   ;;  %v3577_v37 = vld [vmem:[%s4673_s2 + $0x70] sm:$0xff]  }
 0x4fc   : > { %2428 = vmatpush1.bf16.msra.mxu0 %v3536_v11  ;;  %v3579_v11 = vld [vmem:[%s4673_s2 + $0xe8] sm:$0xff]   ;;  %v3578_v12 = vld [vmem:[%s4673_s2 + $0x30] sm:$0xff]  }
 0x4fd   : > { %v2126_v13 = vsel %vm349_vm1, %v2123_v16, %v2124_v30  ;;  %v3539_v57 = vld [vmem:[#allocation4 + $0x68] ss:$24 sps:$4 sm:$0xff]   ;;  %v3541_v54 = vld [vmem:[#allocation4 + $0x6c] ss:$24 sps:$4 sm:$0xff]  }
 0x4fe   : > { %v2127_v17 = vsel %vm1450_vm10, %v2126_v13, %v2122_v53  ;;  %v2139_v63 = vpop.permute.xlu0 %2138  ;;  %v3542_v26 = vld [vmem:[#allocation4 + $0x70] ss:$24 sps:$4 sm:$0xff]   ;;  %v3544_v34 = vld [vmem:[#allocation4 + $0x74] ss:$24 sps:$4 sm:$0xff]   ;;  %2386 = vmatprep.subr.bf16.mxu1 %v3541_v54  ;;  %v3580_v13 = vld [vmem:[%s4673_s2 + $0xa8] sm:$0xff]  }
 0x4ff   : > { %2131 = vst.msk [vmem:[#allocation4 + $0xb8] sm:$0xff] %vm3876_vm3, %v2127_v17  ;;  %v2141_v27 = vrot.slane %v2139_v63, 4  ;;  %2387 = vmatpush1.bf16.msra.mxu1 %v3539_v57  ;;  %2429 = vmatprep.subr.bf16.mxu0 %v3544_v34  ;;  %v3572_v16 = vld [vmem:[%s4673_s2 + $0x98] sm:$0xff]   ;;  %v3576_v53 = vld [vmem:[%s4673_s2 + $0xa0] sm:$0xff]   ;;  %v3583_v57 = vld [vmem:[%s4673_s2 + $0xf0] sm:$0xff]  }
 0x500   : > { %2430 = vmatpush1.bf16.msra.mxu0 %v3542_v26  ;;  %v3581_v30 = vld [vmem:[%s4673_s2 + $0x78] sm:$0xff]   ;;  %v3584_v17 = vld [vmem:[%s4673_s2 + $0xb0] sm:$0xff]   ;;  %v3587_v26 = vld [vmem:[%s4673_s2 + $0x100] sm:$0xff]  }
 0x501   : > { %v2143_v35 = vsel %vm349_vm1, %v2140_v5, %v2141_v27  ;;  %v3545_v36 = vld [vmem:[#allocation4 + $0x98] ss:$24 sps:$4 sm:$0xff]   ;;  %v3547_v48 = vld [vmem:[#allocation4 + $0x9c] ss:$24 sps:$4 sm:$0xff]   ;;  %v3582_v54 = vld [vmem:[%s4673_s2 + $0x38] sm:$0xff]  }
 0x502   : > { %v2144_v29 = vsel %vm1468_vm4, %v2143_v35, %v2139_v63  ;;  %2388 = vmatprep.subr.bf16.mxu1 %v3547_v48  ;;  %v3585_v63 = vld [vmem:[%s4673_s2 + $0xf8] sm:$0xff]   ;;  %v3588_v27 = vld [vmem:[%s4673_s2 + $0x108] sm:$0xff]  }
 0x503   : > { %2148 = vst.msk [vmem:[#allocation4 + $0xd0] sm:$0xff] %vm3876_vm3, %v2144_v29  ;;  %2389 = vmatpush1.bf16.msra.mxu1 %v3545_v36  ;;  %v3586_v34 = vld [vmem:[%s4673_s2 + $0xb8] sm:$0xff]   ;;  %v3596_v35 = vld [vmem:[%s4673_s2 + $0x148] sm:$0xff]   ;;  %v3597_v36 = vld [vmem:[%s4673_s2 + $0x150] sm:$0xff]   ;;  %vm4758_vm3 = vcmask 670720  }
 0x504   : > { %3302 = vmatprep.subr.msk.bf16.mxu1 %vm349_vm1, %v3297_v44  ;;  %v3598_v48 = vld [vmem:[%s4673_s2 + $0x158] sm:$0xff]   ;;  %v3599_v29 = vld [vmem:[%s4673_s2 + $0x160] sm:$0xff]   ;;  %v3600_v44 = vld [vmem:[%s4673_s2 + $0x168] ss:$0 sps:$4 sm:$0x11]  }
 0x505   : > { %vm4760_vm15 = vmmov %vm4758_vm3 }
 0x506   : > { %v3550_v15 = vld [vmem:[#allocation4 + $0xa0] ss:$24 sps:$4 sm:$0xff]   ;;  %v3552_v5 = vld [vmem:[#allocation4 + $0xa4] ss:$24 sps:$4 sm:$0xff]  }
 0x507   : > { %2391 = vmatpush1.bf16.msra.mxu1 %v2328_v55  ;;  %2431 = vmatprep.subr.bf16.mxu0 %v3552_v5 }
 0x508   : > { %2432 = vmatpush1.bf16.msra.mxu0 %v3550_v15  ;;  %3372 = vmatprep.subr.bf16.mxu1 %v3553_v9  ;;  %v2593_v9 = vld [vmem:[%s4679_s8 + $0x10] sm:$0xff]  ;;  %v2595_v15 = vld [vmem:[%s4679_s8 + $0x20] sm:$0xff] }
 0x509   : > { %2608 = vperm.xlu1 %3480, %v2593_v9  }
 0x50a   : > { %v2177_v60 = vld [vmem:[#allocation4 + $0xd0] sm:$0xff]  ;;  %3303 = vmatmul.mubr.msk.bf16.vlgmr.msra.gmra.mrb[8].mxu1 %vm865_vm9, %v4419_v39 }
 0x50b   : > { %v3299_v47 = vcombine.high %v2177_v60, %v2177_v60  ;;  %v3298_v61 = vcombine.low %v2177_v60, %v2177_v60  ;;  %3373 = vmatpush3.bf16.msra.mxu1 %v3555_v7  ;;  %2940 = vmatprep.mubr.bf16.mxu1 %v2469_v41  ;;  %v3565_v41 = vld [vmem:[%s4673_s2 + $0x58] sm:$0xff]  }
 0x50c   : > { %3374 = vmatprep.subr.bf16.mxu1 %v3557_v18 }
 0x50d   : > { %3304 = vmatprep.subr.msk.bf16.mxu0 %vm349_vm1, %v3299_v47  ;;  %v2334_v42 = vsel %vm349_vm1, %v3298_v61, 0  ;;  %vm2904_vm1 = vcmask 1040384   ;;  %2618 = vperm.xlu1 %3480, %v2595_v15   ;;  %v3306_v61 = vcombine.low %v3785_v32, %v3785_v32 }
 0x50e   : > { %2434 = vmatpush1.bf16.msra.mxu0 %v2334_v42  ;;  %v2906_v51 = vsel %vm2904_vm1, %v3600_v44, 0 }
 0x50f   : > { %3406 = vmatprep.subr.bf16.mxu0 %v3559_v1  ;;  %3375 = vmatpush3.bf16.msra.mxu1 %v3558_v59 }
 0x510   : > { %3376 = vmatprep.subr.bf16.mxu1 %v3561_v50 }
 0x511   : > { %3305 = vmatmul.mubr.msk.bf16.vlgmr.msra.gmra.mrb[32].mxu0 %vm865_vm9, %v4419_v39  ;;  %v3566_v39 = vld [vmem:[%s4673_s2 + $0x18] sm:$0xff]   ;;  %vm4759_vm9 = vmmov %vm4758_vm3 }
 0x512   : > { %3407 = vmatpush3.bf16.msra.mxu0 %v3560_v62  ;;  %2996 = vmatprep.mubr.bf16.mxu0 %v2471_v4  ;;  %v3571_v4 = vld [vmem:[%s4673_s2 + $0xd8] sm:$0xff]  }
 0x513   : > { %3408 = vmatprep.subr.bf16.mxu0 %v3563_v38  ;;  %3377 = vmatpush3.bf16.msra.mxu1 %v3562_v56 }
 0x514   : > { %3378 = vmatprep.subr.bf16.mxu1 %v3565_v41 }
 0x516   : > { %3409 = vmatpush3.bf16.msra.mxu0 %v3564_v45 }
 0x517   : > { %3410 = vmatprep.subr.bf16.mxu0 %v3567_v8  ;;  %3379 = vmatpush3.bf16.msra.mxu1 %v3566_v39 }
 0x518   : > { %3380 = vmatprep.subr.bf16.mxu1 %v3569_v3 }
 0x51a   : > { %3411 = vmatpush3.bf16.msra.mxu0 %v3568_v43 }
 0x51b   : > { %3412 = vmatprep.subr.bf16.mxu0 %v3571_v4  ;;  %3381 = vmatpush3.bf16.msra.mxu1 %v3570_v0 }
 0x51c   : > { %3382 = vmatprep.subr.bf16.mxu1 %v3573_v49  ;;  %v2599_v49 = vpop.permute.xlu1 %2598 }
 0x51e   : > { %3413 = vmatpush3.bf16.msra.mxu0 %v3572_v16 }
 0x51f   : > { %3414 = vmatprep.subr.bf16.mxu0 %v3575_v10  ;;  %3383 = vmatpush3.bf16.msra.mxu1 %v3574_v31 }
 0x520   : > { %3384 = vmatprep.subr.bf16.mxu1 %v3577_v37 }
 0x522   : > { %3415 = vmatpush3.bf16.msra.mxu0 %v3576_v53  ;;  %v2604_v53 = vpop.permute.xlu0 %2603 }
 0x523   : > { %3416 = vmatprep.subr.bf16.mxu0 %v3579_v11  ;;  %3385 = vmatpush3.bf16.msra.mxu1 %v3578_v12 }
 0x524   : > { %3386 = vmatprep.subr.bf16.mxu1 %v3581_v30 }
 0x526   : > { %3417 = vmatpush3.bf16.msra.mxu0 %v3580_v13 }
 0x527   : > { %3418 = vmatprep.subr.bf16.mxu0 %v3583_v57  ;;  %3387 = vmatpush3.bf16.msra.mxu1 %v3582_v54 }
 0x528   : > { %3020 = vmatprep.subr.bf16.mxu1 %v3617_v6 }
 0x52a   : > { %3419 = vmatpush3.bf16.msra.mxu0 %v3584_v17  ;;  %2941 = vmatmul.mubr.bf16.vlgmr.msra.gmra.mrb[12].mxu1 %v2468_v40  ;;  %v3592_v40 = vld [vmem:[%s4673_s2 + $0x128] sm:$0xff]  }
 0x52b   : > { %3420 = vmatprep.subr.bf16.mxu0 %v3585_v63  ;;  %3021 = vmatpush1.bf16.msra.mxu1 %v3587_v26 }
 0x52c   : > { %3022 = vmatprep.subr.bf16.mxu1 %v3617_v6 }
 0x52e   : > { %3421 = vmatpush3.bf16.msra.mxu0 %v3586_v34 }
 0x52f   : > { %3023 = vmatpush1.bf16.msra.mxu1 %v3588_v27 }
 0x530   : > { %3024 = vmatprep.subr.bf16.mxu1 %v3617_v6 }
 0x531   : > { %2997 = vmatmul.mubr.bf16.vlgmr.msra.gmra.mrb[36].mxu0 %v2470_v58  ;;  %v3595_v58 = vld [vmem:[%s4673_s2 + $0x140] sm:$0xff]  }
 0x533   : > { %3025 = vmatpush1.bf16.msra.mxu1 %v3589_v14 }
 0x534   : > { %3026 = vmatprep.subr.bf16.mxu1 %v3617_v6 }
 0x537   : > { %3027 = vmatpush1.bf16.msra.mxu1 %v3590_v25 }
 0x538   : > { %3028 = vmatprep.subr.bf16.mxu1 %v3617_v6 }
 0x53b   : > { %3029 = vmatpush1.bf16.msra.mxu1 %v3591_v28 }
 0x53c   : > { %3030 = vmatprep.subr.bf16.mxu1 %v3617_v6 }
 0x53f   : > { %3031 = vmatpush1.bf16.msra.mxu1 %v3592_v40 }
 0x540   : > { %3032 = vmatprep.subr.bf16.mxu1 %v3617_v6 }
 0x543   : > { %3033 = vmatpush1.bf16.msra.mxu1 %v3593_v2 }
 0x544   : > { %3034 = vmatprep.subr.bf16.mxu1 %v3617_v6 }
 0x547   : > { %3035 = vmatpush1.bf16.msra.mxu1 %v3594_v52 }
 0x548   : > { %3036 = vmatprep.subr.bf16.mxu1 %v3617_v6 }
 0x54b   : > { %3037 = vmatpush1.bf16.msra.mxu1 %v3595_v58 }
 0x54c   : > { %3038 = vmatprep.subr.bf16.mxu1 %v3617_v6 }
 0x54f   : > { %3039 = vmatpush1.bf16.msra.mxu1 %v3596_v35 }
 0x550   : > { %3040 = vmatprep.subr.bf16.mxu1 %v3617_v6 }
 0x553   : > { %3041 = vmatpush1.bf16.msra.mxu1 %v3597_v36 }
 0x554   : > { %3042 = vmatprep.subr.bf16.mxu1 %v3617_v6 }
 0x557   : > { %3043 = vmatpush1.bf16.msra.mxu1 %v3598_v48 }
 0x558   : > { %3044 = vmatprep.subr.bf16.mxu1 %v3617_v6 }
 0x55b   : > { %3045 = vmatpush1.bf16.msra.mxu1 %v3599_v29 }
 0x55c   : > { %3046 = vmatprep.subr.bf16.mxu1 %v3617_v6  ;;  %v3307_v6 = vcombine.high %v3785_v32, %v3785_v32  ;;  %v3309_v32 = vcombine.high %v3916_v46, %v3916_v46 }
 0x55f   : > { %3047 = vmatpush1.bf16.msra.mxu1 %v2906_v51 }
 0x588   : > { %v2609_v51 = vpop.permute.xlu1 %2608 }
 0x5c4   : > { %v2373_v5 = vpop.f32.mrb[28].mxu0 }
 0x5c5   : > { %v2375_v55 = vpop.f32.mrb[29].mxu0 }
 0x5c6   : > { %v2377_v7 = vpop.f32.mrb[30].mxu0 }
 0x5c7   : > { %v2474_v18 = vpack.c.bf16 %v2377_v7, %v2373_v5  ;;  %v2379_v60 = vpop.f32.mrb[31].mxu0 }
 0x5c8   : > { %v2475_v47 = vpack.c.bf16 %v2379_v60, %v2375_v55 }
 0x5ca   : > { %2948 = vmatprep.mubr.bf16.mxu1 %v2475_v47 }
 0x5cb   : > { %2949 = vmatmul.mubr.bf16.gmra.mrb[16].mxu1 %v2474_v18  ;;  %v2614_v18 = vpop.permute.xlu0 %2613 }
 0x5cc   : > { %2956 = vmatprep.mubr.bf16.mxu1 %v3307_v6 }
 0x5d3   : > { %2957 = vmatmul.mubr.bf16.gmra.mrb[20].mxu1 %v3306_v61 }
 0x5d4   : > { %3358 = vmatprep.mubr.msk.bf16.mxu1 %vm4758_vm3, %v2473_v24 }
 0x5db   : > { %3053 = vmatmul.mubr.bf16.vlgmr.msra.gmra.mrb[24].mxu1 %v2472_v22  ;;  %v3310_v22 = vcombine.low %v3950_v33, %v3950_v33 }
 0x5dd   : > { %v2416_v1 = vpop.f32.mrb[8].mxu1 }
 0x5de   : > { %v2418_v59 = vpop.f32.mrb[9].mxu1 }
 0x5df   : > { %v2420_v42 = vpop.f32.mrb[10].mxu1 }
 0x5e0   : > { %v2476_v50 = vpack.c.bf16 %v2420_v42, %v2416_v1  ;;  %v2422_v62 = vpop.f32.mrb[11].mxu1  ;;  %v2619_v42 = vpop.permute.xlu1 %2618 }
 0x5e1   : > { %v2477_v38 = vpack.c.bf16 %v2422_v62, %v2418_v59 }
 0x5e3   : > { %3004 = vmatprep.mubr.bf16.mxu0 %v2477_v38 }
 0x5e4   : > { %v2459_v56 = vpop.f32.mrb[32].mxu0  ;;  %3005 = vmatmul.mubr.bf16.gmra.mrb[40].mxu0 %v2476_v50 }
 0x5e5   : > { %v2461_v41 = vpop.f32.mrb[33].mxu0  ;;  %3012 = vmatprep.mubr.bf16.mxu0 %v3309_v32 }
 0x5e6   : > { %v2463_v20 = vpop.f32.mrb[34].mxu0 }
 0x5e7   : > { %v2478_v23 = vpack.c.bf16 %v2463_v20, %v2459_v56  ;;  %v2465_v24 = vpop.f32.mrb[35].mxu0 }
 0x5e8   : > { %v2479_v45 = vpack.c.bf16 %v2465_v24, %v2461_v41 }
 0x5ea   : > { %3359 = vmatprep.mubr.msk.bf16.mxu1 %vm4759_vm9, %v2479_v45 }
 0x5eb   : > { %3061 = vmatmul.mubr.bf16.gmra.mrb[28].mxu1 %v2478_v23 }
 0x5ec   : > { %3360 = vmatprep.mubr.msk.bf16.mxu1 %vm4760_vm15, %v3311_v19  ;;  %3013 = vmatmul.mubr.bf16.gmra.mrb[44].mxu0 %v3308_v21 }
 0x5f3   : > { %3069 = vmatmul.mubr.bf16.gmra.mrb[32].mxu1 %v3310_v22 }
 0x5fd   : > { %v3388_v8 = vpop.f32.mrb[12].mxu1 }
 0x5fe   : > { %v3389_v39 = vpop.f32.mrb[13].mxu1 }
 0x5ff   : > { %v3390_v3 = vadd.f32 %v3389_v39, %v3388_v8  ;;  %v3391_v43 = vpop.f32.mrb[14].mxu1 }
 0x600   : > { %v3392_v4 = vpop.f32.mrb[15].mxu1 }
 0x601   : > { %v3393_v0 = vadd.f32 %v3392_v4, %v3391_v43  ;;  %v2943_v31 = vadd.f32 %v3390_v3, %v2599_v49 }
 0x603   : > { %v2946_v12 = vadd.f32 %v3393_v0, %v2604_v53 }
 0x604   : > { %v3422_v16 = vpop.f32.mrb[36].mxu0 }
 0x605   : > { %v3423_v10 = vpop.f32.mrb[37].mxu0 }
 0x606   : > { %v3424_v37 = vadd.f32 %v3423_v10, %v3422_v16  ;;  %v3425_v46 = vpop.f32.mrb[38].mxu0 }
 0x607   : > { %v3426_v11 = vpop.f32.mrb[39].mxu0 }
 0x608   : > { %v3427_v30 = vadd.f32 %v3426_v11, %v3425_v46  ;;  %v2999_v33 = vadd.f32 %v3424_v37, %v2943_v31 }
 0x60a   : > { %v3002_v13 = vadd.f32 %v3427_v30, %v2946_v12 }
 0x69e   : > { %v3394_v57 = vpop.f32.mrb[16].mxu1 }
 0x69f   : > { %v3395_v54 = vpop.f32.mrb[17].mxu1 }
 0x6a0   : > { %v3396_v17 = vadd.f32 %v3395_v54, %v3394_v57  ;;  %v3397_v63 = vpop.f32.mrb[18].mxu1 }
 0x6a1   : > { %v3398_v26 = vpop.f32.mrb[19].mxu1 }
 0x6a2   : > { %v3399_v34 = vadd.f32 %v3398_v26, %v3397_v63  ;;  %v2951_v5 = vadd.f32 %v3396_v17, %v2609_v51 }
 0x6a4   : > { %v2954_v47 = vadd.f32 %v3399_v34, %v2614_v18 }
 0x6a6   : > { %v3400_v27 = vpop.f32.mrb[20].mxu1 }
 0x6a7   : > { %v3401_v14 = vpop.f32.mrb[21].mxu1 }
 0x6a8   : > { %v3402_v25 = vadd.f32 %v3401_v14, %v3400_v27  ;;  %v3403_v28 = vpop.f32.mrb[22].mxu1 }
 0x6a9   : > { %v3404_v40 = vpop.f32.mrb[23].mxu1 }
 0x6aa   : > { %v2959_v24 = vadd.f32 %v3402_v25, %v2619_v42 }
 0x6ae   : > { %v3054_v2 = vpop.f32.mrb[24].mxu1 }
 0x6af   : > { %v3055_v52 = vadd.f32 %v3054_v2, %v2999_v33  ;;  %v3056_v58 = vpop.f32.mrb[25].mxu1 }
 0x6b0   : > { %v3057_v35 = vpop.f32.mrb[26].mxu1 }
 0x6b1   : > { %v3087_v36 = vmax.f32 %v3055_v52, 0.0  ;;  %v3058_v48 = vadd.f32 %v3057_v35, %v3002_v13  ;;  %v3059_v29 = vpop.f32.mrb[27].mxu1 }
 0x6b3   : > { %3097 = vst [vmem:[%s4661_s26] sm:$0xff] %v3087_v36  ;;  %v3088_v44 = vmax.f32 %v3058_v48, 0.0 }
 0x6b5   : > { %3098 = vst [vmem:[%s4661_s26 + $0x8] sm:$0xff] %v3088_v44 }
 0x6b7   : > { %v3428_v9 = vpop.f32.mrb[40].mxu0 }
 0x6b8   : > { %v3429_v15 = vpop.f32.mrb[41].mxu0 }
 0x6b9   : > { %v3430_v55 = vadd.f32 %v3429_v15, %v3428_v9  ;;  %v3431_v7 = vpop.f32.mrb[42].mxu0 }
 0x6ba   : > { %v3432_v60 = vpop.f32.mrb[43].mxu0 }
 0x6bb   : > { %v3433_v6 = vadd.f32 %v3432_v60, %v3431_v7  ;;  %v3007_v61 = vadd.f32 %v3430_v55, %v2951_v5 }
 0x6bd   : > { %v3010_v59 = vadd.f32 %v3433_v6, %v2954_v47 }
 0x6be   : > { %v3062_v1 = vpop.f32.mrb[28].mxu1 }
 0x6bf   : > { %v3063_v50 = vadd.f32 %v3062_v1, %v3007_v61  ;;  %v3064_v62 = vpop.f32.mrb[29].mxu1  ;;  %v3434_v56 = vpop.f32.mrb[44].mxu0 }
 0x6c0   : > { %v3065_v38 = vpop.f32.mrb[30].mxu1  ;;  %v3435_v23 = vpop.f32.mrb[45].mxu0 }
 0x6c1   : > { %v3089_v32 = vmax.f32 %v3063_v50, 0.0  ;;  %v3066_v41 = vadd.f32 %v3065_v38, %v3010_v59  ;;  %v3067_v20 = vpop.f32.mrb[31].mxu1  ;;  %v3436_v45 = vadd.f32 %v3435_v23, %v3434_v56  ;;  %v3437_v19 = vpop.f32.mrb[46].mxu0 }
 0x6c2   : > { %v3438_v22 = vpop.f32.mrb[47].mxu0 }
 0x6c3   : > { %3099 = vst [vmem:[%s4661_s26 + $0x10] sm:$0xff] %v3089_v32  ;;  %v3090_v21 = vmax.f32 %v3066_v41, 0.0  ;;  %v3015_v8 = vadd.f32 %v3436_v45, %v2959_v24 }
 0x6c5   : > { %3100 = vst [vmem:[%s4661_s26 + $0x18] sm:$0xff] %v3090_v21 }
 0x6c6   : > { %v3070_v39 = vpop.f32.mrb[32].mxu1 }
 0x6c7   : > { %v3071_v3 = vadd.f32 %v3070_v39, %v3015_v8  ;;  %v3072_v43 = vpop.f32.mrb[33].mxu1 }
 0x6c8   : > { %v3073_v4 = vpop.f32.mrb[34].mxu1 }
 0x6c9   : > { %3101 = vst [vmem:[%s4661_s26 + $0x20] sm:$0xff] %v3071_v3  ;;  %v3074_v0 = vpop.f32.mrb[35].mxu1 }
 0x6ca PF: > { %s19_s30 = sadd.s32 1, %s3607_s30  }
 0x6cb   : > { %p16_p5 = scmp.ge.s32.totalorder %s19_s30, 4  }
 0x6cd   :  { %18 = sbr.rel (!%p16_p5) target bundleno = 1 (0x1), region = 87 }

</bundles_post_ra>
